<compile_context>
chip_gen: v7x
topology: tpu7x:2x2x1
jax: 0.10.0
libtpu: 0.0.40
codegen_flags: <defaults>
</compile_context>

<pallas_src>
import functools

import jax
import jax.numpy as jnp
from jax import lax
from jax.experimental import pallas as pl
from jax.experimental.pallas import tpu as pltpu


def _attention_kernel(x_ref, wqkv_ref, wo_ref, bo_ref, o_ref, hd_ref, *,
                      heads, dim_head, b_blk):
    """Per grid step: b_blk batch elements, fused qkv -> heads -> to_out (+bias)."""
    hidden = heads * dim_head
    wqkv_t = wqkv_ref[...]            # (c, 3*hidden) f32, scale folded into q cols
    wo = wo_ref[...]                  # (c, hidden)   f32
    bo = bo_ref[...]                  # (c, 1)        f32

    for bi in range(b_blk):
        x = x_ref[bi]                 # (c, n) f32, channels-first tokens

        # Fused qkv projection (1x1 conv == channel matmul); both operands lane-dense.
        qkv = lax.dot_general(wqkv_t, x, (((0,), (0,)), ((), ())),
                              preferred_element_type=jnp.float32)       # (3*hidden, n)

        for hh in range(heads):
            lo = hh * dim_head
            q = qkv[lo:lo + dim_head, :].astype(jnp.bfloat16)            # (d, n_i), pre-scaled
            k = qkv[hidden + lo:hidden + lo + dim_head, :].astype(jnp.bfloat16)  # (d, n_j)
            v = qkv[2 * hidden + lo:2 * hidden + lo + dim_head, :]       # (d, n_j) f32

            # sim_t[j, i] = sum_d k[d, j] * q[d, i]  -> softmax axis j lives on sublanes.
            sim_t = lax.dot_general(k, q, (((0,), (0,)), ((), ())),
                                    preferred_element_type=jnp.float32)  # (n_j, n_i)

            # Numerically-stable softmax over j (axis 0), all in f32.
            sim_t = sim_t - jnp.max(sim_t, axis=0, keepdims=True)
            p_t = jnp.exp(sim_t)                                         # (n_j, n_i) f32
            inv_l = pl.reciprocal(jnp.sum(p_t, axis=0, keepdims=True),
                                  approx=True)                           # (1, n_i)

            # Unnormalized head output: out_u[d, i] = sum_j v[d, j] * p_t[j, i]  (MXU, bf16 in / f32 acc).
            out_u = jnp.dot(v.astype(jnp.bfloat16), p_t.astype(jnp.bfloat16),
                            preferred_element_type=jnp.float32)          # (d, n_i)

            # Deferred softmax normalization on the (d, n) output; write straight
            # into the head-major (hidden, n) scratch slab (sublane-aligned rows).
            hd_ref[lo:lo + dim_head, :] = out_u * inv_l

        # to_out 1x1 conv: (c, hidden) @ (hidden, n) -> (c, n), plus bias.
        out = jnp.dot(wo, hd_ref[...], preferred_element_type=jnp.float32)
        o_ref[bi] = (out + bo).astype(o_ref.dtype)


def attention_forward(x, w_qkv, w_out, b_out, *, heads=4, dim_head=32,
                      batch_block=1):
    """x: (b, c, h, w) NCHW.  w_qkv: (3*heads*dim_head, c).  w_out: (c, heads*dim_head).
    b_out: (c,).  Returns (b, c, h, w)."""
    b, c, h, w = x.shape
    n = h * w
    hidden = heads * dim_head
    scale = dim_head ** (-0.5)

    if b % batch_block != 0:
        batch_block = 1
    grid_b = b // batch_block

    # Channels-first tokens: NCHW -> (b, c, n) is a pure reshape (no transpose).
    x_flat = x.reshape(b, c, n)

    # One-time host-side weight prep: fold `scale` into the q rows of w_qkv and
    # pre-transpose to (c, 3*hidden) so the in-kernel qkv matmul is lane-dense.
    wqkv_scaled = jnp.concatenate([w_qkv[:hidden] * scale, w_qkv[hidden:]], axis=0)
    wqkv_t = jnp.transpose(wqkv_scaled)                 # (c, 3*hidden)
    bo = b_out.reshape(c, 1)                            # broadcast over lanes in-kernel

    kernel = functools.partial(_attention_kernel, heads=heads, dim_head=dim_head,
                               b_blk=batch_block)

    # Explicit scoped-VMEM budget (default is only 16/32 MiB) so larger feature
    # maps don't trip the default limit long before physical VMEM is full.
    vmem_bytes = 4 * (
        2 * (2 * batch_block * c * n)          # x / out blocks (double-buffered)
        + 2 * c * (4 * hidden + 1)             # weight + bias blocks (double-buffered)
        + 3 * hidden * n                       # qkv projection
        + 3 * n * n                            # sim_t / p_t (+ bf16 copy) per head
        + 2 * hidden * n                       # hd scratch + head-output temporaries
    ) + (4 << 20)
    vmem_limit = int(min(max(vmem_bytes, 32 << 20), 100 << 20))

    out_flat = pl.pallas_call(
        kernel,
        out_shape=jax.ShapeDtypeStruct((b, c, n), x.dtype),
        grid_spec=pltpu.PrefetchScalarGridSpec(
            num_scalar_prefetch=0,
            grid=(grid_b,),
            in_specs=[
                pl.BlockSpec((batch_block, c, n), lambda bi: (bi, 0, 0)),  # tokens
                pl.BlockSpec((c, 3 * hidden), lambda bi: (0, 0)),          # Wqkv^T (scaled)
                pl.BlockSpec((c, hidden), lambda bi: (0, 0)),              # Wout
                pl.BlockSpec((c, 1), lambda bi: (0, 0)),                   # bias
            ],
            out_specs=pl.BlockSpec((batch_block, c, n), lambda bi: (bi, 0, 0)),
            scratch_shapes=[pltpu.VMEM((hidden, n), jnp.float32)],         # head slab
        ),
        compiler_params=pltpu.CompilerParams(
            dimension_semantics=("parallel",),
            vmem_limit_bytes=vmem_limit,
        ),
    )(x_flat, wqkv_t, w_out, bo)

    return out_flat.reshape(b, c, h, w)


def attention_reference(x, w_qkv, w_out, b_out, *, heads=4, dim_head=32):
    """Pure-JAX reference mirroring the PyTorch module."""
    b, c, h, w = x.shape
    n = h * w
    hidden = heads * dim_head
    scale = dim_head ** (-0.5)

    x_flat = x.reshape(b, c, n)                                              # (b, c, n)
    qkv = jnp.einsum('oc,bcn->bon', w_qkv, x_flat)                           # (b, 3*hidden, n)
    q, k, v = jnp.split(qkv, 3, axis=1)

    def to_heads(t):
        return t.reshape(b, heads, dim_head, n)                              # b h d (x y)
    q, k, v = map(to_heads, (q, k, v))
    q = q * scale
    sim = jnp.einsum('bhdi,bhdj->bhij', q, k)
    attn = jax.nn.softmax(sim, axis=-1)
    out = jnp.einsum('bhij,bhdj->bhid', attn, v)                             # (b, h, n, d)
    out = jnp.transpose(out, (0, 1, 3, 2)).reshape(b, hidden, h, w)          # b (h d) x y
    out = jnp.einsum('oc,bchw->bohw', w_out, out) + b_out.reshape(1, c, 1, 1)
    return out


if __name__ == "__main__":
    heads, dim_head = 4, 32
    b, dim, h, w = 2, 4, 16, 16
    hidden = heads * dim_head

    key = jax.random.PRNGKey(0)
    k0, k1, k2, k3 = jax.random.split(key, 4)

    x = jax.random.normal(k0, (b, dim, h, w), dtype=jnp.float32)
    w_qkv = 0.1 * jax.random.normal(k1, (3 * hidden, dim), dtype=jnp.float32)
    w_out = 0.1 * jax.random.normal(k2, (dim, hidden), dtype=jnp.float32)
    b_out = 0.1 * jax.random.normal(k3, (dim,), dtype=jnp.float32)

    out = attention_forward(x, w_qkv, w_out, b_out, heads=heads, dim_head=dim_head)
    out = jax.block_until_ready(out)

    ref = attention_reference(x, w_qkv, w_out, b_out, heads=heads, dim_head=dim_head)
    assert out.shape == (b, dim, h, w)
    # Tolerance covers bf16 MXU operands (f32 accumulation) and the EUP
    # approximate reciprocal in the softmax normalization.
    assert jnp.allclose(out, ref, atol=1e-2, rtol=1e-2), "mismatch vs reference"

    print("KERNEL_OK")
</pallas_src>

<mosaic_0001>
module attributes {stable_mosaic.version = 11 : i64} {
  func.func @_attention_kernel(%arg0: i32, %arg1: memref<1x4x256xf32, #tpu.memory_space<vmem>>, %arg2: memref<4x384xf32, #tpu.memory_space<vmem>>, %arg3: memref<4x128xf32, #tpu.memory_space<vmem>>, %arg4: memref<4x1xf32, #tpu.memory_space<vmem>>, %arg5: memref<1x4x256xf32, #tpu.memory_space<vmem>>, %arg6: memref<128x256xf32, #tpu.memory_space<vmem>>) attributes {dimension_semantics = [#tpu.dimension_semantics<parallel>], iteration_bounds = array<i64: 2>, scalar_prefetch = 0 : i64, scratch_operands = 1 : i64, tpu.core_type = #tpu.core_type<tc>, window_params = [{transform_indices = @transform_0, window_bounds = array<i64: 1, 4, 256>}, {pipeline_mode = #tpu.pipeline_mode<synchronous>, transform_indices = @transform_1, window_bounds = array<i64: 4, 384>}, {pipeline_mode = #tpu.pipeline_mode<synchronous>, transform_indices = @transform_2, window_bounds = array<i64: 4, 128>}, {pipeline_mode = #tpu.pipeline_mode<synchronous>, transform_indices = @transform_3, window_bounds = array<i64: 4, 1>}, {transform_indices = @transform_4, window_bounds = array<i64: 1, 4, 256>}]} {
    %c0 = arith.constant 0 : index
    %c0_0 = arith.constant 0 : index
    %0 = vector.load %arg2[%c0, %c0_0] : memref<4x384xf32, #tpu.memory_space<vmem>>, vector<4x384xf32>
    %c0_1 = arith.constant 0 : index
    %c0_2 = arith.constant 0 : index
    %1 = vector.load %arg3[%c0_1, %c0_2] : memref<4x128xf32, #tpu.memory_space<vmem>>, vector<4x128xf32>
    %c0_3 = arith.constant 0 : index
    %c0_4 = arith.constant 0 : index
    %2 = vector.load %arg4[%c0_3, %c0_4] : memref<4x1xf32, #tpu.memory_space<vmem>>, vector<4x1xf32>
    %c0_5 = arith.constant 0 : index
    %c0_6 = arith.constant 0 : index
    %c0_7 = arith.constant 0 : index
    %3 = vector.load %arg1[%c0_5, %c0_6, %c0_7] : memref<1x4x256xf32, #tpu.memory_space<vmem>>, vector<1x4x256xf32>
    %4 = vector.shape_cast %3 : vector<1x4x256xf32> to vector<4x256xf32>
    %cst = arith.constant dense<0.000000e+00> : vector<384x256xf32>
    %5 = tpu.matmul %0, %4, %cst {dimension_numbers = #tpu.dot_dimension_numbers<[0], [0], [1], [1], [0, 1, 1, 1], [], []>} : vector<4x384xf32>, vector<4x256xf32>, vector<384x256xf32> -> vector<384x256xf32>
    %6 = vector.extract_strided_slice %5 {offsets = [0, 0], sizes = [32, 256], strides = [1, 1]} : vector<384x256xf32> to vector<32x256xf32>
    %7 = arith.truncf %6 : vector<32x256xf32> to vector<32x256xbf16>
    %8 = vector.extract_strided_slice %5 {offsets = [128, 0], sizes = [32, 256], strides = [1, 1]} : vector<384x256xf32> to vector<32x256xf32>
    %9 = arith.truncf %8 : vector<32x256xf32> to vector<32x256xbf16>
    %10 = vector.extract_strided_slice %5 {offsets = [256, 0], sizes = [32, 256], strides = [1, 1]} : vector<384x256xf32> to vector<32x256xf32>
    %cst_8 = arith.constant dense<0.000000e+00> : vector<256x256xf32>
    %11 = tpu.matmul %9, %7, %cst_8 {dimension_numbers = #tpu.dot_dimension_numbers<[0], [0], [1], [1], [0, 1, 1, 1], [], []>} : vector<32x256xbf16>, vector<32x256xbf16>, vector<256x256xf32> -> vector<256x256xf32>
    %cst_9 = arith.constant dense<0xFF800000> : vector<256xf32>
    %12 = vector.multi_reduction <maximumf>, %11, %cst_9 [0] : vector<256x256xf32> to vector<256xf32>
    %13 = vector.shape_cast %12 : vector<256xf32> to vector<1x256xf32>
    %14 = vector.broadcast %13 : vector<1x256xf32> to vector<256x256xf32>
    %15 = arith.subf %11, %14 : vector<256x256xf32>
    %16 = math.exp %15 : vector<256x256xf32>
    %cst_10 = arith.constant dense<0.000000e+00> : vector<256xf32>
    %17 = vector.multi_reduction <add>, %16, %cst_10 [0] : vector<256x256xf32> to vector<256xf32>
    %18 = vector.shape_cast %17 : vector<256xf32> to vector<1x256xf32>
    %19 = tpu.reciprocal %18 {approx = true} : vector<1x256xf32> -> vector<1x256xf32>
    %20 = arith.truncf %10 : vector<32x256xf32> to vector<32x256xbf16>
    %21 = arith.truncf %16 : vector<256x256xf32> to vector<256x256xbf16>
    %cst_11 = arith.constant dense<0.000000e+00> : vector<32x256xf32>
    %22 = tpu.matmul %20, %21, %cst_11 {dimension_numbers = #tpu.dot_dimension_numbers<[1], [0], [0], [1], [0, 0, 1, 1], [], []>} : vector<32x256xbf16>, vector<256x256xbf16>, vector<32x256xf32> -> vector<32x256xf32>
    %23 = vector.broadcast %19 : vector<1x256xf32> to vector<32x256xf32>
    %24 = arith.mulf %22, %23 : vector<32x256xf32>
    %c0_12 = arith.constant 0 : index
    %c0_13 = arith.constant 0 : index
    %25 = vector.load %arg6[%c0_12, %c0_13] : memref<128x256xf32, #tpu.memory_space<vmem>>, vector<32x256xf32>
    tpu.vector_store %arg6[%c0_12, %c0_13], %24 {strides = array<i32>} : memref<128x256xf32, #tpu.memory_space<vmem>>, vector<32x256xf32>,
    %26 = vector.extract_strided_slice %5 {offsets = [32, 0], sizes = [32, 256], strides = [1, 1]} : vector<384x256xf32> to vector<32x256xf32>
    %27 = arith.truncf %26 : vector<32x256xf32> to vector<32x256xbf16>
    %28 = vector.extract_strided_slice %5 {offsets = [160, 0], sizes = [32, 256], strides = [1, 1]} : vector<384x256xf32> to vector<32x256xf32>
    %29 = arith.truncf %28 : vector<32x256xf32> to vector<32x256xbf16>
    %30 = vector.extract_strided_slice %5 {offsets = [288, 0], sizes = [32, 256], strides = [1, 1]} : vector<384x256xf32> to vector<32x256xf32>
    %cst_14 = arith.constant dense<0.000000e+00> : vector<256x256xf32>
    %31 = tpu.matmul %29, %27, %cst_14 {dimension_numbers = #tpu.dot_dimension_numbers<[0], [0], [1], [1], [0, 1, 1, 1], [], []>} : vector<32x256xbf16>, vector<32x256xbf16>, vector<256x256xf32> -> vector<256x256xf32>
    %cst_15 = arith.constant dense<0xFF800000> : vector<256xf32>
    %32 = vector.multi_reduction <maximumf>, %31, %cst_15 [0] : vector<256x256xf32> to vector<256xf32>
    %33 = vector.shape_cast %32 : vector<256xf32> to vector<1x256xf32>
    %34 = vector.broadcast %33 : vector<1x256xf32> to vector<256x256xf32>
    %35 = arith.subf %31, %34 : vector<256x256xf32>
    %36 = math.exp %35 : vector<256x256xf32>
    %cst_16 = arith.constant dense<0.000000e+00> : vector<256xf32>
    %37 = vector.multi_reduction <add>, %36, %cst_16 [0] : vector<256x256xf32> to vector<256xf32>
    %38 = vector.shape_cast %37 : vector<256xf32> to vector<1x256xf32>
    %39 = tpu.reciprocal %38 {approx = true} : vector<1x256xf32> -> vector<1x256xf32>
    %40 = arith.truncf %30 : vector<32x256xf32> to vector<32x256xbf16>
    %41 = arith.truncf %36 : vector<256x256xf32> to vector<256x256xbf16>
    %cst_17 = arith.constant dense<0.000000e+00> : vector<32x256xf32>
    %42 = tpu.matmul %40, %41, %cst_17 {dimension_numbers = #tpu.dot_dimension_numbers<[1], [0], [0], [1], [0, 0, 1, 1], [], []>} : vector<32x256xbf16>, vector<256x256xbf16>, vector<32x256xf32> -> vector<32x256xf32>
    %43 = vector.broadcast %39 : vector<1x256xf32> to vector<32x256xf32>
    %44 = arith.mulf %42, %43 : vector<32x256xf32>
    %c32 = arith.constant 32 : index
    %c0_18 = arith.constant 0 : index
    %45 = vector.load %arg6[%c32, %c0_18] : memref<128x256xf32, #tpu.memory_space<vmem>>, vector<32x256xf32>
    tpu.vector_store %arg6[%c32, %c0_18], %44 {strides = array<i32>} : memref<128x256xf32, #tpu.memory_space<vmem>>, vector<32x256xf32>,
    %46 = vector.extract_strided_slice %5 {offsets = [64, 0], sizes = [32, 256], strides = [1, 1]} : vector<384x256xf32> to vector<32x256xf32>
    %47 = arith.truncf %46 : vector<32x256xf32> to vector<32x256xbf16>
    %48 = vector.extract_strided_slice %5 {offsets = [192, 0], sizes = [32, 256], strides = [1, 1]} : vector<384x256xf32> to vector<32x256xf32>
    %49 = arith.truncf %48 : vector<32x256xf32> to vector<32x256xbf16>
    %50 = vector.extract_strided_slice %5 {offsets = [320, 0], sizes = [32, 256], strides = [1, 1]} : vector<384x256xf32> to vector<32x256xf32>
    %cst_19 = arith.constant dense<0.000000e+00> : vector<256x256xf32>
    %51 = tpu.matmul %49, %47, %cst_19 {dimension_numbers = #tpu.dot_dimension_numbers<[0], [0], [1], [1], [0, 1, 1, 1], [], []>} : vector<32x256xbf16>, vector<32x256xbf16>, vector<256x256xf32> -> vector<256x256xf32>
    %cst_20 = arith.constant dense<0xFF800000> : vector<256xf32>
    %52 = vector.multi_reduction <maximumf>, %51, %cst_20 [0] : vector<256x256xf32> to vector<256xf32>
    %53 = vector.shape_cast %52 : vector<256xf32> to vector<1x256xf32>
    %54 = vector.broadcast %53 : vector<1x256xf32> to vector<256x256xf32>
    %55 = arith.subf %51, %54 : vector<256x256xf32>
    %56 = math.exp %55 : vector<256x256xf32>
    %cst_21 = arith.constant dense<0.000000e+00> : vector<256xf32>
    %57 = vector.multi_reduction <add>, %56, %cst_21 [0] : vector<256x256xf32> to vector<256xf32>
    %58 = vector.shape_cast %57 : vector<256xf32> to vector<1x256xf32>
    %59 = tpu.reciprocal %58 {approx = true} : vector<1x256xf32> -> vector<1x256xf32>
    %60 = arith.truncf %50 : vector<32x256xf32> to vector<32x256xbf16>
    %61 = arith.truncf %56 : vector<256x256xf32> to vector<256x256xbf16>
    %cst_22 = arith.constant dense<0.000000e+00> : vector<32x256xf32>
    %62 = tpu.matmul %60, %61, %cst_22 {dimension_numbers = #tpu.dot_dimension_numbers<[1], [0], [0], [1], [0, 0, 1, 1], [], []>} : vector<32x256xbf16>, vector<256x256xbf16>, vector<32x256xf32> -> vector<32x256xf32>
    %63 = vector.broadcast %59 : vector<1x256xf32> to vector<32x256xf32>
    %64 = arith.mulf %62, %63 : vector<32x256xf32>
    %c64 = arith.constant 64 : index
    %c0_23 = arith.constant 0 : index
    %65 = vector.load %arg6[%c64, %c0_23] : memref<128x256xf32, #tpu.memory_space<vmem>>, vector<32x256xf32>
    tpu.vector_store %arg6[%c64, %c0_23], %64 {strides = array<i32>} : memref<128x256xf32, #tpu.memory_space<vmem>>, vector<32x256xf32>,
    %66 = vector.extract_strided_slice %5 {offsets = [96, 0], sizes = [32, 256], strides = [1, 1]} : vector<384x256xf32> to vector<32x256xf32>
    %67 = arith.truncf %66 : vector<32x256xf32> to vector<32x256xbf16>
    %68 = vector.extract_strided_slice %5 {offsets = [224, 0], sizes = [32, 256], strides = [1, 1]} : vector<384x256xf32> to vector<32x256xf32>
    %69 = arith.truncf %68 : vector<32x256xf32> to vector<32x256xbf16>
    %70 = vector.extract_strided_slice %5 {offsets = [352, 0], sizes = [32, 256], strides = [1, 1]} : vector<384x256xf32> to vector<32x256xf32>
    %cst_24 = arith.constant dense<0.000000e+00> : vector<256x256xf32>
    %71 = tpu.matmul %69, %67, %cst_24 {dimension_numbers = #tpu.dot_dimension_numbers<[0], [0], [1], [1], [0, 1, 1, 1], [], []>} : vector<32x256xbf16>, vector<32x256xbf16>, vector<256x256xf32> -> vector<256x256xf32>
    %cst_25 = arith.constant dense<0xFF800000> : vector<256xf32>
    %72 = vector.multi_reduction <maximumf>, %71, %cst_25 [0] : vector<256x256xf32> to vector<256xf32>
    %73 = vector.shape_cast %72 : vector<256xf32> to vector<1x256xf32>
    %74 = vector.broadcast %73 : vector<1x256xf32> to vector<256x256xf32>
    %75 = arith.subf %71, %74 : vector<256x256xf32>
    %76 = math.exp %75 : vector<256x256xf32>
    %cst_26 = arith.constant dense<0.000000e+00> : vector<256xf32>
    %77 = vector.multi_reduction <add>, %76, %cst_26 [0] : vector<256x256xf32> to vector<256xf32>
    %78 = vector.shape_cast %77 : vector<256xf32> to vector<1x256xf32>
    %79 = tpu.reciprocal %78 {approx = true} : vector<1x256xf32> -> vector<1x256xf32>
    %80 = arith.truncf %70 : vector<32x256xf32> to vector<32x256xbf16>
    %81 = arith.truncf %76 : vector<256x256xf32> to vector<256x256xbf16>
    %cst_27 = arith.constant dense<0.000000e+00> : vector<32x256xf32>
    %82 = tpu.matmul %80, %81, %cst_27 {dimension_numbers = #tpu.dot_dimension_numbers<[1], [0], [0], [1], [0, 0, 1, 1], [], []>} : vector<32x256xbf16>, vector<256x256xbf16>, vector<32x256xf32> -> vector<32x256xf32>
    %83 = vector.broadcast %79 : vector<1x256xf32> to vector<32x256xf32>
    %84 = arith.mulf %82, %83 : vector<32x256xf32>
    %c96 = arith.constant 96 : index
    %c0_28 = arith.constant 0 : index
    %85 = vector.load %arg6[%c96, %c0_28] : memref<128x256xf32, #tpu.memory_space<vmem>>, vector<32x256xf32>
    tpu.vector_store %arg6[%c96, %c0_28], %84 {strides = array<i32>} : memref<128x256xf32, #tpu.memory_space<vmem>>, vector<32x256xf32>,
    %c0_29 = arith.constant 0 : index
    %c0_30 = arith.constant 0 : index
    %86 = vector.load %arg6[%c0_29, %c0_30] : memref<128x256xf32, #tpu.memory_space<vmem>>, vector<128x256xf32>
    %cst_31 = arith.constant dense<0.000000e+00> : vector<4x256xf32>
    %87 = tpu.matmul %1, %86, %cst_31 {dimension_numbers = #tpu.dot_dimension_numbers<[1], [0], [0], [1], [0, 0, 1, 1], [], []>} : vector<4x128xf32>, vector<128x256xf32>, vector<4x256xf32> -> vector<4x256xf32>
    %88 = vector.broadcast %2 : vector<4x1xf32> to vector<4x256xf32>
    %89 = arith.addf %87, %88 : vector<4x256xf32>
    %c0_32 = arith.constant 0 : index
    %c0_33 = arith.constant 0 : index
    %c0_34 = arith.constant 0 : index
    %90 = vector.load %arg5[%c0_32, %c0_33, %c0_34] : memref<1x4x256xf32, #tpu.memory_space<vmem>>, vector<1x4x256xf32>
    %91 = vector.shape_cast %90 : vector<1x4x256xf32> to vector<4x256xf32>
    %92 = vector.shape_cast %89 : vector<4x256xf32> to vector<1x4x256xf32>
    tpu.vector_store %arg5[%c0_32, %c0_33, %c0_34], %92 {strides = array<i32>} : memref<1x4x256xf32, #tpu.memory_space<vmem>>, vector<1x4x256xf32>,
    return
  }
  func.func @transform_0(%arg0: i32) -> (i32, i32, i32) {
    %c0_i32 = arith.constant 0 : i32
    %c0_i32_0 = arith.constant 0 : i32
    %c0_i32_1 = arith.constant 0 : i32
    return %arg0, %c0_i32, %c0_i32_0 : i32, i32, i32
  }
  func.func @transform_1(%arg0: i32) -> (i32, i32) {
    %c0_i32 = arith.constant 0 : i32
    %c0_i32_0 = arith.constant 0 : i32
    %c0_i32_1 = arith.constant 0 : i32
    return %c0_i32, %c0_i32_0 : i32, i32
  }
  func.func @transform_2(%arg0: i32) -> (i32, i32) {
    %c0_i32 = arith.constant 0 : i32
    %c0_i32_0 = arith.constant 0 : i32
    %c0_i32_1 = arith.constant 0 : i32
    return %c0_i32, %c0_i32_0 : i32, i32
  }
  func.func @transform_3(%arg0: i32) -> (i32, i32) {
    %c0_i32 = arith.constant 0 : i32
    %c0_i32_0 = arith.constant 0 : i32
    %c0_i32_1 = arith.constant 0 : i32
    return %c0_i32, %c0_i32_0 : i32, i32
  }
  func.func @transform_4(%arg0: i32) -> (i32, i32, i32) {
    %c0_i32 = arith.constant 0 : i32
    %c0_i32_0 = arith.constant 0 : i32
    %c0_i32_1 = arith.constant 0 : i32
    return %arg0, %c0_i32, %c0_i32_0 : i32, i32, i32
  }
}

</mosaic_0001>

<bundles_post_ra>
// kernel: tpu_custom_call.1
= control target key start
LH: loop header
LB: loop body
LE: loop exit
PB: predicated region body
PF: predicated region fallthrough
CT: control target
= control target key end

     0   :  { %9 = vsyncpa [#allocation4], 0  ;;  %s8207_s0 = inlined_call_operand.hbm [shape: f32[2,4,256], index: 0, kind: input, shape index: {}]   ;;  %s8208_s1 = inlined_call_operand.hbm [shape: f32[4,384], index: 1, kind: input, shape index: {}]   ;;  %s8209_s2 = inlined_call_operand.vmem [shape: f32[4,128], index: 2, kind: input, shape index: {}]   ;;  %s8210_s3 = inlined_call_operand.vmem [shape: f32[4,1], index: 3, kind: input, shape index: {}]   ;;  %s8211_s4 = inlined_call_operand.hbm [shape: f32[2,4,256], index: 4, kind: output, shape index: {}]  }
   0x1   :  { %11 = vsyncpa [#allocation4 + $0x1], 0 }
   0x2   :  { %12 = vsyncpa [#allocation7], 0 }
   0x3   :  { %13 = vsyncpa [#allocation5], 0 }
   0x4   :  { %15 = vsyncpa [#allocation5 + $0x1], 0  ;;  %s4872_s15 = smov 0   ;;  %s4874_s16 = smov 0  }
   0x5   :  { %s4876_s17 = smov 0   ;;  %s4878_s18 = smov 0  }
   0x6 LB: > { %s4893_s19 = sadd.s32 4294967295, %s4840_s18   ;;  %s3958_s20 = sadd.s32 4294967294, %s4840_s18   ;;  %s4840_s18 = sphi %s4878_s18, %s9098_s18   ;;  %s4836_s17 = sphi %s4876_s17, %s9097_s17   ;;  %s4832_s16 = sphi %s4874_s16, %s9096_s16   ;;  %s4828_s15 = sphi %s4872_s15, %s9095_s15  }
   0x7   : > { %p41_p0 = scmp.ne.s32.totalorder %s4832_s16, %s4828_s15  ;;  %p8212_p1 = scmp.eq.s32.totalorder %s4893_s19, 0 }
   0x8   : > { %p134_p3 = scmp.eq.s32.totalorder %s3958_s20, 1  ;;  %p3959_p5 = scmp.ge.s32.totalorder %s4840_s18, 1 }
   0x9   : > { %p4902_p4 = por %p8212_p1, %p41_p0  ;;  %p141_p7 = scmp.lt.s32.totalorder %s4840_s18, 3 }
   0xa   : > { %p4907_p6 = por %p134_p3, %p41_p0  ;;  %s4842_s24 = smov [#allocation6]  }
   0xb   : > { %s8467_s21 = scalar_select %p4902_p4, 1, 0 }
   0xc   : > { %s8468_s22 = scalar_select %p4907_p6, 1, 0 }
   0xd   : > { %p4912_p8 = pnand %p3959_p5, %p141_p7  ;;  %s154_s25 = sshll.u32 %s4842_s24, 4  ;;  %s155_s25 = int_to_ptr.vmem [resolvable:$true] %s154_s25 }
   0xe   : > { %s4920_s26 = sadd.s32 1, %s4840_s18   ;;  %s28_s30 = sadd.s32 1, %s4836_s17 }
   0xf   : > { %s8469_s23 = scalar_select %p4912_p8, 1, 0 }
  0x10   : > { %p4130_p10 = pneg %p4912_p8  ;;  %s25_s28 = ssub.s32 %s4840_s18, %s4920_s26 }
  0x11   : > { %p4930_p12 = scmp.eq.s32.totalorder %s25_s28, 0  ;;  %s4712_s7 = scalar_lea.hbm %s8208_s1, 192 }
  0x12   : > { %p4924_p11 = pnand %p4130_p10, %p8212_p1  ;;  %p4713_p0 = scmp.ne.s32.totalorder %s8208_s1, %s4712_s7 }
  0x13   : > { %s8471_s29 = scalar_select %p4930_p12, 1, 0 }
  0x14   : > { %p4714_p3 = pneg %p4924_p11  ;;  %p4719_p10 = scmp.lt.u32.totalorder %s4712_s7, %s8208_s1 }
  0x16   : > { %p4715_p5 = pnand %p4714_p3, %p4713_p0 }
  0x18   : > { %p4716_p7 = pneg %p4715_p5 }
  0x1a   : > { %p4721_p9 = pnand %p4719_p10, %p4716_p7 }
  0x1c   : > { %4724 = shalt.err (!%p4721_p9)
}
  0x1d   : > { %s4725_s12 = scalar_lea.vmem %s155_s25, 192  ;;  %p4733_p6 = scmp.lt.s32.totalorder %s155_s25, %s155_s25 }
  0x1e   : > { %p4726_p1 = scmp.ne.s32.totalorder %s155_s25, %s4725_s12  ;;  %p4734_p4 = scmp.lt.s32.totalorder %s4725_s12, %s4725_s12 }
  0x20   : > { %p4728_p2 = pnand %p4726_p1, %p4714_p3  ;;  %p4735_p8 = por %p4734_p4, %p4733_p6 }
  0x22   : > { %p4729_p13 = pneg %p4728_p2 }
  0x24   : > { %p4736_p12 = pnand %p4735_p8, %p4729_p13 }
  0x26   : > { %4739 = shalt.err (!%p4736_p12)
}
  0x27   : > { %4133 = dma.hbm_to_vmem [thread:$0]  (!%p4924_p11), %s8208_s1, 192, %s155_s25, [#allocation7]  }
  0x28   : > { %p8472_p1 = scmp.ne.s32.totalorder %s8471_s29, 0  ;;  %p36_p2 = scmp.eq.s32.totalorder %s4840_s18, 0 }
  0x29   : > { %p8473_p4 = scmp.ne.s32.totalorder %s4836_s17, %s4832_s16  ;;  %p8474_p6 = scmp.eq.s32.totalorder %s4893_s19, 1 }
  0x2a   : > { %s4956_s20 = scalar_select %p8472_p1, %s4836_s17, %s28_s30  }
  0x2b   : > { %p4964_p8 = por %p8474_p6, %p8473_p4  ;;  %p4143_p9 = scmp.lt.s32.totalorder %s4840_s18, 2 }
  0x2c   : > { %s171_s27 = sand.u32 1, %s4836_s17   ;;  %p8476_p12 = pmov %p8473_p4 }
  0x2d   : > { %s3962_s28 = sshll.u32 %s171_s27, 3  ;;  %s4088_s5 = sshll.u32 %s4840_s18, 7 }
  0x2e   : > { %p37_p13 = por %p36_p2, %p8476_p12  ;;  %s4977_s25 = scalar_lea.hbm %s8207_s0, %s4088_s5 }
  0x2f   : > { %s175_s29 = scalar_lea.vmem [#allocation3], %s3962_s28  ;;  %s172_s9 = scalar_lea.sflag [#allocation4], %s171_s27 }
  0x30   : > { %s183_s30 = sshll.u32 %s175_s29, 4  ;;  %p4979_p11 = pnand %p4143_p9, %p37_p13  ;;  %s4983_s30 = int_to_ptr.vmem [resolvable:$true] %s183_s30 }
  0x31   : > { %s4740_s10 = scalar_lea.hbm %s4977_s25, 128  ;;  %s4745_s13 = scalar_lea.hbm %s8207_s0, 256 }
  0x32   : > { %p4741_p0 = scmp.ne.s32.totalorder %s4977_s25, %s4740_s10  ;;  %p4742_p3 = pneg %p4979_p11 }
  0x33   : > { %p4746_p10 = scmp.lt.u32.totalorder %s4977_s25, %s8207_s0  ;;  %p4747_p1 = scmp.lt.u32.totalorder %s4745_s13, %s4740_s10 }
  0x34   : > { %p4743_p5 = pnand %p4742_p3, %p4741_p0  ;;  %p4749_p4 = scmp.lt.u32.totalorder %s4740_s10, %s4977_s25 }
  0x35   : > { %p4748_p2 = por %p4747_p1, %p4746_p10 }
  0x36   : > { %p4744_p7 = pneg %p4743_p5 }
  0x37   : > { %p4750_p6 = por %p4749_p4, %p4748_p2 }
  0x39   : > { %p4751_p9 = pnand %p4750_p6, %p4744_p7 }
  0x3b   : > { %4754 = shalt.err (!%p4751_p9)
}
  0x3c   : > { %s4755_s27 = scalar_lea.vmem %s4983_s30, 128  ;;  %s4843_s5 = smov [#allocation3]  }
  0x3d   : > { %p4756_p12 = scmp.ne.s32.totalorder %s4983_s30, %s4755_s27  ;;  %s4760_s6 = sshll.u32 %s4843_s5, 4  ;;  %s4761_s6 = int_to_ptr.vmem [resolvable:$false] %s4760_s6 }
  0x3e   : > { %s4762_s7 = scalar_lea.vmem %s4761_s6, 256  ;;  %p4763_p5 = scmp.lt.s32.totalorder %s4983_s30, %s4761_s6 }
  0x3f   : > { %p4758_p13 = pnand %p4756_p12, %p4742_p3  ;;  %p4764_p10 = scmp.lt.s32.totalorder %s4762_s7, %s4755_s27 }
  0x41   : > { %p4759_p0 = pneg %p4758_p13  ;;  %p4765_p1 = por %p4764_p10, %p4763_p5 }
  0x43   : > { %p4766_p2 = pnand %p4765_p1, %p4759_p0 }
  0x45   : > { %4769 = shalt.err (!%p4766_p2)
}
  0x46   : > { %4137 = dma.hbm_to_vmem [thread:$0]  (!%p4979_p11), %s4977_s25, 128, %s4983_s30, %s172_s9  }
  0x47   : > { %p8478_p7 = scmp.ne.s32.totalorder %s8469_s23, 0 }
  0x49   : > { %192 = sbr.rel (%p8478_p7) target bundleno = 3001 (0xbb9), region = 36 }
  0x50   : > { %s5013_s29 = sand.u32 1, %s4832_s16   ;;  %p8479_p3 = scmp.ne.s32.totalorder %s8467_s21, 0 }
  0x51   : > { %s3966_s10 = sshll.u32 %s5013_s29, 3  ;;  %s195_s11 = scalar_lea.sflag [#allocation4], %s5013_s29 }
  0x52   : > { %s198_s12 = scalar_lea.vmem [#allocation3], %s3966_s10 }
  0x53   : > { %4815 = dma.done.wait (%p8479_p3), %s195_s11, 128  }
  0x54   : > { %4817 = vsyncadd (%p8479_p3), %s195_s11, 4294967168  ;;  %p8480_p11 = scmp.eq.s32.totalorder %s4893_s19, 0 }
  0x56   : > { %4819 = dma.done.wait (%p8480_p11), [#allocation7], 192   ;;  %p8481_p4 = pmov %p8480_p11 }
  0x57   : > { %v8217_v0 = vmov 0.0   ;;  %v228_v1 = vld [vmem:[#allocation6] sm:$0xff]  ;;  %v232_v2 = vld [vmem:[%s198_s12] sm:$0xff]  ;;  %vm479_vm0 = vcmask 1043456   ;;  %vm334_vm1 = vcmask 31744   ;;  %v8215_v25 = vmov 0  }
  0x58   : > { %4821 = vsyncadd (%p8481_p4), [#allocation7], 4294967104  ;;  %548 = vmatprep.mubr.f32.mxu0 %v8217_v0  ;;  %236 = vxpose.xlu0.b32.start.end [1/1] (short) %v228_v1, 128  ;;  %v333_v3 = vcombine.high %v232_v2, %v232_v2  ;;  %v234_v4 = vcombine.high %v228_v1, %v228_v1  ;;  %vm877_vm2 = vcmask 261120   ;;  %s4089_s8 = sshll.u32 %s4893_s19, 7  ;;  %s226_s9 = scalar_lea.vmem [#allocation8], %s3966_s10 }
  0x59   : > { %958 = vmatprep.mubr.bf16.mxu1 %v8215_v25  ;;  %s3878_s13 = sshll.u32 %s226_s9, 4  ;;  %s8163_s27 = scalar_lea.hbm %s8211_s4, %s4089_s8  ;;  %s8165_s13 = int_to_ptr.vmem [resolvable:$true] %s3878_s13 }
  0x5a   : > { %3969 = vmatprep.subr.msk.mxu0 %vm479_vm0, %v333_v3  ;;  %s3864_s5 = scalar_lea.sflag [#allocation5], %s5013_s29  ;;  %s4770_s6 = scalar_lea.vmem %s8165_s13, 128 }
  0x5b   : > { %3970 = vmatpush1.msk.msra.mxu0 %vm479_vm0, %v232_v2  ;;  %p4771_p6 = scmp.ne.s32.totalorder %s8165_s13, %s4770_s6  ;;  %s4846_s19 = smov [#allocation8]  }
  0x5c   : > { %s4774_s7 = sshll.u32 %s4846_s19, 4  ;;  %s4775_s7 = int_to_ptr.vmem [resolvable:$false] %s4774_s7 }
  0x5d   : > { %p4772_p9 = pnand %p4771_p6, %p4964_p8  ;;  %s4776_s10 = scalar_lea.vmem %s4775_s7, 256 }
  0x5e   : > { %p4777_p13 = scmp.lt.s32.totalorder %s8165_s13, %s4775_s7  ;;  %p4778_p0 = scmp.lt.s32.totalorder %s4776_s10, %s4770_s6 }
  0x5f   : > { %p4773_p12 = pneg %p4772_p9 }
  0x60   : > { %p4779_p5 = por %p4778_p0, %p4777_p13 }
  0x62   : > { %p4780_p10 = pnand %p4779_p5, %p4773_p12 }
  0x95   : > { %268 = vxpose.xlu0.b32.start.end [1/1] (short) %v234_v4, 128 }
  0xd8   : > { %v252_v5 = vpop.trf.xlu0 }
  0xd9   : > { %3971 = vmatmul.mubr.msk.f32.vlgmr.msra.gmra.mrb[0].mxu0 %vm334_vm1, %v252_v5 }
  0xda   : > { %554 = vmatprep.mubr.f32.mxu0 %v8217_v0 }
  0xdc   : > { %v253_v6 = vpop.trf.xlu0 }
  0xdd   : > { %3972 = vmatmul.mubr.msk.f32.gmra.mrb[2].mxu0 %vm334_vm1, %v253_v6 }
  0xde   : > { %560 = vmatprep.mubr.f32.mxu0 %v8217_v0 }
  0xe0   : > { %v254_v7 = vpop.trf.xlu0 }
  0xe1   : > { %3973 = vmatmul.mubr.msk.f32.gmra.mrb[4].mxu0 %vm334_vm1, %v254_v7 }
  0xe2   : > { %566 = vmatprep.mubr.f32.mxu0 %v8217_v0 }
  0xe4   : > { %v255_v8 = vpop.trf.xlu0 }
  0xe5   : > { %3974 = vmatmul.mubr.msk.f32.gmra.mrb[6].mxu0 %vm334_vm1, %v255_v8 }
  0xe6   : > { %572 = vmatprep.mubr.f32.mxu0 %v8217_v0 }
  0xe8   : > { %v256_v9 = vpop.trf.xlu0 }
  0xe9   : > { %3975 = vmatmul.mubr.msk.f32.gmra.mrb[8].mxu0 %vm334_vm1, %v256_v9 }
  0xea   : > { %578 = vmatprep.mubr.f32.mxu0 %v8217_v0 }
  0xec   : > { %v257_v10 = vpop.trf.xlu0 }
  0xed   : > { %3976 = vmatmul.mubr.msk.f32.gmra.mrb[10].mxu0 %vm334_vm1, %v257_v10 }
  0xee   : > { %584 = vmatprep.mubr.f32.mxu0 %v8217_v0 }
  0xf0   : > { %v258_v11 = vpop.trf.xlu0 }
  0xf1   : > { %3977 = vmatmul.mubr.msk.f32.gmra.mrb[12].mxu0 %vm334_vm1, %v258_v11 }
  0xf2   : > { %590 = vmatprep.mubr.f32.mxu0 %v8217_v0 }
  0xf4   : > { %v259_v12 = vpop.trf.xlu0 }
  0xf5   : > { %3978 = vmatmul.mubr.msk.f32.gmra.mrb[14].mxu0 %vm334_vm1, %v259_v12 }
  0xf6   : > { %596 = vmatprep.mubr.f32.mxu0 %v8217_v0 }
  0xf8   : > { %v260_v13 = vpop.trf.xlu0 }
  0xf9   : > { %3979 = vmatmul.mubr.msk.f32.gmra.mrb[16].mxu0 %vm334_vm1, %v260_v13 }
  0xfa   : > { %602 = vmatprep.mubr.f32.mxu0 %v8217_v0 }
  0xfc   : > { %v261_v14 = vpop.trf.xlu0 }
  0xfd   : > { %3980 = vmatmul.mubr.msk.f32.gmra.mrb[18].mxu0 %vm334_vm1, %v261_v14 }
  0xfe   : > { %608 = vmatprep.mubr.f32.mxu0 %v8217_v0 }
 0x100   : > { %v262_v15 = vpop.trf.xlu0 }
 0x101   : > { %3981 = vmatmul.mubr.msk.f32.gmra.mrb[20].mxu0 %vm334_vm1, %v262_v15 }
 0x102   : > { %614 = vmatprep.mubr.f32.mxu0 %v8217_v0 }
 0x104   : > { %v263_v16 = vpop.trf.xlu0 }
 0x105   : > { %3982 = vmatmul.mubr.msk.f32.gmra.mrb[22].mxu0 %vm334_vm1, %v263_v16 }
 0x106   : > { %620 = vmatprep.mubr.f32.mxu0 %v8217_v0 }
 0x108   : > { %v264_v17 = vpop.trf.xlu0 }
 0x109   : > { %3983 = vmatmul.mubr.msk.f32.gmra.mrb[24].mxu0 %vm334_vm1, %v264_v17 }
 0x10a   : > { %626 = vmatprep.mubr.f32.mxu0 %v8217_v0 }
 0x10c   : > { %v265_v18 = vpop.trf.xlu0 }
 0x10d   : > { %3984 = vmatmul.mubr.msk.f32.gmra.mrb[26].mxu0 %vm334_vm1, %v265_v18 }
 0x10e   : > { %632 = vmatprep.mubr.f32.mxu0 %v8217_v0 }
 0x110   : > { %v266_v19 = vpop.trf.xlu0 }
 0x111   : > { %3985 = vmatmul.mubr.msk.f32.gmra.mrb[28].mxu0 %vm334_vm1, %v266_v19 }
 0x112   : > { %638 = vmatprep.mubr.f32.mxu0 %v8217_v0 }
 0x114   : > { %v267_v20 = vpop.trf.xlu0 }
 0x115   : > { %3986 = vmatmul.mubr.msk.f32.gmra.mrb[30].mxu0 %vm334_vm1, %v267_v20 }
 0x116   : > { %644 = vmatprep.mubr.f32.mxu0 %v8217_v0 }
 0x118   : > { %v284_v21 = vpop.trf.xlu0 }
 0x119   : > { %3987 = vmatmul.mubr.msk.f32.gmra.mrb[32].mxu0 %vm334_vm1, %v284_v21 }
 0x11a   : > { %650 = vmatprep.mubr.f32.mxu0 %v8217_v0 }
 0x11c   : > { %v285_v22 = vpop.trf.xlu0 }
 0x11d   : > { %3988 = vmatmul.mubr.msk.f32.gmra.mrb[34].mxu0 %vm334_vm1, %v285_v22 }
 0x11e   : > { %656 = vmatprep.mubr.f32.mxu0 %v8217_v0 }
 0x120   : > { %v286_v23 = vpop.trf.xlu0 }
 0x121   : > { %3989 = vmatmul.mubr.msk.f32.gmra.mrb[36].mxu0 %vm334_vm1, %v286_v23  ;;  %v229_v23 = vld [vmem:[#allocation6 + $0x8] sm:$0xf] }
 0x122   : > { %662 = vmatprep.mubr.f32.mxu0 %v8217_v0 }
 0x124   : > { %v287_v24 = vpop.trf.xlu0 }
 0x125   : > { %3990 = vmatmul.mubr.msk.f32.gmra.mrb[38].mxu0 %vm334_vm1, %v287_v24 }
 0x126   : > { %668 = vmatprep.mubr.f32.mxu0 %v8217_v0 }
 0x128   : > { %v288_v24 = vpop.trf.xlu0 }
 0x129   : > { %3991 = vmatmul.mubr.msk.f32.gmra.mrb[40].mxu0 %vm334_vm1, %v288_v24 }
 0x12a   : > { %674 = vmatprep.mubr.f32.mxu0 %v8217_v0 }
 0x1ac   : > { %v550_v26 = vpop.f32.mrb[0].mxu0 }
 0x1ad   : > { %v552_v27 = vpop.f32.mrb[1].mxu0 }
 0x1b0   : > { %v556_v28 = vpop.f32.mrb[2].mxu0 }
 0x1b1   : > { %v837_v29 = vpack.c.bf16 %v556_v28, %v550_v26  ;;  %v558_v30 = vpop.f32.mrb[3].mxu0  ;;  %v289_v26 = vpop.trf.xlu0 }
 0x1b2   : > { %v838_v31 = vpack.c.bf16 %v558_v30, %v552_v27  ;;  %3992 = vmatmul.mubr.msk.f32.gmra.mrb[42].mxu0 %vm334_vm1, %v289_v26 }
 0x1b3   : > { %680 = vmatprep.mubr.f32.mxu0 %v8217_v0 }
 0x1b4   : > { %v562_v32 = vpop.f32.mrb[4].mxu0  ;;  %926 = vmatprep.subr.bf16.mxu1 %v838_v31 }
 0x1b5   : > { %v564_v33 = vpop.f32.mrb[5].mxu0  ;;  %927 = vmatpush1.bf16.msra.mxu1 %v837_v29  ;;  %v290_v27 = vpop.trf.xlu0 }
 0x1b6   : > { %3993 = vmatmul.mubr.msk.f32.gmra.mrb[44].mxu0 %vm334_vm1, %v290_v27 }
 0x1b7   : > { %686 = vmatprep.mubr.f32.mxu0 %v8217_v0 }
 0x1b8   : > { %v568_v34 = vpop.f32.mrb[6].mxu0 }
 0x1b9   : > { %v839_v35 = vpack.c.bf16 %v568_v34, %v562_v32  ;;  %v570_v36 = vpop.f32.mrb[7].mxu0  ;;  %v291_v29 = vpop.trf.xlu0 }
 0x1ba   : > { %v840_v37 = vpack.c.bf16 %v570_v36, %v564_v33  ;;  %3994 = vmatmul.mubr.msk.f32.gmra.mrb[46].mxu0 %vm334_vm1, %v291_v29 }
 0x1bb   : > { %692 = vmatprep.mubr.f32.mxu0 %v8217_v0 }
 0x1bc   : > { %v5069_v38 = vpop.f32.mrb[8].mxu0  ;;  %928 = vmatprep.subr.bf16.mxu1 %v840_v37 }
 0x1bd   : > { %8482 = vst [vmem:[#allocation12_spill] sm:$0xff] %v5069_v38  ;;  %v5071_v39 = vpop.f32.mrb[9].mxu0  ;;  %929 = vmatpush1.bf16.msra.mxu1 %v839_v35  ;;  %v292_v30 = vpop.trf.xlu0 }
 0x1be   : > { %8483 = vst [vmem:[#allocation13_spill] sm:$0xff] %v5071_v39  ;;  %3995 = vmatmul.mubr.msk.f32.gmra.mrb[48].mxu0 %vm334_vm1, %v292_v30 }
 0x1bf   : > { %698 = vmatprep.mubr.f32.mxu0 %v8217_v0 }
 0x1c0   : > { %v5073_v40 = vpop.f32.mrb[10].mxu0 }
 0x1c1   : > { %8484 = vst [vmem:[#allocation14_spill] sm:$0xff] %v5073_v40  ;;  %v5077_v42 = vpop.f32.mrb[11].mxu0  ;;  %v293_v32 = vpop.trf.xlu0 }
 0x1c2   : > { %8485 = vst [vmem:[#allocation15_spill] sm:$0xff] %v5077_v42  ;;  %3996 = vmatmul.mubr.msk.f32.gmra.mrb[50].mxu0 %vm334_vm1, %v293_v32 }
 0x1c3   : > { %704 = vmatprep.mubr.f32.mxu0 %v8217_v0 }
 0x1c4   : > { %v5081_v44 = vpop.f32.mrb[12].mxu0 }
 0x1c5   : > { %8486 = vst [vmem:[#allocation16_spill] sm:$0xff] %v5081_v44  ;;  %v5083_v45 = vpop.f32.mrb[13].mxu0  ;;  %v294_v33 = vpop.trf.xlu0 }
 0x1c6   : > { %8487 = vst [vmem:[#allocation17_spill] sm:$0xff] %v5083_v45  ;;  %3997 = vmatmul.mubr.msk.f32.gmra.mrb[52].mxu0 %vm334_vm1, %v294_v33 }
 0x1c7   : > { %710 = vmatprep.mubr.f32.mxu0 %v8217_v0 }
 0x1c8   : > { %v5085_v46 = vpop.f32.mrb[14].mxu0 }
 0x1c9   : > { %8488 = vst [vmem:[#allocation18_spill] sm:$0xff] %v5085_v46  ;;  %v5089_v48 = vpop.f32.mrb[15].mxu0  ;;  %v295_v35 = vpop.trf.xlu0 }
 0x1ca   : > { %8489 = vst [vmem:[#allocation19_spill] sm:$0xff] %v5089_v48  ;;  %3998 = vmatmul.mubr.msk.f32.gmra.mrb[54].mxu0 %vm334_vm1, %v295_v35 }
 0x1cb   : > { %716 = vmatprep.mubr.f32.mxu0 %v8217_v0 }
 0x1cc   : > { %v5093_v50 = vpop.f32.mrb[16].mxu0 }
 0x1cd   : > { %8490 = vst [vmem:[#allocation20_spill] sm:$0xff] %v5093_v50  ;;  %v5095_v51 = vpop.f32.mrb[17].mxu0  ;;  %v296_v36 = vpop.trf.xlu0 }
 0x1ce   : > { %8491 = vst [vmem:[#allocation21_spill] sm:$0xff] %v5095_v51  ;;  %3999 = vmatmul.mubr.msk.f32.gmra.mrb[56].mxu0 %vm334_vm1, %v296_v36 }
 0x1cf   : > { %722 = vmatprep.mubr.f32.mxu0 %v8217_v0 }
 0x1d0   : > { %v5097_v52 = vpop.f32.mrb[18].mxu0 }
 0x1d1   : > { %8492 = vst [vmem:[#allocation22_spill] sm:$0xff] %v5097_v52  ;;  %v5101_v54 = vpop.f32.mrb[19].mxu0 }
 0x1d2   : > { %8493 = vst [vmem:[#allocation23_spill] sm:$0xff] %v5101_v54 }
 0x1d4   : > { %v5105_v56 = vpop.f32.mrb[20].mxu0 }
 0x1d5   : > { %8494 = vst [vmem:[#allocation24_spill] sm:$0xff] %v5105_v56  ;;  %v5107_v57 = vpop.f32.mrb[21].mxu0 }
 0x1d6   : > { %8495 = vst [vmem:[#allocation25_spill] sm:$0xff] %v5107_v57 }
 0x1d8   : > { %v5109_v58 = vpop.f32.mrb[22].mxu0 }
 0x1d9   : > { %8496 = vst [vmem:[#allocation26_spill] sm:$0xff] %v5109_v58  ;;  %v5113_v60 = vpop.f32.mrb[23].mxu0 }
 0x1da   : > { %8497 = vst [vmem:[#allocation27_spill] sm:$0xff] %v5113_v60 }
 0x1dc   : > { %v5117_v62 = vpop.f32.mrb[24].mxu0 }
 0x1dd   : > { %8498 = vst [vmem:[#allocation28_spill] sm:$0xff] %v5117_v62  ;;  %v5119_v63 = vpop.f32.mrb[25].mxu0 }
 0x1de   : > { %8499 = vst [vmem:[#allocation29_spill] sm:$0xff] %v5119_v63 }
 0x1e0   : > { %v5121_v1 = vpop.f32.mrb[26].mxu0 }
 0x1e1   : > { %8500 = vst [vmem:[#allocation30_spill] sm:$0xff] %v5121_v1  ;;  %v5125_v3 = vpop.f32.mrb[27].mxu0 }
 0x1e2   : > { %8501 = vst [vmem:[#allocation31_spill] sm:$0xff] %v5125_v3 }
 0x1e4   : > { %v5129_v5 = vpop.f32.mrb[28].mxu0 }
 0x1e5   : > { %8502 = vst [vmem:[#allocation32_spill] sm:$0xff] %v5129_v5  ;;  %v5131_v6 = vpop.f32.mrb[29].mxu0 }
 0x1e6   : > { %8503 = vst [vmem:[#allocation33_spill] sm:$0xff] %v5131_v6 }
 0x1e8   : > { %v5133_v7 = vpop.f32.mrb[30].mxu0 }
 0x1e9   : > { %8504 = vst [vmem:[#allocation34_spill] sm:$0xff] %v5133_v7  ;;  %v5137_v9 = vpop.f32.mrb[31].mxu0 }
 0x1ea   : > { %8505 = vst [vmem:[#allocation35_spill] sm:$0xff] %v5137_v9 }
 0x1ec   : > { %v646_v11 = vpop.f32.mrb[32].mxu0 }
 0x1ed   : > { %v648_v12 = vpop.f32.mrb[33].mxu0 }
 0x1f0   : > { %v652_v13 = vpop.f32.mrb[34].mxu0 }
 0x1f1   : > { %v654_v14 = vpop.f32.mrb[35].mxu0  ;;  %v841_v15 = vpack.c.bf16 %v652_v13, %v646_v11  ;;  %v297_v11 = vpop.trf.xlu0 }
 0x1f2   : > { %v842_v16 = vpack.c.bf16 %v654_v14, %v648_v12  ;;  %4000 = vmatmul.mubr.msk.f32.gmra.mrb[58].mxu0 %vm334_vm1, %v297_v11 }
 0x1f3   : > { %845 = vxpose.xlu1.c.b16.start [1/2] (short) %v841_v15, 128  ;;  %728 = vmatprep.mubr.f32.mxu0 %v8217_v0 }
 0x1f4   : > { %v658_v17 = vpop.f32.mrb[36].mxu0 }
 0x1f5   : > { %v660_v18 = vpop.f32.mrb[37].mxu0  ;;  %v298_v12 = vpop.trf.xlu0 }
 0x1f6   : > { %4001 = vmatmul.mubr.msk.f32.gmra.mrb[60].mxu0 %vm334_vm1, %v298_v12 }
 0x1f7   : > { %734 = vmatprep.mubr.f32.mxu0 %v8217_v0 }
 0x1f8   : > { %v664_v19 = vpop.f32.mrb[38].mxu0 }
 0x1f9   : > { %v843_v20 = vpack.c.bf16 %v664_v19, %v658_v17  ;;  %v666_v21 = vpop.f32.mrb[39].mxu0  ;;  %v299_v14 = vpop.trf.xlu0 }
 0x1fa   : > { %v844_v22 = vpack.c.bf16 %v666_v21, %v660_v18  ;;  %4002 = vmatmul.mubr.msk.f32.gmra.mrb[62].mxu0 %vm334_vm1, %v299_v14 }
 0x1fb   : > { %846 = vxpose.xlu1.c.b16.end [2/2] (short) %v843_v20, 128  ;;  %740 = vmatprep.mubr.f32.mxu0 %v8217_v0 }
 0x214   : > { %861 = vxpose.xlu1.c.b16.start [1/2] (short) %v842_v16, 128 }
 0x218   : > { %862 = vxpose.xlu1.c.b16.end [2/2] (short) %v844_v22, 128 }
 0x23a   : > { %300 = vxpose.xlu1.b32.start.end [1/1] (short) %v229_v23, 128 }
 0x25d   : > { %v853_v28 = vpop.trf.xlu1 }
 0x25e   : > { %4019 = vmatmul.mubr.msk.bf16.vlgmr.msra.gmra.mrb[0].mxu1 %vm877_vm2, %v853_v28 }
 0x25f   : > { %968 = vmatprep.mubr.bf16.mxu1 %v8215_v25 }
 0x261   : > { %v854_v31 = vpop.trf.xlu1 }
 0x265   : > { %v855_v34 = vpop.trf.xlu1 }
 0x266   : > { %4020 = vmatmul.mubr.msk.bf16.gmra.mrb[4].mxu1 %vm877_vm2, %v854_v31  ;;  %v670_v31 = vpop.f32.mrb[40].mxu0 }
 0x267   : > { %978 = vmatprep.mubr.bf16.mxu1 %v8215_v25  ;;  %v672_v32 = vpop.f32.mrb[41].mxu0 }
 0x269   : > { %v856_v37 = vpop.trf.xlu1 }
 0x26d   : > { %v857_v13 = vpop.trf.xlu1 }
 0x26e   : > { %4021 = vmatmul.mubr.msk.bf16.gmra.mrb[8].mxu1 %vm877_vm2, %v855_v34 }
 0x26f   : > { %988 = vmatprep.mubr.bf16.mxu1 %v8215_v25 }
 0x271   : > { %v858_v15 = vpop.trf.xlu1 }
 0x275   : > { %v859_v16 = vpop.trf.xlu1 }
 0x276   : > { %4022 = vmatmul.mubr.msk.bf16.gmra.mrb[12].mxu1 %vm877_vm2, %v856_v37 }
 0x277   : > { %998 = vmatprep.mubr.bf16.mxu1 %v8215_v25 }
 0x279   : > { %v860_v17 = vpop.trf.xlu1 }
 0x27d   : > { %v869_v18 = vpop.trf.xlu1 }
 0x27e   : > { %4023 = vmatmul.mubr.msk.bf16.gmra.mrb[16].mxu1 %vm877_vm2, %v857_v13 }
 0x27f   : > { %1008 = vmatprep.mubr.bf16.mxu1 %v8215_v25 }
 0x281   : > { %v870_v19 = vpop.trf.xlu1 }
 0x285   : > { %v871_v20 = vpop.trf.xlu1  ;;  %v676_v33 = vpop.f32.mrb[42].mxu0 }
 0x286   : > { %4024 = vmatmul.mubr.msk.bf16.gmra.mrb[20].mxu1 %vm877_vm2, %v858_v15  ;;  %v1570_v34 = vpack.c.bf16 %v676_v33, %v670_v31  ;;  %v678_v10 = vpop.f32.mrb[43].mxu0 }
 0x287   : > { %1018 = vmatprep.mubr.bf16.mxu1 %v8215_v25 }
 0x288   : > { %1574 = vxpose.xlu0.c.b16.start [1/2] (short) %v1570_v34, 128 }
 0x289   : > { %v872_v21 = vpop.trf.xlu1  ;;  %v682_v1 = vpop.f32.mrb[44].mxu0 }
 0x28a   : > { %v684_v63 = vpop.f32.mrb[45].mxu0 }
 0x28d   : > { %v873_v22 = vpop.trf.xlu1  ;;  %v688_v3 = vpop.f32.mrb[46].mxu0 }
 0x28e   : > { %4025 = vmatmul.mubr.msk.bf16.gmra.mrb[24].mxu1 %vm877_vm2, %v859_v16  ;;  %v1572_v58 = vpack.c.bf16 %v688_v3, %v682_v1 }
 0x28f   : > { %1028 = vmatprep.mubr.bf16.mxu1 %v8215_v25 }
 0x290   : > { %1575 = vxpose.xlu0.c.b16.end [2/2] (short) %v1572_v58, 128 }
 0x291   : > { %v874_v23 = vpop.trf.xlu1 }
 0x295   : > { %v875_v24 = vpop.trf.xlu1 }
 0x296   : > { %4026 = vmatmul.mubr.msk.bf16.gmra.mrb[28].mxu1 %vm877_vm2, %v860_v17 }
 0x297   : > { %1038 = vmatprep.mubr.bf16.mxu1 %v8215_v25 }
 0x299   : > { %v876_v26 = vpop.trf.xlu1 }
 0x29e   : > { %4027 = vmatmul.mubr.msk.bf16.gmra.mrb[32].mxu1 %vm877_vm2, %v869_v18 }
 0x29f   : > { %1048 = vmatprep.mubr.bf16.mxu1 %v8215_v25 }
 0x2a6   : > { %4028 = vmatmul.mubr.msk.bf16.gmra.mrb[36].mxu1 %vm877_vm2, %v870_v19 }
 0x2a7   : > { %1058 = vmatprep.mubr.bf16.mxu1 %v8215_v25 }
 0x2ae   : > { %4029 = vmatmul.mubr.msk.bf16.gmra.mrb[40].mxu1 %vm877_vm2, %v871_v20 }
 0x2af   : > { %1068 = vmatprep.mubr.bf16.mxu1 %v8215_v25 }
 0x2b6   : > { %4030 = vmatmul.mubr.msk.bf16.gmra.mrb[44].mxu1 %vm877_vm2, %v872_v21 }
 0x2b7   : > { %1078 = vmatprep.mubr.bf16.mxu1 %v8215_v25 }
 0x2ba   : > { %v316_v27 = vpop.trf.xlu1 }
 0x2bb   : > { %4003 = vmatmul.mubr.msk.f32.gmra.mrb[64].mxu0 %vm334_vm1, %v316_v27 }
 0x2bc   : > { %746 = vmatprep.mubr.f32.mxu0 %v8217_v0 }
 0x2be   : > { %4031 = vmatmul.mubr.msk.bf16.gmra.mrb[48].mxu1 %vm877_vm2, %v873_v22  ;;  %v317_v28 = vpop.trf.xlu1 }
 0x2bf   : > { %1088 = vmatprep.mubr.bf16.mxu1 %v8215_v25  ;;  %4004 = vmatmul.mubr.msk.f32.gmra.mrb[66].mxu0 %vm334_vm1, %v317_v28 }
 0x2c0   : > { %752 = vmatprep.mubr.f32.mxu0 %v8217_v0 }
 0x2c2   : > { %v318_v29 = vpop.trf.xlu1 }
 0x2c3   : > { %4005 = vmatmul.mubr.msk.f32.gmra.mrb[68].mxu0 %vm334_vm1, %v318_v29 }
 0x2c4   : > { %758 = vmatprep.mubr.f32.mxu0 %v8217_v0 }
 0x2c6   : > { %4032 = vmatmul.mubr.msk.bf16.gmra.mrb[52].mxu1 %vm877_vm2, %v874_v23  ;;  %v319_v30 = vpop.trf.xlu1 }
 0x2c7   : > { %1098 = vmatprep.mubr.bf16.mxu1 %v8215_v25  ;;  %4006 = vmatmul.mubr.msk.f32.gmra.mrb[70].mxu0 %vm334_vm1, %v319_v30 }
 0x2c8   : > { %764 = vmatprep.mubr.f32.mxu0 %v8217_v0 }
 0x2ce   : > { %4033 = vmatmul.mubr.msk.bf16.gmra.mrb[56].mxu1 %vm877_vm2, %v875_v24 }
 0x2cf   : > { %1108 = vmatprep.mubr.bf16.mxu1 %v8215_v25 }
 0x2d6   : > { %4034 = vmatmul.mubr.msk.bf16.gmra.mrb[60].mxu1 %vm877_vm2, %v876_v26 }
 0x331   : > { %v5204_v35 = vpop.f32.mrb[0].mxu1 }
 0x332   : > { %v5206_v36 = vpop.f32.mrb[1].mxu1 }
 0x333   : > { %v5208_v37 = vpop.f32.mrb[2].mxu1 }
 0x334   : > { %v5210_v11 = vpop.f32.mrb[3].mxu1 }
 0x339   : > { %v5212_v12 = vpop.f32.mrb[4].mxu1 }
 0x33a   : > { %v1119_v13 = vmax.f32 %v5204_v35, %v5212_v12  ;;  %v5216_v14 = vpop.f32.mrb[5].mxu1 }
 0x33b   : > { %v1156_v15 = vmax.f32 %v5206_v36, %v5216_v14  ;;  %v5220_v16 = vpop.f32.mrb[6].mxu1 }
 0x33c   : > { %v1120_v17 = vmax.f32 %v5208_v37, %v5220_v16  ;;  %v5224_v18 = vpop.f32.mrb[7].mxu1 }
 0x33d   : > { %v1157_v19 = vmax.f32 %v5210_v11, %v5224_v18 }
 0x341   : > { %v5228_v20 = vpop.f32.mrb[8].mxu1 }
 0x342   : > { %v1121_v21 = vmax.f32 %v1119_v13, %v5228_v20  ;;  %v5231_v22 = vpop.f32.mrb[9].mxu1 }
 0x343   : > { %v1158_v23 = vmax.f32 %v1156_v15, %v5231_v22  ;;  %v5234_v24 = vpop.f32.mrb[10].mxu1 }
 0x344   : > { %v1122_v26 = vmax.f32 %v1120_v17, %v5234_v24  ;;  %v5237_v27 = vpop.f32.mrb[11].mxu1 }
 0x345   : > { %v1159_v28 = vmax.f32 %v1157_v19, %v5237_v27 }
 0x349   : > { %v5240_v29 = vpop.f32.mrb[12].mxu1 }
 0x34a   : > { %v1123_v30 = vmax.f32 %v1121_v21, %v5240_v29  ;;  %v5243_v31 = vpop.f32.mrb[13].mxu1  ;;  %v1571_v21 = vpack.c.bf16 %v678_v10, %v672_v32 }
 0x34b   : > { %v1160_v33 = vmax.f32 %v1158_v23, %v5243_v31  ;;  %v5246_v34 = vpop.f32.mrb[14].mxu1 }
 0x34c   : > { %v1124_v13 = vmax.f32 %v1122_v26, %v5246_v34  ;;  %v5249_v15 = vpop.f32.mrb[15].mxu1  ;;  %1590 = vxpose.xlu1.c.b16.start [1/2] (short) %v1571_v21, 128 }
 0x34d   : > { %v1161_v17 = vmax.f32 %v1159_v28, %v5249_v15 }
 0x351   : > { %v5252_v8 = vpop.f32.mrb[16].mxu1 }
 0x352   : > { %v1125_v19 = vmax.f32 %v1123_v30, %v5252_v8  ;;  %v5255_v2 = vpop.f32.mrb[17].mxu1 }
 0x353   : > { %8506 = vst [vmem:[#allocation36_spill] sm:$0xff] %v5255_v2  ;;  %v1162_v4 = vmax.f32 %v1160_v33, %v5255_v2  ;;  %v5258_v59 = vpop.f32.mrb[18].mxu1 }
 0x354   : > { %v1126_v23 = vmax.f32 %v1124_v13, %v5258_v59  ;;  %v5261_v61 = vpop.f32.mrb[19].mxu1 }
 0x355   : > { %8507 = vst [vmem:[#allocation37_spill] sm:$0xff] %v5261_v61  ;;  %v1163_v26 = vmax.f32 %v1161_v17, %v5261_v61 }
 0x359   : > { %v5264_v28 = vpop.f32.mrb[20].mxu1 }
 0x35a   : > { %v1127_v53 = vmax.f32 %v1125_v19, %v5264_v28  ;;  %v5267_v55 = vpop.f32.mrb[21].mxu1 }
 0x35b   : > { %8508 = vst [vmem:[#allocation38_spill] sm:$0xff] %v5267_v55  ;;  %v1164_v30 = vmax.f32 %v1162_v4, %v5267_v55  ;;  %v5270_v10 = vpop.f32.mrb[22].mxu1 }
 0x35c   : > { %v1128_v32 = vmax.f32 %v1126_v23, %v5270_v10  ;;  %v5273_v33 = vpop.f32.mrb[23].mxu1 }
 0x35d   : > { %8509 = vst [vmem:[#allocation39_spill] sm:$0xff] %v5273_v33  ;;  %v1165_v13 = vmax.f32 %v1163_v26, %v5273_v33 }
 0x361   : > { %v5276_v47 = vpop.f32.mrb[24].mxu1 }
 0x362   : > { %v1129_v17 = vmax.f32 %v1127_v53, %v5276_v47  ;;  %v5279_v21 = vpop.f32.mrb[25].mxu1 }
 0x363   : > { %8510 = vst [vmem:[#allocation40_spill] sm:$0xff] %v5279_v21  ;;  %v1166_v19 = vmax.f32 %v1164_v30, %v5279_v21  ;;  %v5282_v49 = vpop.f32.mrb[26].mxu1 }
 0x364   : > { %v1130_v4 = vmax.f32 %v1128_v32, %v5282_v49  ;;  %v5285_v41 = vpop.f32.mrb[27].mxu1 }
 0x365   : > { %8511 = vst [vmem:[#allocation41_spill] sm:$0xff] %v5285_v41  ;;  %v1167_v23 = vmax.f32 %v1165_v13, %v5285_v41 }
 0x369   : > { %v5288_v43 = vpop.f32.mrb[28].mxu1 }
 0x36a   : > { %v1131_v26 = vmax.f32 %v1129_v17, %v5288_v43  ;;  %v5291_v25 = vpop.f32.mrb[29].mxu1 }
 0x36b   : > { %8512 = vst [vmem:[#allocation42_spill] sm:$0xff] %v5291_v25  ;;  %v1168_v53 = vmax.f32 %v1166_v19, %v5291_v25  ;;  %v5294_v0 = vpop.f32.mrb[30].mxu1 }
 0x36c   : > { %v1132_v30 = vmax.f32 %v1130_v4, %v5294_v0  ;;  %v5297_v5 = vpop.f32.mrb[31].mxu1 }
 0x36d   : > { %8513 = vst [vmem:[#allocation43_spill] sm:$0xff] %v5297_v5  ;;  %v1169_v32 = vmax.f32 %v1167_v23, %v5297_v5  ;;  %v690_v23 = vpop.f32.mrb[47].mxu0 }
 0x36e   : > { %v694_v39 = vpop.f32.mrb[48].mxu0 }
 0x371   : > { %v5300_v7 = vpop.f32.mrb[32].mxu1 }
 0x372   : > { %v1133_v13 = vmax.f32 %v1131_v26, %v5300_v7  ;;  %v5303_v6 = vpop.f32.mrb[33].mxu1  ;;  %v1573_v26 = vpack.c.bf16 %v690_v23, %v684_v63 }
 0x373   : > { %8514 = vst [vmem:[#allocation44_spill] sm:$0xff] %v5303_v6  ;;  %v1170_v17 = vmax.f32 %v1168_v53, %v5303_v6  ;;  %v5306_v9 = vpop.f32.mrb[34].mxu1 }
 0x374   : > { %v1134_v19 = vmax.f32 %v1132_v30, %v5306_v9  ;;  %v5309_v62 = vpop.f32.mrb[35].mxu1  ;;  %1591 = vxpose.xlu1.c.b16.end [2/2] (short) %v1573_v26, 128 }
 0x375   : > { %8515 = vst [vmem:[#allocation45_spill] sm:$0xff] %v5309_v62  ;;  %v1171_v4 = vmax.f32 %v1169_v32, %v5309_v62 }
 0x379   : > { %v5312_v56 = vpop.f32.mrb[36].mxu1 }
 0x37a   : > { %v1135_v57 = vmax.f32 %v1133_v13, %v5312_v56  ;;  %v5315_v60 = vpop.f32.mrb[37].mxu1 }
 0x37b   : > { %8516 = vst [vmem:[#allocation46_spill] sm:$0xff] %v5315_v60  ;;  %v1172_v53 = vmax.f32 %v1170_v17, %v5315_v60  ;;  %v5318_v50 = vpop.f32.mrb[38].mxu1 }
 0x37c   : > { %v1136_v30 = vmax.f32 %v1134_v19, %v5318_v50  ;;  %v5321_v32 = vpop.f32.mrb[39].mxu1 }
 0x37d   : > { %8517 = vst [vmem:[#allocation47_spill] sm:$0xff] %v5321_v32  ;;  %v1173_v52 = vmax.f32 %v1171_v4, %v5321_v32 }
 0x381   : > { %v5324_v51 = vpop.f32.mrb[40].mxu1 }
 0x382   : > { %v1137_v63 = vmax.f32 %v1135_v57, %v5324_v51  ;;  %v5327_v1 = vpop.f32.mrb[41].mxu1 }
 0x383   : > { %8518 = vst [vmem:[#allocation48_spill] sm:$0xff] %v5327_v1  ;;  %v1174_v3 = vmax.f32 %v1172_v53, %v5327_v1  ;;  %v5330_v13 = vpop.f32.mrb[42].mxu1 }
 0x384   : > { %v1138_v17 = vmax.f32 %v1136_v30, %v5330_v13  ;;  %v5333_v58 = vpop.f32.mrb[43].mxu1 }
 0x385   : > { %8519 = vst [vmem:[#allocation49_spill] sm:$0xff] %v5333_v58  ;;  %v1175_v19 = vmax.f32 %v1173_v52, %v5333_v58 }
 0x389   : > { %v5336_v23 = vpop.f32.mrb[44].mxu1 }
 0x38a   : > { %v1139_v4 = vmax.f32 %v1137_v63, %v5336_v23  ;;  %v5339_v26 = vpop.f32.mrb[45].mxu1 }
 0x38b   : > { %8520 = vst [vmem:[#allocation50_spill] sm:$0xff] %v5339_v26  ;;  %v1176_v57 = vmax.f32 %v1174_v3, %v5339_v26  ;;  %v5342_v54 = vpop.f32.mrb[46].mxu1 }
 0x38c   : > { %v1140_v53 = vmax.f32 %v1138_v17, %v5342_v54  ;;  %v5345_v44 = vpop.f32.mrb[47].mxu1 }
 0x38d   : > { %8521 = vst [vmem:[#allocation51_spill] sm:$0xff] %v5345_v44  ;;  %v1177_v30 = vmax.f32 %v1175_v19, %v5345_v44 }
 0x391   : > { %v5348_v46 = vpop.f32.mrb[48].mxu1 }
 0x392   : > { %v1141_v52 = vmax.f32 %v1139_v4, %v5348_v46  ;;  %v5351_v45 = vpop.f32.mrb[49].mxu1  ;;  %v696_v4 = vpop.f32.mrb[49].mxu0 }
 0x393   : > { %8522 = vst [vmem:[#allocation52_spill] sm:$0xff] %v5351_v45  ;;  %v1178_v63 = vmax.f32 %v1176_v57, %v5351_v45  ;;  %v5354_v48 = vpop.f32.mrb[50].mxu1  ;;  %v700_v57 = vpop.f32.mrb[50].mxu0 }
 0x394   : > { %v1142_v3 = vmax.f32 %v1140_v53, %v5354_v48  ;;  %v5357_v38 = vpop.f32.mrb[51].mxu1  ;;  %v702_v58 = vpop.f32.mrb[51].mxu0 }
 0x395   : > { %8523 = vst [vmem:[#allocation53_spill] sm:$0xff] %v5357_v38  ;;  %v1179_v17 = vmax.f32 %v1177_v30, %v5357_v38  ;;  %v2298_v38 = vpack.c.bf16 %v700_v57, %v694_v39  ;;  %v2299_v1 = vpack.c.bf16 %v702_v58, %v696_v4  ;;  %v706_v32 = vpop.f32.mrb[52].mxu0 }
 0x396   : > { %v708_v60 = vpop.f32.mrb[53].mxu0 }
 0x397   : > { %2302 = vxpose.xlu0.c.b16.start [1/2] (short) %v2298_v38, 128  ;;  %2318 = vxpose.xlu1.c.b16.start [1/2] (short) %v2299_v1, 128 }
 0x399   : > { %v5360_v40 = vpop.f32.mrb[52].mxu1 }
 0x39a   : > { %v1143_v19 = vmax.f32 %v1141_v52, %v5360_v40  ;;  %v5363_v42 = vpop.f32.mrb[53].mxu1  ;;  %v712_v52 = vpop.f32.mrb[54].mxu0 }
 0x39b   : > { %8524 = vst [vmem:[#allocation54_spill] sm:$0xff] %v5363_v42  ;;  %v1180_v44 = vmax.f32 %v1178_v63, %v5363_v42  ;;  %v5366_v26 = vpop.f32.mrb[54].mxu1  ;;  %v714_v62 = vpop.f32.mrb[55].mxu0  ;;  %v2300_v63 = vpack.c.bf16 %v712_v52, %v706_v32 }
 0x39c   : > { %v1144_v45 = vmax.f32 %v1142_v3, %v5366_v26  ;;  %v5369_v53 = vpop.f32.mrb[55].mxu1  ;;  %v2301_v42 = vpack.c.bf16 %v714_v62, %v708_v60 }
 0x39d   : > { %8525 = vst [vmem:[#allocation55_spill] sm:$0xff] %v5369_v53  ;;  %v1181_v30 = vmax.f32 %v1179_v17, %v5369_v53  ;;  %2303 = vxpose.xlu0.c.b16.end [2/2] (short) %v2300_v63, 128  ;;  %v718_v53 = vpop.f32.mrb[56].mxu0 }
 0x39e   : > { %2319 = vxpose.xlu1.c.b16.end [2/2] (short) %v2301_v42, 128 }
 0x3a1   : > { %v5372_v6 = vpop.f32.mrb[56].mxu1 }
 0x3a2   : > { %v1145_v5 = vmax.f32 %v1143_v19, %v5372_v6  ;;  %v5375_v3 = vpop.f32.mrb[57].mxu1 }
 0x3a3   : > { %8526 = vst [vmem:[#allocation56_spill] sm:$0xff] %v5375_v3  ;;  %v1182_v25 = vmax.f32 %v1180_v44, %v5375_v3  ;;  %v5378_v41 = vpop.f32.mrb[58].mxu1 }
 0x3a4   : > { %v1146_v39 = vmax.f32 %v1144_v45, %v5378_v41  ;;  %v5381_v38 = vpop.f32.mrb[59].mxu1 }
 0x3a5   : > { %8527 = vst [vmem:[#allocation57_spill] sm:$0xff] %v5381_v38  ;;  %v1183_v1 = vmax.f32 %v1181_v30, %v5381_v38 }
 0x3a9   : > { %v5384_v58 = vpop.f32.mrb[60].mxu1 }
 0x3aa   : > { %v1147_v60 = vmax.f32 %v1145_v5, %v5384_v58  ;;  %v5387_v62 = vpop.f32.mrb[61].mxu1 }
 0x3ab   : > { %8528 = vst [vmem:[#allocation58_spill] sm:$0xff] %v5387_v62  ;;  %v1184_v32 = vmax.f32 %v1182_v25, %v5387_v62  ;;  %v5390_v17 = vpop.f32.mrb[62].mxu1  ;;  %v720_v25 = vpop.f32.mrb[57].mxu0 }
 0x3ac   : > { %v1148_v44 = vmax.f32 %v1146_v39, %v5390_v17  ;;  %v5393_v19 = vpop.f32.mrb[63].mxu1  ;;  %v724_v33 = vpop.f32.mrb[58].mxu0 }
 0x3ad   : > { %8529 = vst [vmem:[#allocation59_spill] sm:$0xff] %v5393_v19  ;;  %v1185_v42 = vmax.f32 %v1183_v1, %v5393_v19  ;;  %v726_v39 = vpop.f32.mrb[59].mxu0  ;;  %v3026_v2 = vpack.c.bf16 %v724_v33, %v718_v53 }
 0x3ae   : > { %v1149_v45 = vmax.f32 %v1147_v60, %v1148_v44  ;;  %v3027_v1 = vpack.c.bf16 %v726_v39, %v720_v25 }
 0x3af   : > { %v1186_v4 = vmax.f32 %v1184_v32, %v1185_v42 }
 0x3b0   : > { %v1150_v57 = vrot.slane %v1149_v45, 4 }
 0x3b1   : > { %v1187_v30 = vrot.slane %v1186_v4, 4 }
 0x3b2   : > { %v1151_v52 = vmax.f32 %v1149_v45, %v1150_v57  ;;  %v5408_v45 = vpop.f32.mrb[60].mxu0 }
 0x3b3   : > { %v1188_v63 = vmax.f32 %v1186_v4, %v1187_v30 }
 0x3b4   : > { %v1152_v38 = vrot.slane %v1151_v52, 2 }
 0x3b5   : > { %v1189_v5 = vrot.slane %v1188_v63, 2 }
 0x3b6   : > { %v1153_v3 = vmax.f32 %v1151_v52, %v1152_v38  ;;  %3030 = vxpose.xlu0.c.b16.start [1/2] (short) %v3026_v2, 128 }
 0x3b7   : > { %v1190_v21 = vmax.f32 %v1188_v63, %v1189_v5  ;;  %3046 = vxpose.xlu1.c.b16.start [1/2] (short) %v3027_v1, 128 }
 0x3b8   : > { %v1154_v62 = vrot.slane %v1153_v3, 1 }
 0x3b9   : > { %v1191_v55 = vrot.slane %v1190_v21, 1 }
 0x3ba   : > { %v5396_v61 = vmax.f32 %v1153_v3, %v1154_v62 }
 0x3bb   : > { %v5398_v60 = vmax.f32 %v1190_v21, %v1191_v55 }
 0x3bc   : > { %v1193_v32 = vsub.f32 %v5204_v35, %v5396_v61  ;;  %v1195_v44 = vsub.f32 %v5208_v37, %v5396_v61  ;;  %v1197_v38 = vsub.f32 %v5212_v12, %v5396_v61  ;;  %v1199_v42 = vsub.f32 %v5220_v16, %v5396_v61  ;;  %v5418_v12 = vpop.f32.mrb[61].mxu0 }
 0x3bd   : > { %v1201_v33 = vsub.f32 %v5228_v20, %v5396_v61  ;;  %v1203_v55 = vsub.f32 %v5234_v24, %v5396_v61  ;;  %v1205_v35 = vsub.f32 %v5240_v29, %v5396_v61  ;;  %v1207_v37 = vsub.f32 %v5246_v34, %v5396_v61  ;;  %v5428_v21 = vpop.f32.mrb[62].mxu0 }
 0x3be   : > { %v1209_v2 = vsub.f32 %v5252_v8, %v5396_v61  ;;  %v1211_v16 = vsub.f32 %v5258_v59, %v5396_v61  ;;  %v1213_v20 = vsub.f32 %v5264_v28, %v5396_v61  ;;  %v1215_v24 = vsub.f32 %v5270_v10, %v5396_v61  ;;  %v5438_v53 = vpop.f32.mrb[63].mxu0 }
 0x3bf   : > { %v1217_v29 = vsub.f32 %v5276_v47, %v5396_v61  ;;  %v1219_v34 = vsub.f32 %v5282_v49, %v5396_v61  ;;  %v1221_v8 = vsub.f32 %v5288_v43, %v5396_v61  ;;  %v1223_v59 = vsub.f32 %v5294_v0, %v5396_v61  ;;  %v5448_v3 = vpop.f32.mrb[64].mxu0 }
 0x3c0   : > { %v1225_v28 = vsub.f32 %v5300_v7, %v5396_v61  ;;  %v1227_v10 = vsub.f32 %v5306_v9, %v5396_v61  ;;  %v1229_v47 = vsub.f32 %v5312_v56, %v5396_v61  ;;  %v1231_v49 = vsub.f32 %v5318_v50, %v5396_v61  ;;  %v5458_v62 = vpop.f32.mrb[65].mxu0 }
 0x3c1   : > { %v1233_v43 = vsub.f32 %v5324_v51, %v5396_v61  ;;  %v1235_v0 = vsub.f32 %v5330_v13, %v5396_v61  ;;  %v1237_v7 = vsub.f32 %v5336_v23, %v5396_v61  ;;  %v1239_v9 = vsub.f32 %v5342_v54, %v5396_v61  ;;  %v5468_v4 = vpop.f32.mrb[66].mxu0 }
 0x3c2   : > { %v5478_v52 = vpop.f32.mrb[67].mxu0  ;;  %v1257_v63 = vmul.f32 1.442695, %v1193_v32  ;;  %v1261_v5 = vmul.f32 1.442695, %v1195_v44 }
 0x3c3   : > { %v1265_v25 = vmul.f32 1.442695, %v1197_v38  ;;  %v1269_v1 = vmul.f32 1.442695, %v1199_v42  ;;  %v1273_v54 = vmul.f32 1.442695, %v1201_v33 }
 0x3c4   : > { %4184 = vpow2.f32 %v1257_v63  ;;  %v1277_v13 = vmul.f32 1.442695, %v1203_v55  ;;  %v1281_v57 = vmul.f32 1.442695, %v1205_v35  ;;  %v1285_v30 = vmul.f32 1.442695, %v1207_v37  ;;  %v320_v55 = vpop.trf.xlu1 }
 0x3c5   : > { %4186 = vpow2.f32 %v1261_v5  ;;  %v1289_v51 = vmul.f32 1.442695, %v1209_v2  ;;  %v1293_v50 = vmul.f32 1.442695, %v1211_v16  ;;  %v1297_v32 = vmul.f32 1.442695, %v1213_v20  ;;  %4007 = vmatmul.mubr.msk.f32.gmra.mrb[72].mxu0 %vm334_vm1, %v320_v55 }
 0x3c6   : > { %4188 = vpow2.f32 %v1265_v25  ;;  %v1301_v44 = vmul.f32 1.442695, %v1215_v24  ;;  %v1305_v38 = vmul.f32 1.442695, %v1217_v29  ;;  %v1309_v39 = vmul.f32 1.442695, %v1219_v34 }
 0x3c7   : > { %4190 = vpow2.f32 %v1269_v1  ;;  %v1313_v42 = vmul.f32 1.442695, %v1221_v8  ;;  %v1317_v56 = vmul.f32 1.442695, %v1223_v59  ;;  %v1321_v23 = vmul.f32 1.442695, %v1225_v28 }
 0x3c8   : > { %4192 = vpow2.f32 %v1273_v54  ;;  %v1325_v63 = vmul.f32 1.442695, %v1227_v10  ;;  %v5484_v33 = vmul.f32 1.442695, %v1229_v47  ;;  %v5486_v35 = vmul.f32 1.442695, %v1231_v49 }
 0x3c9   : > { %4194 = vpow2.f32 %v1277_v13  ;;  %v5488_v37 = vmul.f32 1.442695, %v1233_v43  ;;  %v5490_v2 = vmul.f32 1.442695, %v1235_v0  ;;  %v5493_v16 = vmul.f32 1.442695, %v1237_v7 }
 0x3ca   : > { %4196 = vpow2.f32 %v1281_v57  ;;  %v5495_v20 = vmul.f32 1.442695, %v1239_v9  ;;  %v5499_v29 = vpop.f32.mrb[68].mxu0  ;;  %v8531_v34 = vmov 0.0   ;;  %v8533_v0 = vld [vmem:[#allocation36_spill] sm:$0xff]  ;;  %v8535_v13 = vld [vmem:[#allocation37_spill] sm:$0xff]  ;;  %v8558_v24 = vsub.f32 %v5348_v46, %v5396_v61 }
 0x3cb   : > { %4198 = vpow2.f32 %v1285_v30  ;;  %8530 = vst [vmem:[#allocation60_spill] sm:$0xff] %v5499_v29  ;;  %770 = vmatprep.mubr.f32.mxu0 %v8531_v34  ;;  %v5508_v10 = vpop.f32.mrb[69].mxu0  ;;  %v8536_v57 = vld [vmem:[#allocation38_spill] sm:$0xff]  ;;  %v8537_v5 = vld [vmem:[#allocation39_spill] sm:$0xff]  ;;  %v8551_v49 = vld [vmem:[#allocation52_spill] sm:$0xff]  ;;  %v8560_v46 = vsub.f32 %v5360_v40, %v5396_v61  ;;  %v8562_v40 = vsub.f32 %v5372_v6, %v5396_v61 }
 0x3cc   : > { %4200 = vpow2.f32 %v1289_v51  ;;  %8532 = vst [vmem:[#allocation61_spill] sm:$0xff] %v5508_v10  ;;  %v5518_v9 = vpop.f32.mrb[70].mxu0  ;;  %v8541_v25 = vld [vmem:[#allocation42_spill] sm:$0xff] }
 0x3cd   : > { %4202 = vpow2.f32 %v1293_v50  ;;  %8534 = vst [vmem:[#allocation36_spill] sm:$0xff] %v5518_v9  ;;  %v321_v50 = vpop.trf.xlu1  ;;  %v5528_v1 = vpop.f32.mrb[71].mxu0  ;;  %v8592_v9 = vld [vmem:[#allocation47_spill] sm:$0xff] }
 0x3ce   : > { %v5510_v47 = vpop.eup %4184  ;;  %4204 = vpow2.f32 %v1297_v32  ;;  %8538 = vst [vmem:[#allocation37_spill] sm:$0xff] %v5528_v1  ;;  %4008 = vmatmul.mubr.msk.f32.gmra.mrb[74].mxu0 %vm334_vm1, %v321_v50  ;;  %v8554_v1 = vld [vmem:[#allocation55_spill] sm:$0xff] }
 0x3cf   : > { %v5520_v51 = vpop.eup %4186  ;;  %4206 = vpow2.f32 %v1301_v44  ;;  %v8539_v44 = vld [vmem:[#allocation40_spill] sm:$0xff]  ;;  %776 = vmatprep.mubr.f32.mxu0 %v8531_v34 }
 0x3d0   : > { %v5531_v32 = vpop.eup %4188  ;;  %4208 = vpow2.f32 %v1305_v38  ;;  %v1385_v55 = vadd.f32 %v5520_v51, %v5510_v47 }
 0x3d1   : > { %v5540_v30 = vpop.eup %4190  ;;  %4210 = vpow2.f32 %v1309_v39  ;;  %v322_v10 = vpop.trf.xlu1 }
 0x3d2   : > { %v5548_v8 = vpop.eup %4192  ;;  %4212 = vpow2.f32 %v1313_v42  ;;  %v1386_v7 = vadd.f32 %v5531_v32, %v1385_v55  ;;  %4009 = vmatmul.mubr.msk.f32.gmra.mrb[76].mxu0 %vm334_vm1, %v322_v10  ;;  %v8556_v42 = vld [vmem:[#allocation57_spill] sm:$0xff] }
 0x3d3   : > { %v5555_v54 = vpop.eup %4194  ;;  %4214 = vpow2.f32 %v1317_v56  ;;  %782 = vmatprep.mubr.f32.mxu0 %v8531_v34  ;;  %v1353_v56 = vmul.f32 1.442695, %v8558_v24 }
 0x3d4   : > { %v5564_v55 = vpop.eup %4196  ;;  %4216 = vpow2.f32 %v1321_v23  ;;  %v1387_v39 = vadd.f32 %v5540_v30, %v1386_v7 }
 0x3d5   : > { %v5572_v50 = vpop.eup %4198  ;;  %4218 = vpow2.f32 %v1325_v63  ;;  %v8555_v63 = vld [vmem:[#allocation56_spill] sm:$0xff]  ;;  %v323_v38 = vpop.trf.xlu1 }
 0x3d6   : > { %v5580_v59 = vpop.eup %4200  ;;  %4220 = vpow2.f32 %v5484_v33  ;;  %v1388_v43 = vadd.f32 %v5548_v8, %v1387_v39  ;;  %4010 = vmatmul.mubr.msk.f32.gmra.mrb[78].mxu0 %vm334_vm1, %v323_v38  ;;  %v8559_v33 = vsub.f32 %v5354_v48, %v5396_v61 }
 0x3d7   : > { %v5588_v28 = vpop.eup %4202  ;;  %4222 = vpow2.f32 %v5486_v35  ;;  %788 = vmatprep.mubr.f32.mxu0 %v8531_v34 }
 0x3d8   : > { %v5598_v39 = vpop.eup %4204  ;;  %4224 = vpow2.f32 %v5488_v37  ;;  %v1389_v35 = vadd.f32 %v5555_v54, %v1388_v43  ;;  %v1357_v38 = vmul.f32 1.442695, %v8559_v33  ;;  %v1361_v37 = vmul.f32 1.442695, %v8560_v46 }
 0x3d9   : > { %v5606_v7 = vpop.eup %4206  ;;  %4226 = vpow2.f32 %v5490_v2  ;;  %v324_v43 = vpop.trf.xlu1  ;;  %v8561_v2 = vsub.f32 %v5366_v26, %v5396_v61  ;;  %v8563_v26 = vsub.f32 %v5378_v41, %v5396_v61  ;;  %v8566_v41 = vsub.f32 %v5206_v36, %v5398_v60 }
 0x3da   : > { %v5612_v10 = vpop.eup %4208  ;;  %4228 = vpow2.f32 %v5493_v16  ;;  %v1390_v24 = vadd.f32 %v5564_v55, %v1389_v35  ;;  %4011 = vmatmul.mubr.msk.f32.gmra.mrb[80].mxu0 %vm334_vm1, %v324_v43  ;;  %v1369_v16 = vmul.f32 1.442695, %v8562_v40  ;;  %v8569_v36 = vsub.f32 %v5224_v18, %v5398_v60 }
 0x3db   : > { %v5619_v19 = vpop.eup %4210  ;;  %4230 = vpow2.f32 %v5495_v20  ;;  %v1365_v48 = vmul.f32 1.442695, %v8561_v2  ;;  %794 = vmatprep.mubr.f32.mxu0 %v8531_v34  ;;  %v1373_v20 = vmul.f32 1.442695, %v8563_v26  ;;  %v1259_v26 = vmul.f32 1.442695, %v8566_v41 }
 0x3dc   : > { %v5626_v33 = vpop.eup %4212  ;;  %4232 = vpow2.f32 %v1353_v56  ;;  %v1391_v35 = vadd.f32 %v5572_v50, %v1390_v24  ;;  %v8564_v56 = vsub.f32 %v5384_v58, %v5396_v61  ;;  %v8573_v18 = vsub.f32 %v5249_v15, %v5398_v60 }
 0x3dd   : > { %v5633_v46 = vpop.eup %4214  ;;  %4234 = vpow2.f32 %v1357_v38  ;;  %v325_v40 = vpop.trf.xlu1  ;;  %v8565_v38 = vsub.f32 %v5390_v17, %v5396_v61 }
 0x3de   : > { %v5638_v2 = vpop.eup %4216  ;;  %4236 = vpow2.f32 %v1361_v37  ;;  %v1377_v43 = vmul.f32 1.442695, %v8564_v56  ;;  %v1392_v6 = vadd.f32 %v5580_v59, %v1391_v35  ;;  %4012 = vmatmul.mubr.msk.f32.gmra.mrb[82].mxu0 %vm334_vm1, %v325_v40  ;;  %v8567_v35 = vsub.f32 %v5210_v11, %v5398_v60 }
 0x3df   : > { %v5644_v24 = vpop.eup %4218  ;;  %4238 = vpow2.f32 %v1365_v48  ;;  %v1381_v23 = vmul.f32 1.442695, %v8565_v38  ;;  %v8568_v48 = vsub.f32 %v5216_v14, %v5398_v60  ;;  %800 = vmatprep.mubr.f32.mxu0 %v8531_v34  ;;  %v1271_v40 = vmul.f32 1.442695, %v8569_v36 }
 0x3e0   : > { %v5653_v37 = vpop.eup %4220  ;;  %4240 = vpow2.f32 %v1369_v16  ;;  %v1393_v58 = vadd.f32 %v5588_v28, %v1392_v6  ;;  %v1263_v56 = vmul.f32 1.442695, %v8567_v35  ;;  %v8570_v16 = vsub.f32 %v5231_v22, %v5398_v60 }
 0x3e1   : > { %v1267_v61 = vmul.f32 1.442695, %v8568_v48  ;;  %v5663_v17 = vpop.eup %4222  ;;  %4242 = vpow2.f32 %v1373_v20  ;;  %v8571_v11 = vsub.f32 %v5237_v27, %v5398_v60  ;;  %v8572_v20 = vsub.f32 %v5243_v31, %v5398_v60  ;;  %v326_v36 = vpop.trf.xlu1 }
 0x3e2   : > { %v1275_v6 = vmul.f32 1.442695, %v8570_v16  ;;  %v5674_v41 = vpop.eup %4224  ;;  %4244 = vpow2.f32 %v1377_v43  ;;  %v1394_v14 = vadd.f32 %v5598_v39, %v1393_v58  ;;  %v1287_v48 = vmul.f32 1.442695, %v8573_v18  ;;  %4013 = vmatmul.mubr.msk.f32.gmra.mrb[84].mxu0 %vm334_vm1, %v326_v36  ;;  %v8590_v36 = vld [vmem:[#allocation46_spill] sm:$0xff] }
 0x3e3   : > { %v1279_v38 = vmul.f32 1.442695, %v8571_v11  ;;  %v1283_v35 = vmul.f32 1.442695, %v8572_v20  ;;  %v5683_v22 = vpop.eup %4226  ;;  %4246 = vpow2.f32 %v1381_v23  ;;  %v8574_v27 = vsub.f32 %v8533_v0, %v5398_v60  ;;  %806 = vmatprep.mubr.f32.mxu0 %v8531_v34 }
 0x3e4   : > { %v8575_v43 = vsub.f32 %v8535_v13, %v5398_v60  ;;  %v8576_v31 = vsub.f32 %v8536_v57, %v5398_v60  ;;  %v5697_v15 = vpop.eup %4228  ;;  %v1395_v20 = vadd.f32 %v5606_v7, %v1394_v14  ;;  %4248 = vpow2.f32 %v1259_v26  ;;  %v8588_v26 = vld [vmem:[#allocation45_spill] sm:$0xff] }
 0x3e5   : > { %v1291_v16 = vmul.f32 1.442695, %v8574_v27  ;;  %v8577_v0 = vsub.f32 %v8537_v5, %v5398_v60  ;;  %v8578_v13 = vsub.f32 %v8539_v44, %v5398_v60  ;;  %v5709_v57 = vpop.eup %4230  ;;  %4250 = vpow2.f32 %v1263_v56 }
 0x3e6   : > { %v1295_v58 = vmul.f32 1.442695, %v8575_v43  ;;  %v5694_v11 = vmul.f32 1.442695, %v8576_v31  ;;  %v5717_v14 = vpop.eup %4232  ;;  %v1396_v44 = vadd.f32 %v5612_v10, %v1395_v20  ;;  %4252 = vpow2.f32 %v1267_v61  ;;  %v327_v43 = vpop.trf.xlu1 }
 0x3e7   : > { %v1303_v23 = vmul.f32 1.442695, %v8577_v0  ;;  %v5706_v18 = vmul.f32 1.442695, %v8578_v13  ;;  %v5724_v31 = vpop.eup %4234  ;;  %4254 = vpow2.f32 %v1271_v40  ;;  %4014 = vmatmul.mubr.msk.f32.gmra.mrb[86].mxu0 %vm334_vm1, %v327_v43  ;;  %v3029_v40 = vpack.c.bf16 %v5438_v53, %v5418_v12 }
 0x3e8   : > { %v5733_v61 = vpop.eup %4236  ;;  %v1397_v27 = vadd.f32 %v5619_v19, %v1396_v44  ;;  %4256 = vpow2.f32 %v1275_v6  ;;  %812 = vmatprep.mubr.f32.mxu0 %v8531_v34  ;;  %v3028_v6 = vpack.c.bf16 %v5428_v21, %v5408_v45  ;;  %v1462_v21 = vpack.c.bf16 %v5478_v52, %v5458_v62  ;;  %v8579_v62 = vld [vmem:[#allocation41_spill] sm:$0xff] }
 0x3e9   : > { %v5741_v0 = vpop.eup %4238  ;;  %4258 = vpow2.f32 %v1279_v38  ;;  %3047 = vxpose.xlu1.c.b16.end [2/2] (short) %v3029_v40, 128  ;;  %v8580_v52 = vsub.f32 %v8579_v62, %v5398_v60  ;;  %v8584_v62 = vld [vmem:[#allocation43_spill] sm:$0xff] }
 0x3ea   : > { %v5749_v44 = vpop.eup %4240  ;;  %v1398_v56 = vadd.f32 %v5626_v33, %v1397_v27  ;;  %4260 = vpow2.f32 %v1283_v35  ;;  %v328_v13 = vpop.trf.xlu1  ;;  %3031 = vxpose.xlu0.c.b16.end [2/2] (short) %v3028_v6, 128  ;;  %1529 = vmatprep.mubr.bf16.mxu1 %v1462_v21  ;;  %v8585_v21 = vsub.f32 %v8584_v62, %v5398_v60  ;;  %v8589_v62 = vsub.f32 %v8588_v26, %v5398_v60  ;;  %v8594_v26 = vld [vmem:[#allocation48_spill] sm:$0xff] }
 0x3eb   : > { %v5756_v5 = vpop.eup %4242  ;;  %4262 = vpow2.f32 %v1287_v48  ;;  %4015 = vmatmul.mubr.msk.f32.gmra.mrb[88].mxu0 %vm334_vm1, %v328_v13  ;;  %v1311_v13 = vmul.f32 1.442695, %v8580_v52  ;;  %v8583_v48 = vsub.f32 %v8541_v25, %v5398_v60 }
 0x3ec   : > { %v5765_v12 = vpop.eup %4244  ;;  %v1399_v53 = vadd.f32 %v5633_v46, %v1398_v56  ;;  %4264 = vpow2.f32 %v1291_v16  ;;  %818 = vmatprep.mubr.f32.mxu0 %v8531_v34  ;;  %v1319_v52 = vmul.f32 1.442695, %v8585_v21  ;;  %v8586_v16 = vld [vmem:[#allocation44_spill] sm:$0xff]  ;;  %v1327_v21 = vmul.f32 1.442695, %v8589_v62 }
 0x3ed   : > { %v5773_v27 = vpop.eup %4246  ;;  %4266 = vpow2.f32 %v1295_v58  ;;  %v1315_v35 = vmul.f32 1.442695, %v8583_v48  ;;  %v8587_v20 = vsub.f32 %v8586_v16, %v5398_v60  ;;  %v8595_v62 = vsub.f32 %v8594_v26, %v5398_v60 }
 0x3ee   : > { %v4249_v40 = vpop.eup %4248  ;;  %v1400_v45 = vadd.f32 %v5638_v2, %v1399_v53  ;;  %4268 = vpow2.f32 %v5694_v11  ;;  %v329_v43 = vpop.trf.xlu1 }
 0x3ef   : > { %v4251_v38 = vpop.eup %4250  ;;  %4270 = vpow2.f32 %v1303_v23  ;;  %v1323_v53 = vmul.f32 1.442695, %v8587_v20  ;;  %4016 = vmatmul.mubr.msk.f32.gmra.mrb[90].mxu0 %vm334_vm1, %v329_v43  ;;  %v8591_v20 = vsub.f32 %v8590_v36, %v5398_v60  ;;  %v1339_v56 = vmul.f32 1.442695, %v8595_v62 }
 0x3f0   : > { %v4253_v11 = vpop.eup %4252  ;;  %v1401_v25 = vadd.f32 %v5644_v24, %v1400_v45  ;;  %4272 = vpow2.f32 %v5706_v18  ;;  %v1422_v48 = vadd.f32 %v4251_v38, %v4249_v40  ;;  %v1466_v58 = vpack.c.bf16 %v4251_v38, %v4249_v40  ;;  %824 = vmatprep.mubr.f32.mxu0 %v8531_v34 }
 0x3f1   : > { %v4255_v23 = vpop.eup %4254  ;;  %4274 = vpow2.f32 %v1311_v13  ;;  %v1331_v16 = vmul.f32 1.442695, %v8591_v20  ;;  %v8593_v13 = vsub.f32 %v8592_v9, %v5398_v60  ;;  %v8596_v36 = vpack.c.bf16 %v5520_v51, %v5510_v47 }
 0x3f2   : > { %v4257_v43 = vpop.eup %4256  ;;  %v1402_v29 = vadd.f32 %v5653_v37, %v1401_v25  ;;  %4276 = vpow2.f32 %v1315_v35  ;;  %v1423_v45 = vadd.f32 %v4253_v11, %v1422_v48  ;;  %1497 = vmatprep.subr.bf16.mxu1 %v1466_v58  ;;  %v1468_v18 = vpack.c.bf16 %v4255_v23, %v4253_v11  ;;  %v330_v38 = vpop.trf.xlu1  ;;  %v8597_v25 = vld [vmem:[#allocation49_spill] sm:$0xff] }
 0x3f3   : > { %v4259_v40 = vpop.eup %4258  ;;  %4278 = vpow2.f32 %v1319_v52  ;;  %v1335_v6 = vmul.f32 1.442695, %v8593_v13  ;;  %1498 = vmatpush1.bf16.msra.mxu1 %v8596_v36  ;;  %4017 = vmatmul.mubr.msk.f32.gmra.mrb[92].mxu0 %vm334_vm1, %v330_v38  ;;  %v8598_v48 = vsub.f32 %v8597_v25, %v5398_v60  ;;  %v8599_v13 = vld [vmem:[#allocation50_spill] sm:$0xff]  ;;  %v8601_v38 = vmov 0  }
 0x3f4   : > { %v4261_v35 = vpop.eup %4260  ;;  %v1403_v58 = vadd.f32 %v5663_v17, %v1402_v29  ;;  %4280 = vpow2.f32 %v1323_v53  ;;  %v1424_v11 = vadd.f32 %v4255_v23, %v1423_v45  ;;  %1499 = vmatprep.subr.bf16.mxu1 %v1468_v18  ;;  %v1470_v52 = vpack.c.bf16 %v4259_v40, %v4257_v43  ;;  %830 = vmatprep.mubr.f32.mxu0 %v8531_v34 }
 0x3f5   : > { %v4263_v9 = vpop.eup %4262  ;;  %4282 = vpow2.f32 %v1327_v21  ;;  %v1343_v20 = vmul.f32 1.442695, %v8598_v48  ;;  %v8600_v47 = vsub.f32 %v8599_v13, %v5398_v60  ;;  %4181 = vset.pattern.permute.xlu0 %v8601_v38  ;;  %v8602_v21 = vld [vmem:[#allocation51_spill] sm:$0xff]  ;;  %v8604_v25 = vsub.f32 %v8551_v49, %v5398_v60 }
 0x3f6   : > { %v4265_v26 = vpop.eup %4264  ;;  %v1404_v29 = vadd.f32 %v5674_v41, %v1403_v58  ;;  %4284 = vpow2.f32 %v1331_v16  ;;  %v1425_v53 = vadd.f32 %v4257_v43, %v1424_v11  ;;  %v1472_v23 = vpack.c.bf16 %v4263_v9, %v4261_v35  ;;  %v331_v45 = vpop.trf.xlu1 }
 0x3f7   : > { %v1347_v51 = vmul.f32 1.442695, %v8600_v47  ;;  %v4267_v18 = vpop.eup %4266  ;;  %4286 = vpow2.f32 %v1335_v6  ;;  %v8603_v62 = vsub.f32 %v8602_v21, %v5398_v60  ;;  %v1355_v48 = vmul.f32 1.442695, %v8604_v25  ;;  %4018 = vmatmul.mubr.msk.f32.gmra.mrb[94].mxu0 %vm334_vm1, %v331_v45  ;;  %v8606_v47 = vld [vmem:[#allocation53_spill] sm:$0xff] }
 0x3f8   : > { %v8605_v13 = vpack.c.bf16 %v5540_v30, %v5531_v32  ;;  %v4269_v16 = vpop.eup %4268  ;;  %v1405_v43 = vadd.f32 %v5683_v22, %v1404_v29  ;;  %4288 = vpow2.f32 %v1339_v56  ;;  %v1426_v58 = vadd.f32 %v4259_v40, %v1425_v53 }
 0x3f9   : > { %v1351_v36 = vmul.f32 1.442695, %v8603_v62  ;;  %v1474_v6 = vpack.c.bf16 %v4267_v18, %v4265_v26  ;;  %v4271_v11 = vpop.eup %4270  ;;  %4290 = vpow2.f32 %v1343_v20  ;;  %v8607_v21 = vsub.f32 %v8606_v47, %v5398_v60  ;;  %v8608_v62 = vld [vmem:[#allocation54_spill] sm:$0xff] }
 0x3fa   : > { %1500 = vmatpush1.bf16.msra.mxu1 %v8605_v13  ;;  %v8609_v25 = vsub.f32 %v8608_v62, %v5398_v60  ;;  %v4273_v32 = vpop.eup %4272  ;;  %v1406_v45 = vadd.f32 %v5697_v15, %v1405_v43  ;;  %4292 = vpow2.f32 %v1347_v51  ;;  %v1427_v13 = vadd.f32 %v4261_v35, %v1426_v58  ;;  %v8614_v62 = vld [vmem:[#allocation58_spill] sm:$0xff] }
 0x3fb   : > { %1501 = vmatprep.subr.bf16.mxu1 %v1470_v52  ;;  %v1359_v49 = vmul.f32 1.442695, %v8607_v21  ;;  %v1476_v29 = vpack.c.bf16 %v4271_v11, %v4269_v16  ;;  %v4275_v56 = vpop.eup %4274  ;;  %4294 = vpow2.f32 %v1351_v36  ;;  %v8610_v40 = vsub.f32 %v8554_v1, %v5398_v60 }
 0x3fc   : > { %v1363_v30 = vmul.f32 1.442695, %v8609_v25  ;;  %v8611_v20 = vsub.f32 %v8555_v63, %v5398_v60  ;;  %v8612_v47 = vpack.c.bf16 %v5555_v54, %v5548_v8  ;;  %v4277_v21 = vpop.eup %4276  ;;  %v1407_v43 = vadd.f32 %v5709_v57, %v1406_v45 }
 0x3fd   : > { %v1367_v52 = vmul.f32 1.442695, %v8610_v40  ;;  %4296 = vpow2.f32 %v1355_v48  ;;  %v1428_v35 = vadd.f32 %v4263_v9, %v1427_v13  ;;  %v1478_v51 = vpack.c.bf16 %v4275_v56, %v4273_v32  ;;  %v4279_v36 = vpop.eup %4278  ;;  %v8616_v9 = vld [vmem:[#allocation59_spill] sm:$0xff] }
 0x3fe   : > { %v1371_v53 = vmul.f32 1.442695, %v8611_v20  ;;  %1502 = vmatpush1.bf16.msra.mxu1 %v8612_v47  ;;  %4298 = vpow2.f32 %v1359_v49  ;;  %v8613_v1 = vsub.f32 %v8556_v42, %v5398_v60  ;;  %v8615_v63 = vsub.f32 %v8614_v62, %v5398_v60  ;;  %v4281_v40 = vpop.eup %4280 }
 0x3ff   : > { %1503 = vmatprep.subr.bf16.mxu1 %v1472_v23  ;;  %v1408_v8 = vadd.f32 %v5717_v14, %v1407_v43  ;;  %4300 = vpow2.f32 %v1363_v30  ;;  %v1429_v54 = vadd.f32 %v4265_v26, %v1428_v35  ;;  %v1480_v45 = vpack.c.bf16 %v4279_v36, %v4277_v21  ;;  %v4283_v48 = vpop.eup %4282 }
 0x400   : > { %v1375_v58 = vmul.f32 1.442695, %v8613_v1  ;;  %v1379_v25 = vmul.f32 1.442695, %v8615_v63  ;;  %4302 = vpow2.f32 %v1367_v52  ;;  %v8617_v23 = vsub.f32 %v8616_v9, %v5398_v60  ;;  %v4285_v13 = vpop.eup %4284 }
 0x401   : > { %v8618_v42 = vpack.c.bf16 %v5572_v50, %v5564_v55  ;;  %v1409_v20 = vadd.f32 %v5724_v31, %v1408_v8  ;;  %4304 = vpow2.f32 %v1371_v53  ;;  %v1430_v47 = vadd.f32 %v4267_v18, %v1429_v54  ;;  %v4287_v30 = vpop.eup %4286 }
 0x402   : > { %v1383_v49 = vmul.f32 1.442695, %v8617_v23  ;;  %v1482_v43 = vpack.c.bf16 %v4283_v48, %v4281_v40  ;;  %4306 = vpow2.f32 %v1375_v58  ;;  %v4289_v26 = vpop.eup %4288  ;;  %v1484_v60 = vpack.c.bf16 %v4287_v30, %v4285_v13 }
 0x403   : > { %1504 = vmatpush1.bf16.msra.mxu1 %v8618_v42  ;;  %v1410_v52 = vadd.f32 %v5733_v61, %v1409_v20  ;;  %4308 = vpow2.f32 %v1379_v25  ;;  %v1431_v35 = vadd.f32 %v4269_v16, %v1430_v47  ;;  %v4291_v1 = vpop.eup %4290  ;;  %v8619_v50 = vpack.c.bf16 %v5588_v28, %v5580_v59 }
 0x404   : > { %1505 = vmatprep.subr.bf16.mxu1 %v1474_v6  ;;  %4310 = vpow2.f32 %v1383_v49  ;;  %v4293_v55 = vpop.eup %4292  ;;  %v1486_v6 = vpack.c.bf16 %v4291_v1, %v4289_v26  ;;  %v8620_v54 = vpack.c.bf16 %v5606_v7, %v5598_v39 }
 0x405   : > { %v1411_v53 = vadd.f32 %v5741_v0, %v1410_v52  ;;  %v1432_v18 = vadd.f32 %v4271_v11, %v1431_v35  ;;  %v4295_v62 = vpop.eup %4294 }
 0x406   : > { %v1488_v25 = vpack.c.bf16 %v4295_v62, %v4293_v55 }
 0x407   : > { %1506 = vmatpush1.bf16.msra.mxu1 %v8619_v50  ;;  %v4297_v58 = vpop.eup %4296  ;;  %v1412_v63 = vadd.f32 %v5749_v44, %v1411_v53  ;;  %v1433_v8 = vadd.f32 %v4273_v32, %v1432_v18  ;;  %v8621_v32 = vpack.c.bf16 %v5619_v19, %v5612_v10  ;;  %v8622_v53 = vpack.c.bf16 %v5633_v46, %v5626_v33 }
 0x408   : > { %1507 = vmatprep.subr.bf16.mxu1 %v1476_v29  ;;  %v4299_v16 = vpop.eup %4298  ;;  %v8623_v19 = vpack.c.bf16 %v5644_v24, %v5638_v2  ;;  %v8625_v33 = vpack.c.bf16 %v5683_v22, %v5674_v41  ;;  %v8626_v2 = vpack.c.bf16 %v5709_v57, %v5697_v15  ;;  %v8628_v41 = vpack.c.bf16 %v5741_v0, %v5733_v61  ;;  %v8635_v61 = vld [vmem:[#allocation14_spill] sm:$0xff] }
 0x409   : > { %v4301_v9 = vpop.eup %4300  ;;  %v1413_v59 = vadd.f32 %v5756_v5, %v1412_v63  ;;  %v1434_v28 = vadd.f32 %v4275_v56, %v1433_v8  ;;  %v1490_v23 = vpack.c.bf16 %v4299_v16, %v4297_v58  ;;  %v8629_v15 = vpack.c.bf16 %v5756_v5, %v5749_v44  ;;  %v8638_v5 = vld [vmem:[#allocation37_spill] sm:$0xff]  ;;  %v8645_v8 = vld [vmem:[#allocation16_spill] sm:$0xff] }
 0x40a   : > { %v4303_v11 = vpop.eup %4302  ;;  %v8634_v0 = vpack.c.bf16 %v5468_v4, %v5448_v3  ;;  %v8639_v44 = vld [vmem:[#allocation61_spill] sm:$0xff]  ;;  %v1582_v4 = vpop.trf.xlu0 }
 0x40b   : > { %1508 = vmatpush1.bf16.msra.mxu1 %v8620_v54  ;;  %v4305_v29 = vpop.eup %4304  ;;  %v1414_v49 = vadd.f32 %v5765_v12, %v1413_v59  ;;  %v1435_v42 = vadd.f32 %v4277_v21, %v1434_v28  ;;  %v1492_v20 = vpack.c.bf16 %v4303_v11, %v4301_v9  ;;  %v8648_v54 = vld [vmem:[#allocation60_spill] sm:$0xff] }
 0x40c   : > { %1509 = vmatprep.subr.bf16.mxu1 %v1478_v51  ;;  %v4307_v47 = vpop.eup %4306 }
 0x40d   : > { %v4309_v52 = vpop.eup %4308  ;;  %v5881_v7 = vadd.f32 %v5773_v27, %v1414_v49  ;;  %v1436_v39 = vadd.f32 %v4279_v36, %v1435_v42  ;;  %v1494_v56 = vpack.c.bf16 %v4307_v47, %v4305_v29  ;;  %v8624_v36 = vpack.c.bf16 %v5663_v17, %v5653_v37  ;;  %v1598_v42 = vpop.trf.xlu1 }
 0x40e   : > { %v4311_v51 = vpop.eup %4310  ;;  %v8627_v37 = vpack.c.bf16 %v5724_v31, %v5717_v14  ;;  %v8630_v14 = vpack.c.bf16 %v5773_v27, %v5765_v12  ;;  %v8631_v31 = vld [vmem:[#allocation15_spill] sm:$0xff]  ;;  %v8644_v27 = vld [vmem:[#allocation18_spill] sm:$0xff] }
 0x40f   : > { %1510 = vmatpush1.bf16.msra.mxu1 %v8621_v32  ;;  %v1437_v35 = vadd.f32 %v4281_v40, %v1436_v39  ;;  %v1496_v50 = vpack.c.bf16 %v4311_v51, %v4309_v52 }
 0x410   : > { %1511 = vmatprep.subr.bf16.mxu1 %v1480_v45 }
 0x411   : > { %v1438_v21 = vadd.f32 %v4283_v48, %v1437_v35 }
 0x413   : > { %1512 = vmatpush1.bf16.msra.mxu1 %v8622_v53  ;;  %v1439_v18 = vadd.f32 %v4285_v13, %v1438_v21 }
 0x414   : > { %1513 = vmatprep.subr.bf16.mxu1 %v1482_v43 }
 0x415   : > { %v1440_v10 = vadd.f32 %v4287_v30, %v1439_v18 }
 0x417   : > { %1514 = vmatpush1.bf16.msra.mxu1 %v8623_v19  ;;  %v1441_v63 = vadd.f32 %v4289_v26, %v1440_v10  ;;  %v8632_v26 = vld [vmem:[#allocation13_spill] sm:$0xff] }
 0x418   : > { %1515 = vmatprep.subr.bf16.mxu1 %v1484_v60  ;;  %v8633_v60 = vpack.c.bf16 %v8631_v31, %v8632_v26 }
 0x419   : > { %v1442_v40 = vadd.f32 %v4291_v1, %v1441_v63  ;;  %v8636_v1 = vld [vmem:[#allocation12_spill] sm:$0xff] }
 0x41b   : > { %1516 = vmatpush1.bf16.msra.mxu1 %v8624_v36  ;;  %v1443_v45 = vadd.f32 %v4293_v55, %v1442_v40  ;;  %v8637_v55 = vpack.c.bf16 %v8635_v61, %v8636_v1 }
 0x41c   : > { %1517 = vmatprep.subr.bf16.mxu1 %v1486_v6  ;;  %v8640_v6 = vpack.c.bf16 %v8638_v5, %v8639_v44 }
 0x41d   : > { %v1444_v46 = vadd.f32 %v4295_v62, %v1443_v45  ;;  %v8641_v62 = vld [vmem:[#allocation19_spill] sm:$0xff] }
 0x41f   : > { %1518 = vmatpush1.bf16.msra.mxu1 %v8625_v33  ;;  %v1445_v48 = vadd.f32 %v4297_v58, %v1444_v46  ;;  %v8642_v58 = vld [vmem:[#allocation17_spill] sm:$0xff] }
 0x420   : > { %1519 = vmatprep.subr.bf16.mxu1 %v1488_v25  ;;  %v8643_v12 = vpack.c.bf16 %v8641_v62, %v8642_v58  ;;  %v8646_v25 = vpack.c.bf16 %v8644_v27, %v8645_v8  ;;  %v1416_v58 = vrot.slane %v5881_v7, 4 }
 0x421   : > { %v1446_v24 = vadd.f32 %v4299_v16, %v1445_v48  ;;  %v8647_v16 = vld [vmem:[#allocation36_spill] sm:$0xff] }
 0x422   : > { %v8649_v3 = vpack.c.bf16 %v8647_v16, %v8648_v54  ;;  %v1417_v27 = vadd.f32 %v1416_v58, %v5881_v7 }
 0x423   : > { %1520 = vmatpush1.bf16.msra.mxu1 %v8626_v2  ;;  %v1447_v13 = vadd.f32 %v4301_v9, %v1446_v24  ;;  %v1583_v9 = vpop.trf.xlu0 }
 0x424   : > { %1521 = vmatprep.subr.bf16.mxu1 %v1490_v23 }
 0x425   : > { %v1448_v17 = vadd.f32 %v4303_v11, %v1447_v13 }
 0x427   : > { %1522 = vmatpush1.bf16.msra.mxu1 %v8627_v37  ;;  %v1449_v43 = vadd.f32 %v4305_v29, %v1448_v17  ;;  %v1584_v59 = vpop.trf.xlu0 }
 0x428   : > { %1523 = vmatprep.subr.bf16.mxu1 %v1492_v20  ;;  %v1599_v20 = vpop.trf.xlu1 }
 0x429   : > { %v1450_v22 = vadd.f32 %v4307_v47, %v1449_v43 }
 0x42b   : > { %1524 = vmatpush1.bf16.msra.mxu1 %v8628_v41  ;;  %v1451_v30 = vadd.f32 %v4309_v52, %v1450_v22  ;;  %v1585_v28 = vpop.trf.xlu0 }
 0x42c   : > { %1525 = vmatprep.subr.bf16.mxu1 %v1494_v56  ;;  %v1600_v47 = vpop.trf.xlu1 }
 0x42d   : > { %v5907_v57 = vadd.f32 %v4311_v51, %v1451_v30 }
 0x42f   : > { %1526 = vmatpush1.bf16.msra.mxu1 %v8629_v15  ;;  %v1586_v23 = vpop.trf.xlu0 }
 0x430   : > { %1527 = vmatprep.subr.bf16.mxu1 %v1496_v50  ;;  %v1601_v32 = vpop.trf.xlu1 }
 0x433   : > { %1528 = vmatpush1.bf16.msra.mxu1 %v8630_v14  ;;  %v1587_v11 = vpop.trf.xlu0 }
 0x434   : > { %1654 = vmatprep.subr.bf16.mxu1 %v8633_v60  ;;  %v1602_v52 = vpop.trf.xlu1 }
 0x436   : > { %1530 = vmatmul.mubr.bf16.vlgmr.msra.gmra.mrb[64].mxu1 %v8634_v0 }
 0x437   : > { %1655 = vmatpush1.bf16.msra.mxu1 %v8637_v55  ;;  %1539 = vmatprep.mubr.bf16.mxu1 %v8640_v6  ;;  %v1588_v29 = vpop.trf.xlu0 }
 0x438   : > { %1656 = vmatprep.subr.bf16.mxu1 %v8643_v12  ;;  %v1603_v21 = vpop.trf.xlu1  ;;  %v1453_v12 = vrot.slane %v5907_v57, 4 }
 0x43a   : > { %v1454_v8 = vadd.f32 %v1453_v12, %v5907_v57 }
 0x43b   : > { %1657 = vmatpush1.bf16.msra.mxu1 %v8646_v25  ;;  %v1589_v49 = vpop.trf.xlu0  ;;  %v1418_v25 = vrot.slane %v1417_v27, 2 }
 0x43c   : > { %v1604_v45 = vpop.trf.xlu1  ;;  %v1455_v16 = vrot.slane %v1454_v8, 2 }
 0x43d   : > { %v1419_v54 = vadd.f32 %v1418_v25, %v1417_v27 }
 0x43e   : > { %1540 = vmatmul.mubr.bf16.gmra.mrb[68].mxu1 %v8649_v3  ;;  %v1456_v3 = vadd.f32 %v1455_v16, %v1454_v8 }
 0x43f   : > { %1686 = vmatprep.mubr.bf16.mxu1 %v8601_v38 }
 0x440   : > { %v1605_v37 = vpop.trf.xlu1 }
 0x446   : > { %4035 = vmatmul.mubr.msk.bf16.vlgmr.msra.gmra.mrb[72].mxu1 %vm877_vm2, %v1582_v4  ;;  %v1420_v4 = vrot.slane %v1419_v54, 1 }
 0x447   : > { %1696 = vmatprep.mubr.bf16.mxu1 %v8601_v38 }
 0x44e   : > { %4036 = vmatmul.mubr.msk.bf16.gmra.mrb[76].mxu1 %vm877_vm2, %v1583_v9  ;;  %v1457_v9 = vrot.slane %v1456_v3, 1 }
 0x44f   : > { %1706 = vmatprep.mubr.bf16.mxu1 %v8601_v38 }
 0x456   : > { %4037 = vmatmul.mubr.msk.bf16.gmra.mrb[80].mxu1 %vm877_vm2, %v1584_v59  ;;  %v1421_v59 = vadd.f32 %v1420_v4, %v1419_v54 }
 0x457   : > { %1716 = vmatprep.mubr.bf16.mxu1 %v8601_v38 }
 0x458   : > { %4312 = vrcp.f32 %v1421_v59 }
 0x45e   : > { %4038 = vmatmul.mubr.msk.bf16.gmra.mrb[84].mxu1 %vm877_vm2, %v1585_v28  ;;  %v1458_v28 = vadd.f32 %v1457_v9, %v1456_v3 }
 0x45f   : > { %1726 = vmatprep.mubr.bf16.mxu1 %v8601_v38 }
 0x460   : > { %4314 = vrcp.f32 %v1458_v28 }
 0x466   : > { %4039 = vmatmul.mubr.msk.bf16.gmra.mrb[88].mxu1 %vm877_vm2, %v1586_v23  ;;  %v4313_v23 = vpop.eup %4312 }
 0x467   : > { %1736 = vmatprep.mubr.bf16.mxu1 %v8601_v38 }
 0x46e   : > { %4040 = vmatmul.mubr.msk.bf16.gmra.mrb[92].mxu1 %vm877_vm2, %v1587_v11 }
 0x46f   : > { %1746 = vmatprep.mubr.bf16.mxu1 %v8601_v38 }
 0x476   : > { %4041 = vmatmul.mubr.msk.bf16.gmra.mrb[96].mxu1 %vm877_vm2, %v1588_v29  ;;  %v4315_v29 = vpop.eup %4314 }
 0x477   : > { %1756 = vmatprep.mubr.bf16.mxu1 %v8601_v38 }
 0x47e   : > { %4042 = vmatmul.mubr.msk.bf16.gmra.mrb[100].mxu1 %vm877_vm2, %v1589_v49 }
 0x47f   : > { %1766 = vmatprep.mubr.bf16.mxu1 %v8601_v38 }
 0x486   : > { %4043 = vmatmul.mubr.msk.bf16.gmra.mrb[104].mxu1 %vm877_vm2, %v1598_v42 }
 0x487   : > { %1776 = vmatprep.mubr.bf16.mxu1 %v8601_v38 }
 0x48e   : > { %4044 = vmatmul.mubr.msk.bf16.gmra.mrb[108].mxu1 %vm877_vm2, %v1599_v20 }
 0x48f   : > { %1786 = vmatprep.mubr.bf16.mxu1 %v8601_v38 }
 0x496   : > { %4045 = vmatmul.mubr.msk.bf16.gmra.mrb[112].mxu1 %vm877_vm2, %v1600_v47 }
 0x497   : > { %1796 = vmatprep.mubr.bf16.mxu1 %v8601_v38 }
 0x498   : > { %v5958_v39 = vpop.f32.mrb[72].mxu0 }
 0x499   : > { %8650 = vst [vmem:[#allocation38_spill] sm:$0xff] %v5958_v39  ;;  %v768_v56 = vpop.f32.mrb[73].mxu0 }
 0x49e   : > { %4046 = vmatmul.mubr.msk.bf16.gmra.mrb[116].mxu1 %vm877_vm2, %v1601_v32 }
 0x49f   : > { %1806 = vmatprep.mubr.bf16.mxu1 %v8601_v38 }
 0x4a1   : > { %v5962_v51 = vpop.f32.mrb[74].mxu0 }
 0x4a2   : > { %8651 = vst [vmem:[#allocation39_spill] sm:$0xff] %v5962_v51  ;;  %v774_v50 = vpop.f32.mrb[75].mxu0 }
 0x4a3   : > { %v2190_v53 = vpack.c.bf16 %v774_v50, %v768_v56 }
 0x4a5   : > { %2257 = vmatprep.mubr.bf16.mxu0 %v2190_v53  ;;  %v5966_v18 = vpop.f32.mrb[76].mxu0 }
 0x4a6   : > { %4047 = vmatmul.mubr.msk.bf16.gmra.mrb[120].mxu1 %vm877_vm2, %v1602_v52  ;;  %8652 = vst [vmem:[#allocation40_spill] sm:$0xff] %v5966_v18  ;;  %v5969_v19 = vpop.f32.mrb[77].mxu0 }
 0x4a7   : > { %1816 = vmatprep.mubr.bf16.mxu1 %v8601_v38  ;;  %8653 = vst [vmem:[#allocation42_spill] sm:$0xff] %v5969_v19 }
 0x4a9   : > { %v5972_v10 = vpop.f32.mrb[78].mxu0 }
 0x4aa   : > { %8654 = vst [vmem:[#allocation52_spill] sm:$0xff] %v5972_v10  ;;  %v5976_v36 = vpop.f32.mrb[79].mxu0 }
 0x4ab   : > { %8655 = vst [vmem:[#allocation55_spill] sm:$0xff] %v5976_v36 }
 0x4ad   : > { %v5980_v33 = vpop.f32.mrb[80].mxu0 }
 0x4ae   : > { %4048 = vmatmul.mubr.msk.bf16.gmra.mrb[124].mxu1 %vm877_vm2, %v1603_v21  ;;  %8656 = vst [vmem:[#allocation56_spill] sm:$0xff] %v5980_v33  ;;  %v792_v46 = vpop.f32.mrb[81].mxu0 }
 0x4af   : > { %1826 = vmatprep.mubr.bf16.mxu1 %v8601_v38 }
 0x4b1   : > { %v5984_v48 = vpop.f32.mrb[82].mxu0 }
 0x4b2   : > { %8657 = vst [vmem:[#allocation57_spill] sm:$0xff] %v5984_v48  ;;  %v798_v24 = vpop.f32.mrb[83].mxu0 }
 0x4b3   : > { %v2918_v13 = vpack.c.bf16 %v798_v24, %v792_v46 }
 0x4b5   : > { %v5988_v17 = vpop.f32.mrb[84].mxu0 }
 0x4b6   : > { %4049 = vmatmul.mubr.msk.bf16.gmra.mrb[128].mxu1 %vm877_vm2, %v1604_v45  ;;  %8658 = vst [vmem:[#allocation41_spill] sm:$0xff] %v5988_v17  ;;  %v5991_v43 = vpop.f32.mrb[85].mxu0 }
 0x4b7   : > { %1836 = vmatprep.mubr.bf16.mxu1 %v8601_v38  ;;  %8659 = vst [vmem:[#allocation43_spill] sm:$0xff] %v5991_v43 }
 0x4ba   : > { %v5993_v41 = vpop.f32.mrb[86].mxu0 }
 0x4bb   : > { %8660 = vst [vmem:[#allocation44_spill] sm:$0xff] %v5993_v41  ;;  %v5997_v30 = vpop.f32.mrb[87].mxu0 }
 0x4bc   : > { %8661 = vst [vmem:[#allocation45_spill] sm:$0xff] %v5997_v30 }
 0x4be   : > { %4050 = vmatmul.mubr.msk.bf16.gmra.mrb[132].mxu1 %vm877_vm2, %v1605_v37  ;;  %v6001_v14 = vpop.f32.mrb[88].mxu0 }
 0x4bf   : > { %2985 = vmatprep.mubr.bf16.mxu1 %v2918_v13  ;;  %8662 = vst [vmem:[#allocation46_spill] sm:$0xff] %v6001_v14  ;;  %v6003_v31 = vpop.f32.mrb[89].mxu0 }
 0x4c0   : > { %8663 = vst [vmem:[#allocation47_spill] sm:$0xff] %v6003_v31 }
 0x4c2   : > { %v6005_v26 = vpop.f32.mrb[90].mxu0 }
 0x4c3   : > { %8664 = vst [vmem:[#allocation48_spill] sm:$0xff] %v6005_v26  ;;  %v6009_v0 = vpop.f32.mrb[91].mxu0 }
 0x4c4   : > { %8665 = vst [vmem:[#allocation49_spill] sm:$0xff] %v6009_v0 }
 0x4c6   : > { %v6013_v1 = vpop.f32.mrb[92].mxu0 }
 0x4c7   : > { %8666 = vst [vmem:[#allocation50_spill] sm:$0xff] %v6013_v1  ;;  %v6015_v55 = vpop.f32.mrb[93].mxu0 }
 0x4c8   : > { %8667 = vst [vmem:[#allocation51_spill] sm:$0xff] %v6015_v55 }
 0x4ca   : > { %v6017_v5 = vpop.f32.mrb[94].mxu0 }
 0x4cb   : > { %8668 = vst [vmem:[#allocation53_spill] sm:$0xff] %v6017_v5  ;;  %v6021_v6 = vpop.f32.mrb[95].mxu0 }
 0x4cc   : > { %8669 = vst [vmem:[#allocation54_spill] sm:$0xff] %v6021_v6 }
 0x509   : > { %v1531_v11 = vpop.f32.mrb[64].mxu1 }
 0x50a   : > { %v6029_v49 = vmul.f32 %v4313_v23, %v1531_v11  ;;  %v1533_v42 = vpop.f32.mrb[65].mxu1 }
 0x50b   : > { %v6031_v20 = vmul.f32 %v4315_v29, %v1533_v42  ;;  %v1535_v7 = vpop.f32.mrb[66].mxu1 }
 0x50c   : > { %8670 = vst [vmem:[#allocation58_spill] sm:$0xff] %v6029_v49  ;;  %v6033_v57 = vmul.f32 %v4313_v23, %v1535_v7  ;;  %v1537_v47 = vpop.f32.mrb[67].mxu1 }
 0x50d   : > { %8671 = vst [vmem:[#allocation59_spill] sm:$0xff] %v6031_v20  ;;  %v6035_v32 = vmul.f32 %v4315_v29, %v1537_v47 }
 0x50e   : > { %8672 = vst [vmem:[#allocation15_spill] sm:$0xff] %v6033_v57 }
 0x50f   : > { %8673 = vst [vmem:[#allocation13_spill] sm:$0xff] %v6035_v32 }
 0x511   : > { %v1541_v50 = vpop.f32.mrb[68].mxu1 }
 0x512   : > { %v6041_v53 = vmul.f32 %v4313_v23, %v1541_v50  ;;  %v1543_v21 = vpop.f32.mrb[69].mxu1 }
 0x513   : > { %v6043_v45 = vmul.f32 %v4315_v29, %v1543_v21  ;;  %v1545_v46 = vpop.f32.mrb[70].mxu1 }
 0x514   : > { %8674 = vst [vmem:[#allocation14_spill] sm:$0xff] %v6041_v53  ;;  %v6045_v24 = vmul.f32 %v4313_v23, %v1545_v46  ;;  %v1547_v13 = vpop.f32.mrb[71].mxu1 }
 0x515   : > { %8675 = vst [vmem:[#allocation12_spill] sm:$0xff] %v6043_v45  ;;  %v6047_v37 = vmul.f32 %v4315_v29, %v1547_v13 }
 0x516   : > { %8676 = vst [vmem:[#allocation37_spill] sm:$0xff] %v6045_v24 }
 0x517   : > { %8677 = vst [vmem:[#allocation61_spill] sm:$0xff] %v6047_v37 }
 0x519   : > { %v6053_v27 = vpop.f32.mrb[72].mxu1 }
 0x51a   : > { %v6055_v8 = vpop.f32.mrb[73].mxu1 }
 0x51b   : > { %v6057_v25 = vpop.f32.mrb[74].mxu1 }
 0x51c   : > { %v6059_v16 = vpop.f32.mrb[75].mxu1 }
 0x521   : > { %v6061_v54 = vpop.f32.mrb[76].mxu1 }
 0x522   : > { %v1847_v3 = vmax.f32 %v6053_v27, %v6061_v54  ;;  %v6065_v4 = vpop.f32.mrb[77].mxu1 }
 0x523   : > { %v1884_v9 = vmax.f32 %v6055_v8, %v6065_v4  ;;  %v6069_v59 = vpop.f32.mrb[78].mxu1 }
 0x524   : > { %v1848_v28 = vmax.f32 %v6057_v25, %v6069_v59  ;;  %v6073_v23 = vpop.f32.mrb[79].mxu1 }
 0x525   : > { %v1885_v11 = vmax.f32 %v6059_v16, %v6073_v23 }
 0x529   : > { %v6077_v29 = vpop.f32.mrb[80].mxu1 }
 0x52a   : > { %v1849_v42 = vmax.f32 %v1847_v3, %v6077_v29  ;;  %v6080_v7 = vpop.f32.mrb[81].mxu1 }
 0x52b   : > { %v1886_v47 = vmax.f32 %v1884_v9, %v6080_v7  ;;  %v6083_v50 = vpop.f32.mrb[82].mxu1 }
 0x52c   : > { %v1850_v21 = vmax.f32 %v1848_v28, %v6083_v50  ;;  %v6086_v46 = vpop.f32.mrb[83].mxu1 }
 0x52d   : > { %v1887_v13 = vmax.f32 %v1885_v11, %v6086_v46 }
 0x531   : > { %v6089_v44 = vpop.f32.mrb[84].mxu1 }
 0x532   : > { %v1851_v58 = vmax.f32 %v1849_v42, %v6089_v44  ;;  %v6092_v12 = vpop.f32.mrb[85].mxu1 }
 0x533   : > { %v1888_v3 = vmax.f32 %v1886_v47, %v6092_v12  ;;  %v6095_v52 = vpop.f32.mrb[86].mxu1 }
 0x534   : > { %v1852_v9 = vmax.f32 %v1850_v21, %v6095_v52  ;;  %v6098_v62 = vpop.f32.mrb[87].mxu1 }
 0x535   : > { %v1889_v28 = vmax.f32 %v1887_v13, %v6098_v62 }
 0x539   : > { %v6101_v60 = vpop.f32.mrb[88].mxu1 }
 0x53a   : > { %v1853_v11 = vmax.f32 %v1851_v58, %v6101_v60  ;;  %v6104_v56 = vpop.f32.mrb[89].mxu1 }
 0x53b   : > { %v1890_v42 = vmax.f32 %v1888_v3, %v6104_v56  ;;  %v6107_v22 = vpop.f32.mrb[90].mxu1 }
 0x53c   : > { %v1854_v47 = vmax.f32 %v1852_v9, %v6107_v22  ;;  %v6110_v15 = vpop.f32.mrb[91].mxu1 }
 0x53d   : > { %v1891_v21 = vmax.f32 %v1889_v28, %v6110_v15 }
 0x541   : > { %v6113_v2 = vpop.f32.mrb[92].mxu1 }
 0x542   : > { %v1855_v13 = vmax.f32 %v1853_v11, %v6113_v2  ;;  %v6116_v61 = vpop.f32.mrb[93].mxu1 }
 0x543   : > { %v1892_v58 = vmax.f32 %v1890_v42, %v6116_v61  ;;  %v6119_v63 = vpop.f32.mrb[94].mxu1 }
 0x544   : > { %v1856_v3 = vmax.f32 %v1854_v47, %v6119_v63  ;;  %v6122_v40 = vpop.f32.mrb[95].mxu1 }
 0x545   : > { %8678 = vst [vmem:[#allocation19_spill] sm:$0xff] %v6122_v40  ;;  %v1893_v9 = vmax.f32 %v1891_v21, %v6122_v40 }
 0x549   : > { %v6125_v35 = vpop.f32.mrb[96].mxu1 }
 0x54a   : > { %v1857_v28 = vmax.f32 %v1855_v13, %v6125_v35  ;;  %v6128_v34 = vpop.f32.mrb[97].mxu1 }
 0x54b   : > { %8679 = vst [vmem:[#allocation17_spill] sm:$0xff] %v6128_v34  ;;  %v1894_v11 = vmax.f32 %v1892_v58, %v6128_v34  ;;  %v6131_v1 = vpop.f32.mrb[98].mxu1 }
 0x54c   : > { %v1858_v42 = vmax.f32 %v1856_v3, %v6131_v1  ;;  %v6134_v5 = vpop.f32.mrb[99].mxu1 }
 0x54d   : > { %8680 = vst [vmem:[#allocation18_spill] sm:$0xff] %v6134_v5  ;;  %v1895_v47 = vmax.f32 %v1893_v9, %v6134_v5 }
 0x551   : > { %v6137_v53 = vpop.f32.mrb[100].mxu1 }
 0x552   : > { %v1859_v21 = vmax.f32 %v1857_v28, %v6137_v53  ;;  %v6140_v24 = vpop.f32.mrb[101].mxu1 }
 0x553   : > { %8681 = vst [vmem:[#allocation16_spill] sm:$0xff] %v6140_v24  ;;  %v1896_v13 = vmax.f32 %v1894_v11, %v6140_v24  ;;  %v6143_v45 = vpop.f32.mrb[102].mxu1 }
 0x554   : > { %v1860_v58 = vmax.f32 %v1858_v42, %v6143_v45  ;;  %v6146_v37 = vpop.f32.mrb[103].mxu1 }
 0x555   : > { %8682 = vst [vmem:[#allocation36_spill] sm:$0xff] %v6146_v37  ;;  %v1897_v3 = vmax.f32 %v1895_v47, %v6146_v37 }
 0x559   : > { %v6149_v49 = vpop.f32.mrb[104].mxu1 }
 0x55a   : > { %v1861_v9 = vmax.f32 %v1859_v21, %v6149_v49  ;;  %v6152_v57 = vpop.f32.mrb[105].mxu1 }
 0x55b   : > { %8683 = vst [vmem:[#allocation60_spill] sm:$0xff] %v6152_v57  ;;  %v1898_v28 = vmax.f32 %v1896_v13, %v6152_v57  ;;  %v6155_v55 = vpop.f32.mrb[106].mxu1 }
 0x55c   : > { %v1862_v11 = vmax.f32 %v1860_v58, %v6155_v55  ;;  %v6158_v6 = vpop.f32.mrb[107].mxu1 }
 0x55d   : > { %8684 = vst [vmem:[#allocation62_spill] sm:$0xff] %v6158_v6  ;;  %v1899_v42 = vmax.f32 %v1897_v3, %v6158_v6 }
 0x561   : > { %v6161_v14 = vpop.f32.mrb[108].mxu1 }
 0x562   : > { %v1863_v47 = vmax.f32 %v1861_v9, %v6161_v14  ;;  %v6164_v26 = vpop.f32.mrb[109].mxu1 }
 0x563   : > { %8685 = vst [vmem:[#allocation63_spill] sm:$0xff] %v6164_v26  ;;  %v1900_v21 = vmax.f32 %v1898_v28, %v6164_v26  ;;  %v6167_v20 = vpop.f32.mrb[110].mxu1 }
 0x564   : > { %v1864_v13 = vmax.f32 %v1862_v11, %v6167_v20  ;;  %v6170_v32 = vpop.f32.mrb[111].mxu1 }
 0x565   : > { %8686 = vst [vmem:[#allocation64_spill] sm:$0xff] %v6170_v32  ;;  %v1901_v58 = vmax.f32 %v1899_v42, %v6170_v32 }
 0x569   : > { %v6173_v17 = vpop.f32.mrb[112].mxu1 }
 0x56a   : > { %v1865_v3 = vmax.f32 %v1863_v47, %v6173_v17  ;;  %v6176_v41 = vpop.f32.mrb[113].mxu1 }
 0x56b   : > { %8687 = vst [vmem:[#allocation65_spill] sm:$0xff] %v6176_v41  ;;  %v1902_v9 = vmax.f32 %v1900_v21, %v6176_v41  ;;  %v6179_v43 = vpop.f32.mrb[114].mxu1 }
 0x56c   : > { %v1866_v28 = vmax.f32 %v1864_v13, %v6179_v43  ;;  %v6182_v30 = vpop.f32.mrb[115].mxu1 }
 0x56d   : > { %8688 = vst [vmem:[#allocation66_spill] sm:$0xff] %v6182_v30  ;;  %v1903_v11 = vmax.f32 %v1901_v58, %v6182_v30 }
 0x571   : > { %v6185_v33 = vpop.f32.mrb[116].mxu1 }
 0x572   : > { %v1867_v42 = vmax.f32 %v1865_v3, %v6185_v33  ;;  %v6188_v48 = vpop.f32.mrb[117].mxu1 }
 0x573   : > { %8689 = vst [vmem:[#allocation67_spill] sm:$0xff] %v6188_v48  ;;  %v1904_v47 = vmax.f32 %v1902_v9, %v6188_v48  ;;  %v6191_v31 = vpop.f32.mrb[118].mxu1 }
 0x574   : > { %v1868_v21 = vmax.f32 %v1866_v28, %v6191_v31  ;;  %v6194_v0 = vpop.f32.mrb[119].mxu1 }
 0x575   : > { %8690 = vst [vmem:[#allocation68_spill] sm:$0xff] %v6194_v0  ;;  %v1905_v13 = vmax.f32 %v1903_v11, %v6194_v0 }
 0x579   : > { %v6197_v38 = vpop.f32.mrb[120].mxu1 }
 0x57a   : > { %v1869_v58 = vmax.f32 %v1867_v42, %v6197_v38  ;;  %v6200_v18 = vpop.f32.mrb[121].mxu1 }
 0x57b   : > { %8691 = vst [vmem:[#allocation69_spill] sm:$0xff] %v6200_v18  ;;  %v1906_v3 = vmax.f32 %v1904_v47, %v6200_v18  ;;  %v6203_v10 = vpop.f32.mrb[122].mxu1 }
 0x57c   : > { %v1870_v9 = vmax.f32 %v1868_v21, %v6203_v10  ;;  %v6206_v19 = vpop.f32.mrb[123].mxu1 }
 0x57d   : > { %8692 = vst [vmem:[#allocation70_spill] sm:$0xff] %v6206_v19  ;;  %v1907_v28 = vmax.f32 %v1905_v13, %v6206_v19 }
 0x581   : > { %v6209_v36 = vpop.f32.mrb[124].mxu1 }
 0x582   : > { %v1871_v11 = vmax.f32 %v1869_v58, %v6209_v36  ;;  %v6212_v39 = vpop.f32.mrb[125].mxu1 }
 0x583   : > { %8693 = vst [vmem:[#allocation71_spill] sm:$0xff] %v6212_v39  ;;  %v1908_v42 = vmax.f32 %v1906_v3, %v6212_v39  ;;  %v6215_v51 = vpop.f32.mrb[126].mxu1 }
 0x584   : > { %v1872_v47 = vmax.f32 %v1870_v9, %v6215_v51  ;;  %v6218_v18 = vpop.f32.mrb[127].mxu1 }
 0x585   : > { %8694 = vst [vmem:[#allocation72_spill] sm:$0xff] %v6218_v18  ;;  %v1909_v21 = vmax.f32 %v1907_v28, %v6218_v18 }
 0x589   : > { %v6221_v0 = vpop.f32.mrb[128].mxu1 }
 0x58a   : > { %v1873_v13 = vmax.f32 %v1871_v11, %v6221_v0  ;;  %v6224_v19 = vpop.f32.mrb[129].mxu1 }
 0x58b   : > { %8695 = vst [vmem:[#allocation73_spill] sm:$0xff] %v6224_v19  ;;  %v1910_v58 = vmax.f32 %v1908_v42, %v6224_v19  ;;  %v6227_v48 = vpop.f32.mrb[130].mxu1 }
 0x58c   : > { %v1874_v3 = vmax.f32 %v1872_v47, %v6227_v48  ;;  %v6230_v39 = vpop.f32.mrb[131].mxu1 }
 0x58d   : > { %8696 = vst [vmem:[#allocation74_spill] sm:$0xff] %v6230_v39  ;;  %v1911_v9 = vmax.f32 %v1909_v21, %v6230_v39 }
 0x591   : > { %v6233_v30 = vpop.f32.mrb[132].mxu1 }
 0x592   : > { %v1875_v28 = vmax.f32 %v1873_v13, %v6233_v30  ;;  %v6236_v18 = vpop.f32.mrb[133].mxu1 }
 0x593   : > { %8697 = vst [vmem:[#allocation75_spill] sm:$0xff] %v6236_v18  ;;  %v1912_v11 = vmax.f32 %v1910_v58, %v6236_v18  ;;  %v6239_v41 = vpop.f32.mrb[134].mxu1 }
 0x594   : > { %v1876_v42 = vmax.f32 %v1874_v3, %v6239_v41  ;;  %v6242_v19 = vpop.f32.mrb[135].mxu1 }
 0x595   : > { %8698 = vst [vmem:[#allocation76_spill] sm:$0xff] %v6242_v19  ;;  %v1913_v47 = vmax.f32 %v1911_v9, %v6242_v19 }
 0x596   : > { %v1877_v32 = vmax.f32 %v1875_v28, %v1876_v42 }
 0x597   : > { %v1914_v26 = vmax.f32 %v1912_v11, %v1913_v47 }
 0x598   : > { %v1878_v6 = vrot.slane %v1877_v32, 4 }
 0x599   : > { %v1915_v21 = vrot.slane %v1914_v26, 4 }
 0x59a   : > { %v1879_v39 = vmax.f32 %v1877_v32, %v1878_v6 }
 0x59b   : > { %v1916_v57 = vmax.f32 %v1914_v26, %v1915_v21 }
 0x59c   : > { %v1880_v37 = vrot.slane %v1879_v39, 2 }
 0x59d   : > { %v1917_v13 = vrot.slane %v1916_v57, 2 }
 0x59e   : > { %v1881_v24 = vmax.f32 %v1879_v39, %v1880_v37 }
 0x59f   : > { %v1918_v5 = vmax.f32 %v1916_v57, %v1917_v13 }
 0x5a0   : > { %v1882_v34 = vrot.slane %v1881_v24, 1 }
 0x5a1   : > { %v1919_v58 = vrot.slane %v1918_v5, 1 }
 0x5a2   : > { %v6245_v18 = vmax.f32 %v1881_v24, %v1882_v34 }
 0x5a3   : > { %v6247_v40 = vmax.f32 %v1918_v5, %v1919_v58 }
 0x5a4   : > { %v1921_v3 = vsub.f32 %v6053_v27, %v6245_v18  ;;  %v1923_v9 = vsub.f32 %v6057_v25, %v6245_v18  ;;  %v1925_v6 = vsub.f32 %v6061_v54, %v6245_v18  ;;  %v1927_v26 = vsub.f32 %v6069_v59, %v6245_v18 }
 0x5a5   : > { %v1929_v39 = vsub.f32 %v6077_v29, %v6245_v18  ;;  %v1931_v34 = vsub.f32 %v6083_v50, %v6245_v18  ;;  %v1933_v5 = vsub.f32 %v6089_v44, %v6245_v18  ;;  %v1935_v57 = vsub.f32 %v6095_v52, %v6245_v18 }
 0x5a6   : > { %v1937_v32 = vsub.f32 %v6101_v60, %v6245_v18  ;;  %v1939_v24 = vsub.f32 %v6107_v22, %v6245_v18  ;;  %v1941_v37 = vsub.f32 %v6113_v2, %v6245_v18  ;;  %v1943_v27 = vsub.f32 %v6119_v63, %v6245_v18 }
 0x5a7   : > { %v1945_v25 = vsub.f32 %v6125_v35, %v6245_v18  ;;  %v1947_v44 = vsub.f32 %v6131_v1, %v6245_v18  ;;  %v1949_v52 = vsub.f32 %v6137_v53, %v6245_v18  ;;  %v1951_v60 = vsub.f32 %v6143_v45, %v6245_v18 }
 0x5a8   : > { %v1953_v22 = vsub.f32 %v6149_v49, %v6245_v18  ;;  %v1955_v2 = vsub.f32 %v6155_v55, %v6245_v18  ;;  %v1957_v63 = vsub.f32 %v6161_v14, %v6245_v18  ;;  %v1959_v35 = vsub.f32 %v6167_v20, %v6245_v18  ;;  %v8718_v55 = vld [vmem:[#allocation75_spill] sm:$0xff] }
 0x5a9   : > { %v1961_v1 = vsub.f32 %v6173_v17, %v6245_v18  ;;  %v1963_v53 = vsub.f32 %v6179_v43, %v6245_v18  ;;  %v1965_v45 = vsub.f32 %v6185_v33, %v6245_v18  ;;  %v1967_v49 = vsub.f32 %v6191_v31, %v6245_v18 }
 0x5aa   : > { %v1985_v59 = vmul.f32 1.442695, %v1921_v3  ;;  %v1989_v29 = vmul.f32 1.442695, %v1923_v9  ;;  %v1993_v50 = vmul.f32 1.442695, %v1925_v6 }
 0x5ab   : > { %v1997_v11 = vmul.f32 1.442695, %v1927_v26  ;;  %v2001_v47 = vmul.f32 1.442695, %v1929_v39  ;;  %v2005_v21 = vmul.f32 1.442695, %v1931_v34 }
 0x5ac   : > { %4316 = vpow2.f32 %v1985_v59  ;;  %v2009_v13 = vmul.f32 1.442695, %v1933_v5  ;;  %v2013_v58 = vmul.f32 1.442695, %v1935_v57  ;;  %v2017_v31 = vmul.f32 1.442695, %v1937_v32 }
 0x5ad   : > { %4318 = vpow2.f32 %v1989_v29  ;;  %v2021_v54 = vmul.f32 1.442695, %v1939_v24  ;;  %v2025_v3 = vmul.f32 1.442695, %v1941_v37  ;;  %v2029_v9 = vmul.f32 1.442695, %v1943_v27 }
 0x5ae   : > { %4320 = vpow2.f32 %v1993_v50  ;;  %v2033_v6 = vmul.f32 1.442695, %v1945_v25  ;;  %v2037_v28 = vmul.f32 1.442695, %v1947_v44  ;;  %v2041_v26 = vmul.f32 1.442695, %v1949_v52 }
 0x5af   : > { %4322 = vpow2.f32 %v1997_v11  ;;  %v2045_v33 = vmul.f32 1.442695, %v1951_v60  ;;  %v2049_v42 = vmul.f32 1.442695, %v1953_v22  ;;  %v2053_v59 = vmul.f32 1.442695, %v1955_v2 }
 0x5b0   : > { %4324 = vpow2.f32 %v2001_v47  ;;  %v2057_v39 = vmul.f32 1.442695, %v1957_v63  ;;  %v2061_v34 = vmul.f32 1.442695, %v1959_v35  ;;  %v2065_v29 = vmul.f32 1.442695, %v1961_v1 }
 0x5b1   : > { %4326 = vpow2.f32 %v2005_v21  ;;  %v6317_v5 = vmul.f32 1.442695, %v1963_v53  ;;  %v6319_v57 = vmul.f32 1.442695, %v1965_v45  ;;  %v6321_v32 = vmul.f32 1.442695, %v1967_v49 }
 0x5b2   : > { %4328 = vpow2.f32 %v2009_v13  ;;  %v8699_v1 = vld [vmem:[#allocation19_spill] sm:$0xff]  ;;  %v8701_v50 = vld [vmem:[#allocation18_spill] sm:$0xff]  ;;  %v8702_v21 = vld [vmem:[#allocation16_spill] sm:$0xff] }
 0x5b3   : > { %4330 = vpow2.f32 %v2013_v58  ;;  %v8703_v58 = vld [vmem:[#allocation36_spill] sm:$0xff]  ;;  %v8705_v35 = vld [vmem:[#allocation62_spill] sm:$0xff]  ;;  %v8706_v63 = vld [vmem:[#allocation63_spill] sm:$0xff] }
 0x5b4   : > { %4332 = vpow2.f32 %v2017_v31  ;;  %v8700_v31 = vld [vmem:[#allocation17_spill] sm:$0xff]  ;;  %v8707_v13 = vld [vmem:[#allocation64_spill] sm:$0xff]  ;;  %v8709_v52 = vld [vmem:[#allocation66_spill] sm:$0xff] }
 0x5b5   : > { %4334 = vpow2.f32 %v2021_v54  ;;  %v8708_v60 = vld [vmem:[#allocation65_spill] sm:$0xff]  ;;  %v8710_v11 = vld [vmem:[#allocation67_spill] sm:$0xff]  ;;  %v8711_v27 = vld [vmem:[#allocation68_spill] sm:$0xff] }
 0x5b6   : > { %v6331_v44 = vpop.eup %4316  ;;  %4336 = vpow2.f32 %v2025_v3  ;;  %v8712_v3 = vld [vmem:[#allocation69_spill] sm:$0xff]  ;;  %v8713_v24 = vld [vmem:[#allocation70_spill] sm:$0xff] }
 0x5b7   : > { %v6339_v2 = vpop.eup %4318  ;;  %4338 = vpow2.f32 %v2029_v9  ;;  %v8704_v9 = vld [vmem:[#allocation60_spill] sm:$0xff] }
 0x5b8   : > { %v6347_v45 = vpop.eup %4320  ;;  %4340 = vpow2.f32 %v2033_v6  ;;  %v2113_v49 = vadd.f32 %v6339_v2, %v6331_v44  ;;  %v8717_v6 = vld [vmem:[#allocation74_spill] sm:$0xff] }
 0x5b9   : > { %v6355_v47 = vpop.eup %4322  ;;  %4342 = vpow2.f32 %v2037_v28  ;;  %v8715_v28 = vld [vmem:[#allocation72_spill] sm:$0xff] }
 0x5ba   : > { %v6363_v53 = vpop.eup %4324  ;;  %4344 = vpow2.f32 %v2041_v26  ;;  %v2114_v54 = vadd.f32 %v6347_v45, %v2113_v49 }
 0x5bb   : > { %v6370_v22 = vpop.eup %4326  ;;  %4346 = vpow2.f32 %v2045_v33 }
 0x5bc   : > { %v6378_v25 = vpop.eup %4328  ;;  %4348 = vpow2.f32 %v2049_v42  ;;  %v2115_v49 = vadd.f32 %v6355_v47, %v2114_v54 }
 0x5bd   : > { %v6385_v37 = vpop.eup %4330  ;;  %4350 = vpow2.f32 %v2053_v59 }
 0x5be   : > { %v6393_v17 = vpop.eup %4332  ;;  %4352 = vpow2.f32 %v2057_v39  ;;  %v2116_v54 = vadd.f32 %v6363_v53, %v2115_v49  ;;  %v8719_v49 = vsub.f32 %v6197_v38, %v6245_v18 }
 0x5bf   : > { %v6400_v14 = vpop.eup %4334  ;;  %4354 = vpow2.f32 %v2061_v34  ;;  %v8720_v34 = vsub.f32 %v6203_v10, %v6245_v18 }
 0x5c0   : > { %v6408_v43 = vpop.eup %4336  ;;  %4356 = vpow2.f32 %v2065_v29  ;;  %v2081_v33 = vmul.f32 1.442695, %v8719_v49  ;;  %v2117_v59 = vadd.f32 %v6370_v22, %v2116_v54  ;;  %v8721_v29 = vsub.f32 %v6209_v36, %v6245_v18 }
 0x5c1   : > { %v6414_v20 = vpop.eup %4338  ;;  %4358 = vpow2.f32 %v6317_v5  ;;  %v2085_v42 = vmul.f32 1.442695, %v8720_v34  ;;  %v8722_v5 = vsub.f32 %v6215_v51, %v6245_v18  ;;  %v8726_v51 = vsub.f32 %v6233_v30, %v6245_v18 }
 0x5c2   : > { %v6420_v26 = vpop.eup %4340  ;;  %4360 = vpow2.f32 %v6319_v57  ;;  %v2089_v39 = vmul.f32 1.442695, %v8721_v29  ;;  %v2118_v38 = vadd.f32 %v6378_v25, %v2117_v59  ;;  %v8723_v57 = vsub.f32 %v6221_v0, %v6245_v18 }
 0x5c3   : > { %v6427_v49 = vpop.eup %4342  ;;  %4362 = vpow2.f32 %v6321_v32  ;;  %v2093_v54 = vmul.f32 1.442695, %v8722_v5  ;;  %v8724_v59 = vsub.f32 %v6227_v48, %v6245_v18 }
 0x5c4   : > { %v6433_v10 = vpop.eup %4344  ;;  %4364 = vpow2.f32 %v2081_v33  ;;  %v2097_v34 = vmul.f32 1.442695, %v8723_v57  ;;  %v2119_v36 = vadd.f32 %v6385_v37, %v2118_v38  ;;  %v2105_v33 = vmul.f32 1.442695, %v8726_v51 }
 0x5c5   : > { %v6439_v29 = vpop.eup %4346  ;;  %4366 = vpow2.f32 %v2085_v42  ;;  %v2101_v32 = vmul.f32 1.442695, %v8724_v59  ;;  %v8727_v38 = vsub.f32 %v6239_v41, %v6245_v18  ;;  %v8730_v18 = vsub.f32 %v6065_v4, %v6247_v40 }
 0x5c6   : > { %v6444_v19 = vpop.eup %4348  ;;  %4368 = vpow2.f32 %v2089_v39  ;;  %v2120_v5 = vadd.f32 %v6393_v17, %v2119_v36  ;;  %v8728_v39 = vsub.f32 %v6055_v8, %v6247_v40  ;;  %v8729_v36 = vsub.f32 %v6059_v16, %v6247_v40 }
 0x5c7   : > { %8725 = vst [vmem:[#allocation19_spill] sm:$0xff] %v6444_v19  ;;  %v6450_v0 = vpop.eup %4350  ;;  %4370 = vpow2.f32 %v2093_v54  ;;  %v2109_v42 = vmul.f32 1.442695, %v8727_v38  ;;  %v1995_v41 = vmul.f32 1.442695, %v8730_v18  ;;  %v8731_v8 = vsub.f32 %v6073_v23, %v6247_v40 }
 0x5c8   : > { %v6455_v57 = vpop.eup %4352  ;;  %4372 = vpow2.f32 %v2097_v34  ;;  %v2121_v48 = vadd.f32 %v6400_v14, %v2120_v5  ;;  %v1987_v59 = vmul.f32 1.442695, %v8728_v39  ;;  %v1991_v54 = vmul.f32 1.442695, %v8729_v36 }
 0x5c9   : > { %v6461_v30 = vpop.eup %4354  ;;  %4374 = vpow2.f32 %v2101_v32  ;;  %v1999_v5 = vmul.f32 1.442695, %v8731_v8  ;;  %v8732_v32 = vsub.f32 %v6080_v7, %v6247_v40  ;;  %v8733_v16 = vsub.f32 %v6086_v46, %v6247_v40 }
 0x5ca   : > { %v6469_v51 = vpop.eup %4356  ;;  %4376 = vpow2.f32 %v2105_v33  ;;  %v2122_v34 = vadd.f32 %v6408_v43, %v2121_v48  ;;  %v8734_v33 = vsub.f32 %v6092_v12, %v6247_v40  ;;  %v8735_v48 = vsub.f32 %v6098_v62, %v6247_v40 }
 0x5cb   : > { %v2003_v38 = vmul.f32 1.442695, %v8732_v32  ;;  %v6478_v39 = vpop.eup %4358  ;;  %4378 = vpow2.f32 %v2109_v42  ;;  %v2007_v4 = vmul.f32 1.442695, %v8733_v16  ;;  %v8736_v42 = vsub.f32 %v6104_v56, %v6247_v40 }
 0x5cc   : > { %v2011_v36 = vmul.f32 1.442695, %v8734_v33  ;;  %v2015_v23 = vmul.f32 1.442695, %v8735_v48  ;;  %v6489_v18 = vpop.eup %4360  ;;  %v2123_v7 = vadd.f32 %v6414_v20, %v2122_v34  ;;  %4380 = vpow2.f32 %v1987_v59 }
 0x5cd   : > { %v2019_v8 = vmul.f32 1.442695, %v8736_v42  ;;  %v8737_v46 = vsub.f32 %v6110_v15, %v6247_v40  ;;  %v6498_v16 = vpop.eup %4362  ;;  %4382 = vpow2.f32 %v1991_v54 }
 0x5ce   : > { %v6506_v34 = vpop.eup %4364  ;;  %v2124_v56 = vadd.f32 %v6420_v26, %v2123_v7  ;;  %4384 = vpow2.f32 %v1995_v41 }
 0x5cf   : > { %v2023_v32 = vmul.f32 1.442695, %v8737_v46  ;;  %v6513_v33 = vpop.eup %4366  ;;  %4386 = vpow2.f32 %v1999_v5  ;;  %v8738_v5 = vsub.f32 %v6116_v61, %v6247_v40  ;;  %v8739_v46 = vsub.f32 %v8699_v1, %v6247_v40 }
 0x5d0   : > { %v6521_v7 = vpop.eup %4368  ;;  %v2125_v41 = vadd.f32 %v6427_v49, %v2124_v56  ;;  %4388 = vpow2.f32 %v2003_v38 }
 0x5d1   : > { %v6528_v15 = vpop.eup %4370  ;;  %4390 = vpow2.f32 %v2007_v4  ;;  %v2027_v54 = vmul.f32 1.442695, %v8738_v5  ;;  %v2031_v42 = vmul.f32 1.442695, %v8739_v46 }
 0x5d2   : > { %v6536_v56 = vpop.eup %4372  ;;  %v2126_v38 = vadd.f32 %v6433_v10, %v2125_v41  ;;  %4392 = vpow2.f32 %v2011_v36  ;;  %v8740_v36 = vsub.f32 %v8700_v31, %v6247_v40  ;;  %v8745_v31 = vsub.f32 %v8705_v35, %v6247_v40 }
 0x5d3   : > { %v6544_v59 = vpop.eup %4374  ;;  %4394 = vpow2.f32 %v2015_v23  ;;  %v8741_v23 = vsub.f32 %v8701_v50, %v6247_v40  ;;  %v8744_v50 = vsub.f32 %v8704_v9, %v6247_v40  ;;  %v8748_v35 = vsub.f32 %v8708_v60, %v6247_v40 }
 0x5d4   : > { %v6549_v48 = vpop.eup %4376  ;;  %v2127_v12 = vadd.f32 %v6439_v29, %v2126_v38  ;;  %4396 = vpow2.f32 %v2019_v8  ;;  %v2035_v61 = vmul.f32 1.442695, %v8740_v36  ;;  %v8742_v8 = vsub.f32 %v8702_v21, %v6247_v40 }
 0x5d5   : > { %v6557_v5 = vpop.eup %4378  ;;  %4398 = vpow2.f32 %v2023_v32  ;;  %v2039_v1 = vmul.f32 1.442695, %v8741_v23  ;;  %v8743_v32 = vsub.f32 %v8703_v58, %v6247_v40  ;;  %v2051_v23 = vmul.f32 1.442695, %v8744_v50 }
 0x5d6   : > { %v4381_v46 = vpop.eup %4380  ;;  %v2128_v4 = vadd.f32 %v6444_v19, %v2127_v12  ;;  %4400 = vpow2.f32 %v2027_v54  ;;  %v2043_v38 = vmul.f32 1.442695, %v8742_v8  ;;  %v8746_v58 = vsub.f32 %v8706_v63, %v6247_v40 }
 0x5d7   : > { %v4383_v36 = vpop.eup %4382  ;;  %4402 = vpow2.f32 %v2031_v42  ;;  %v2047_v41 = vmul.f32 1.442695, %v8743_v32  ;;  %v2055_v42 = vmul.f32 1.442695, %v8745_v31  ;;  %v2067_v31 = vmul.f32 1.442695, %v8748_v35 }
 0x5d8   : > { %v4385_v62 = vpop.eup %4384  ;;  %v2129_v12 = vadd.f32 %v6450_v0, %v2128_v4  ;;  %4404 = vpow2.f32 %v2035_v61  ;;  %v2150_v54 = vadd.f32 %v4383_v36, %v4381_v46  ;;  %v2194_v21 = vpack.c.bf16 %v4383_v36, %v4381_v46 }
 0x5d9   : > { %v4387_v8 = vpop.eup %4386  ;;  %4406 = vpow2.f32 %v2039_v1  ;;  %v2059_v32 = vmul.f32 1.442695, %v8746_v58  ;;  %v8747_v1 = vsub.f32 %v8707_v13, %v6247_v40  ;;  %v8749_v63 = vpack.c.bf16 %v6339_v2, %v6331_v44 }
 0x5da   : > { %v4389_v19 = vpop.eup %4388  ;;  %v2130_v9 = vadd.f32 %v6455_v57, %v2129_v12  ;;  %4408 = vpow2.f32 %v2043_v38  ;;  %v2151_v50 = vadd.f32 %v4385_v62, %v2150_v54  ;;  %2225 = vmatprep.subr.bf16.mxu0 %v2194_v21  ;;  %v2196_v4 = vpack.c.bf16 %v4387_v8, %v4385_v62 }
 0x5db   : > { %v4391_v61 = vpop.eup %4390  ;;  %4410 = vpow2.f32 %v2047_v41  ;;  %v2063_v46 = vmul.f32 1.442695, %v8747_v1  ;;  %2226 = vmatpush1.bf16.msra.mxu0 %v8749_v63  ;;  %v8750_v13 = vsub.f32 %v8709_v52, %v6247_v40  ;;  %v8751_v60 = vsub.f32 %v8710_v11, %v6247_v40  ;;  %v8756_v63 = vld [vmem:[#allocation71_spill] sm:$0xff] }
 0x5dc   : > { %v4393_v36 = vpop.eup %4392  ;;  %v2131_v38 = vadd.f32 %v6461_v30, %v2130_v9  ;;  %4412 = vpow2.f32 %v2051_v23  ;;  %v2152_v12 = vadd.f32 %v4387_v8, %v2151_v50  ;;  %2227 = vmatprep.subr.bf16.mxu0 %v2196_v4  ;;  %v2198_v62 = vpack.c.bf16 %v4391_v61, %v4389_v19 }
 0x5dd   : > { %v4395_v41 = vpop.eup %4394  ;;  %4414 = vpow2.f32 %v2055_v42  ;;  %v2071_v54 = vmul.f32 1.442695, %v8750_v13  ;;  %v2075_v21 = vmul.f32 1.442695, %v8751_v60  ;;  %v8752_v8 = vsub.f32 %v8711_v27, %v6247_v40 }
 0x5de   : > { %v4397_v58 = vpop.eup %4396  ;;  %v2132_v44 = vadd.f32 %v6469_v51, %v2131_v38  ;;  %4416 = vpow2.f32 %v2059_v32  ;;  %v2153_v2 = vadd.f32 %v4389_v19, %v2152_v12  ;;  %v2200_v9 = vpack.c.bf16 %v4395_v41, %v4393_v36 }
 0x5df   : > { %v4399_v23 = vpop.eup %4398  ;;  %4418 = vpow2.f32 %v2063_v46  ;;  %v2079_v42 = vmul.f32 1.442695, %v8752_v8  ;;  %v8753_v52 = vsub.f32 %v8712_v3, %v6247_v40  ;;  %v8754_v11 = vpack.c.bf16 %v6355_v47, %v6347_v45 }
 0x5e0   : > { %v4401_v4 = vpop.eup %4400  ;;  %v2133_v1 = vadd.f32 %v6478_v39, %v2132_v44  ;;  %4420 = vpow2.f32 %v2067_v31  ;;  %v2154_v19 = vadd.f32 %v4391_v61, %v2153_v2  ;;  %v2202_v32 = vpack.c.bf16 %v4399_v23, %v4397_v58 }
 0x5e1   : > { %v2083_v50 = vmul.f32 1.442695, %v8753_v52  ;;  %2228 = vmatpush1.bf16.msra.mxu0 %v8754_v11  ;;  %v4403_v46 = vpop.eup %4402  ;;  %4422 = vpow2.f32 %v2071_v54  ;;  %v8755_v27 = vsub.f32 %v8713_v24, %v6247_v40  ;;  %v8757_v3 = vsub.f32 %v8756_v63, %v6247_v40  ;;  %v8759_v54 = vld [vmem:[#allocation73_spill] sm:$0xff] }
 0x5e2   : > { %2229 = vmatprep.subr.bf16.mxu0 %v2198_v62  ;;  %v4405_v12 = vpop.eup %4404  ;;  %v2134_v45 = vadd.f32 %v6489_v18, %v2133_v1  ;;  %4424 = vpow2.f32 %v2075_v21  ;;  %v2155_v47 = vadd.f32 %v4393_v36, %v2154_v19  ;;  %v2204_v13 = vpack.c.bf16 %v4403_v46, %v4401_v4 }
 0x5e3   : > { %v2087_v35 = vmul.f32 1.442695, %v8755_v27  ;;  %v2091_v38 = vmul.f32 1.442695, %v8757_v3  ;;  %v4407_v31 = vpop.eup %4406  ;;  %4426 = vpow2.f32 %v2079_v42  ;;  %v8758_v61 = vsub.f32 %v8715_v28, %v6247_v40 }
 0x5e4   : > { %v8760_v24 = vsub.f32 %v8759_v54, %v6247_v40  ;;  %v8761_v44 = vpack.c.bf16 %v6370_v22, %v6363_v53  ;;  %v4409_v2 = vpop.eup %4408  ;;  %v2135_v8 = vadd.f32 %v6498_v16, %v2134_v45  ;;  %4428 = vpow2.f32 %v2083_v50 }
 0x5e5   : > { %v2095_v62 = vmul.f32 1.442695, %v8758_v61  ;;  %v2156_v36 = vadd.f32 %v4395_v41, %v2155_v47  ;;  %v2206_v21 = vpack.c.bf16 %v4407_v31, %v4405_v12  ;;  %v4411_v42 = vpop.eup %4410  ;;  %4430 = vpow2.f32 %v2087_v35  ;;  %v8764_v41 = vld [vmem:[#allocation76_spill] sm:$0xff] }
 0x5e6   : > { %v2099_v60 = vmul.f32 1.442695, %v8760_v24  ;;  %2230 = vmatpush1.bf16.msra.mxu0 %v8761_v44  ;;  %v8762_v28 = vsub.f32 %v8717_v6, %v6247_v40  ;;  %v8763_v11 = vsub.f32 %v8718_v55, %v6247_v40  ;;  %v4413_v19 = vpop.eup %4412  ;;  %v2136_v22 = vadd.f32 %v6506_v34, %v2135_v8 }
 0x5e7   : > { %2231 = vmatprep.subr.bf16.mxu0 %v2200_v9  ;;  %4432 = vpow2.f32 %v2091_v38  ;;  %v2157_v53 = vadd.f32 %v4397_v58, %v2156_v36  ;;  %v2208_v27 = vpack.c.bf16 %v4411_v42, %v4409_v2  ;;  %v4415_v50 = vpop.eup %4414  ;;  %v8765_v9 = vsub.f32 %v8764_v41, %v6247_v40 }
 0x5e8   : > { %v2103_v52 = vmul.f32 1.442695, %v8762_v28  ;;  %v2107_v1 = vmul.f32 1.442695, %v8763_v11  ;;  %4434 = vpow2.f32 %v2095_v62  ;;  %v8766_v6 = vpack.c.bf16 %v6385_v37, %v6378_v25  ;;  %v4417_v63 = vpop.eup %4416 }
 0x5e9   : > { %v2111_v35 = vmul.f32 1.442695, %v8765_v9  ;;  %v2137_v55 = vadd.f32 %v6513_v33, %v2136_v22  ;;  %4436 = vpow2.f32 %v2099_v60  ;;  %v2158_v3 = vadd.f32 %v4399_v23, %v2157_v53  ;;  %v4419_v38 = vpop.eup %4418 }
 0x5ea   : > { %2232 = vmatpush1.bf16.msra.mxu0 %v8766_v6  ;;  %v2210_v45 = vpack.c.bf16 %v4415_v50, %v4413_v19  ;;  %4438 = vpow2.f32 %v2103_v52  ;;  %v4421_v58 = vpop.eup %4420  ;;  %v2212_v40 = vpack.c.bf16 %v4419_v38, %v4417_v63  ;;  %v8767_v37 = vpack.c.bf16 %v6400_v14, %v6393_v17 }
 0x5eb   : > { %2233 = vmatprep.subr.bf16.mxu0 %v2202_v32  ;;  %v2138_v47 = vadd.f32 %v6521_v7, %v2137_v55  ;;  %4440 = vpow2.f32 %v2107_v1  ;;  %v2159_v61 = vadd.f32 %v4401_v4, %v2158_v3  ;;  %v4423_v62 = vpop.eup %4422  ;;  %v8768_v28 = vpack.c.bf16 %v6414_v20, %v6408_v43 }
 0x5ec   : > { %4442 = vpow2.f32 %v2111_v35  ;;  %v4425_v25 = vpop.eup %4424  ;;  %v2214_v32 = vpack.c.bf16 %v4423_v62, %v4421_v58  ;;  %v8770_v55 = vpack.c.bf16 %v6439_v29, %v6433_v10  ;;  %v8774_v10 = vpack.c.bf16 %v6478_v39, %v6469_v51 }
 0x5ed   : > { %v2139_v54 = vadd.f32 %v6528_v15, %v2138_v47  ;;  %v2160_v23 = vadd.f32 %v4403_v46, %v2159_v61  ;;  %v4427_v24 = vpop.eup %4426  ;;  %v8777_v51 = vpack.c.bf16 %v6528_v15, %v6521_v7  ;;  %v8784_v15 = vld [vmem:[#allocation38_spill] sm:$0xff] }
 0x5ee   : > { %2234 = vmatpush1.bf16.msra.mxu0 %v8767_v37  ;;  %v4429_v60 = vpop.eup %4428  ;;  %v2216_v36 = vpack.c.bf16 %v4427_v24, %v4425_v25  ;;  %v8783_v37 = vld [vmem:[#allocation39_spill] sm:$0xff] }
 0x5ef   : > { %2235 = vmatprep.subr.bf16.mxu0 %v2204_v13  ;;  %v2140_v44 = vadd.f32 %v6536_v56, %v2139_v54  ;;  %v2161_v8 = vadd.f32 %v4405_v12, %v2160_v23  ;;  %v4431_v4 = vpop.eup %4430  ;;  %v8769_v12 = vpack.c.bf16 %v6427_v49, %v6420_v26  ;;  %v8771_v26 = vld [vmem:[#allocation19_spill] sm:$0xff]  ;;  %v8785_v7 = vpack.c.bf16 %v8783_v37, %v8784_v15  ;;  %v8787_v54 = vld [vmem:[#allocation42_spill] sm:$0xff] }
 0x5f0   : > { %v2218_v11 = vpack.c.bf16 %v4431_v4, %v4429_v60  ;;  %v8772_v49 = vpack.c.bf16 %v6450_v0, %v8771_v26  ;;  %v8775_v0 = vpack.c.bf16 %v6498_v16, %v6489_v18  ;;  %v8778_v18 = vpack.c.bf16 %v6544_v59, %v6536_v56  ;;  %v8790_v56 = vld [vmem:[#allocation20_spill] sm:$0xff] }
 0x5f1   : > { %v4433_v52 = vpop.eup %4432  ;;  %v2141_v14 = vadd.f32 %v6544_v59, %v2140_v44  ;;  %v2162_v17 = vadd.f32 %v4407_v31, %v2161_v8  ;;  %v8789_v59 = vld [vmem:[#allocation22_spill] sm:$0xff]  ;;  %v8796_v44 = vld [vmem:[#allocation24_spill] sm:$0xff] }
 0x5f2   : > { %2236 = vmatpush1.bf16.msra.mxu0 %v8768_v28  ;;  %v4435_v46 = vpop.eup %4434 }
 0x5f3   : > { %2237 = vmatprep.subr.bf16.mxu0 %v2206_v21  ;;  %v4437_v13 = vpop.eup %4436  ;;  %v2142_v1 = vadd.f32 %v6549_v48, %v2141_v14  ;;  %v2163_v22 = vadd.f32 %v4409_v2, %v2162_v17  ;;  %v2220_v53 = vpack.c.bf16 %v4435_v46, %v4433_v52  ;;  %v2310_v14 = vpop.trf.xlu0 }
 0x5f4   : > { %v4439_v41 = vpop.eup %4438 }
 0x5f5   : > { %v4441_v9 = vpop.eup %4440  ;;  %v6655_v20 = vadd.f32 %v6557_v5, %v2142_v1  ;;  %v2164_v43 = vadd.f32 %v4411_v42, %v2163_v22  ;;  %v2222_v31 = vpack.c.bf16 %v4439_v41, %v4437_v13  ;;  %v8773_v42 = vpack.c.bf16 %v6461_v30, %v6455_v57 }
 0x5f6   : > { %2238 = vmatpush1.bf16.msra.mxu0 %v8769_v12  ;;  %v4443_v21 = vpop.eup %4442  ;;  %v8776_v57 = vpack.c.bf16 %v6513_v33, %v6506_v34  ;;  %v8779_v34 = vpack.c.bf16 %v6557_v5, %v6549_v48  ;;  %v8780_v33 = vld [vmem:[#allocation23_spill] sm:$0xff]  ;;  %v8795_v5 = vld [vmem:[#allocation26_spill] sm:$0xff] }
 0x5f7   : > { %2239 = vmatprep.subr.bf16.mxu0 %v2208_v27  ;;  %v2165_v35 = vadd.f32 %v4413_v19, %v2164_v43  ;;  %v2224_v6 = vpack.c.bf16 %v4443_v21, %v4441_v9  ;;  %v8797_v8 = vpack.c.bf16 %v8795_v5, %v8796_v44  ;;  %v2311_v17 = vpop.trf.xlu0  ;;  %v2144_v26 = vrot.slane %v6655_v20, 4 }
 0x5f9   : > { %v2166_v2 = vadd.f32 %v4415_v50, %v2165_v35 }
 0x5fa   : > { %2240 = vmatpush1.bf16.msra.mxu0 %v8770_v55  ;;  %v8802_v55 = vld [vmem:[#allocation49_spill] sm:$0xff] }
 0x5fb   : > { %2241 = vmatprep.subr.bf16.mxu0 %v2210_v45  ;;  %v2167_v3 = vadd.f32 %v4417_v63, %v2166_v2  ;;  %v8803_v2 = vld [vmem:[#allocation47_spill] sm:$0xff] }
 0x5fd   : > { %v2168_v47 = vadd.f32 %v4419_v38, %v2167_v3  ;;  %v8804_v3 = vpack.c.bf16 %v8802_v55, %v8803_v2 }
 0x5fe   : > { %2242 = vmatpush1.bf16.msra.mxu0 %v8772_v49 }
 0x5ff   : > { %2243 = vmatprep.subr.bf16.mxu0 %v2212_v40  ;;  %v2169_v61 = vadd.f32 %v4421_v58, %v2168_v47  ;;  %v8781_v40 = vld [vmem:[#allocation21_spill] sm:$0xff]  ;;  %v2145_v47 = vadd.f32 %v2144_v26, %v6655_v20 }
 0x601   : > { %v2170_v19 = vadd.f32 %v4423_v62, %v2169_v61  ;;  %v8782_v62 = vpack.c.bf16 %v8780_v33, %v8781_v40 }
 0x602   : > { %2244 = vmatpush1.bf16.msra.mxu0 %v8773_v42  ;;  %v2146_v42 = vrot.slane %v2145_v47, 2 }
 0x603   : > { %2245 = vmatprep.subr.bf16.mxu0 %v2214_v32  ;;  %v2171_v27 = vadd.f32 %v4425_v25, %v2170_v19  ;;  %v8786_v25 = vld [vmem:[#allocation55_spill] sm:$0xff]  ;;  %v8791_v32 = vpack.c.bf16 %v8789_v59, %v8790_v56 }
 0x604   : > { %v8788_v23 = vpack.c.bf16 %v8786_v25, %v8787_v54 }
 0x605   : > { %v2172_v29 = vadd.f32 %v4427_v24, %v2171_v27  ;;  %v8792_v24 = vld [vmem:[#allocation27_spill] sm:$0xff]  ;;  %v2147_v27 = vadd.f32 %v2146_v42, %v2145_v47 }
 0x606   : > { %2246 = vmatpush1.bf16.msra.mxu0 %v8774_v10 }
 0x607   : > { %2247 = vmatprep.subr.bf16.mxu0 %v2216_v36  ;;  %v2173_v50 = vadd.f32 %v4429_v60, %v2172_v29  ;;  %v8793_v60 = vld [vmem:[#allocation25_spill] sm:$0xff]  ;;  %v8798_v36 = vld [vmem:[#allocation52_spill] sm:$0xff]  ;;  %v2148_v29 = vrot.slane %v2147_v27, 1 }
 0x608   : > { %v8794_v48 = vpack.c.bf16 %v8792_v24, %v8793_v60 }
 0x609   : > { %v2174_v63 = vadd.f32 %v4431_v4, %v2173_v50  ;;  %v8799_v4 = vld [vmem:[#allocation40_spill] sm:$0xff] }
 0x60a   : > { %2248 = vmatpush1.bf16.msra.mxu0 %v8775_v0  ;;  %v8800_v28 = vpack.c.bf16 %v8798_v36, %v8799_v4  ;;  %v2149_v0 = vadd.f32 %v2148_v29, %v2147_v27 }
 0x60b   : > { %2249 = vmatprep.subr.bf16.mxu0 %v2218_v11  ;;  %v2175_v45 = vadd.f32 %v4433_v52, %v2174_v63  ;;  %v8801_v52 = vmov 0   ;;  %v2312_v11 = vpop.trf.xlu0 }
 0x60c   : > { %4444 = vrcp.f32 %v2149_v0 }
 0x60d   : > { %v2176_v30 = vadd.f32 %v4435_v46, %v2175_v45 }
 0x60e   : > { %2250 = vmatpush1.bf16.msra.mxu0 %v8776_v57 }
 0x60f   : > { %2251 = vmatprep.subr.bf16.mxu0 %v2220_v53  ;;  %v2177_v38 = vadd.f32 %v4437_v13, %v2176_v30  ;;  %v2313_v46 = vpop.trf.xlu0 }
 0x611   : > { %v2178_v39 = vadd.f32 %v4439_v41, %v2177_v38  ;;  %v2326_v41 = vpop.trf.xlu1 }
 0x612   : > { %2252 = vmatpush1.bf16.msra.mxu0 %v8777_v51 }
 0x613   : > { %2253 = vmatprep.subr.bf16.mxu0 %v2222_v31  ;;  %v2179_v58 = vadd.f32 %v4441_v9, %v2178_v39  ;;  %v2314_v13 = vpop.trf.xlu0 }
 0x615   : > { %v2180_v16 = vadd.f32 %v4443_v21, %v2179_v58  ;;  %v2327_v12 = vpop.trf.xlu1 }
 0x616   : > { %2254 = vmatpush1.bf16.msra.mxu0 %v8778_v18  ;;  %v4445_v45 = vpop.eup %4444 }
 0x617   : > { %2255 = vmatprep.subr.bf16.mxu0 %v2224_v6  ;;  %v2315_v1 = vpop.trf.xlu0  ;;  %v2181_v49 = vrot.slane %v2180_v16, 4 }
 0x619   : > { %v2328_v9 = vpop.trf.xlu1  ;;  %v2182_v61 = vadd.f32 %v2181_v49, %v2180_v16 }
 0x61a   : > { %2256 = vmatpush1.bf16.msra.mxu0 %v8779_v34 }
 0x61b   : > { %2382 = vmatprep.subr.bf16.mxu0 %v8782_v62  ;;  %v2316_v22 = vpop.trf.xlu0  ;;  %v2183_v19 = vrot.slane %v2182_v61, 2 }
 0x61d   : > { %2258 = vmatmul.mubr.bf16.vlgmr.msra.gmra.mrb[96].mxu0 %v8785_v7  ;;  %v2329_v43 = vpop.trf.xlu1  ;;  %v2184_v10 = vadd.f32 %v2183_v19, %v2182_v61 }
 0x61e   : > { %2267 = vmatprep.mubr.bf16.mxu0 %v8788_v23  ;;  %2383 = vmatpush1.bf16.msra.mxu0 %v8791_v32 }
 0x61f   : > { %2384 = vmatprep.subr.bf16.mxu0 %v8794_v48  ;;  %v2317_v53 = vpop.trf.xlu0  ;;  %v2185_v50 = vrot.slane %v2184_v10, 1 }
 0x621   : > { %v2330_v31 = vpop.trf.xlu1  ;;  %v2186_v63 = vadd.f32 %v2185_v50, %v2184_v10 }
 0x622   : > { %2385 = vmatpush1.bf16.msra.mxu0 %v8797_v8 }
 0x623   : > { %4446 = vrcp.f32 %v2186_v63 }
 0x625   : > { %2268 = vmatmul.mubr.bf16.gmra.mrb[100].mxu0 %v8800_v28  ;;  %v2331_v21 = vpop.trf.xlu1 }
 0x626   : > { %2414 = vmatprep.mubr.bf16.mxu0 %v8801_v52 }
 0x629   : > { %v2332_v35 = vpop.trf.xlu1 }
 0x62d   : > { %4051 = vmatmul.mubr.msk.bf16.vlgmr.msra.gmra.mrb[104].mxu0 %vm877_vm2, %v2310_v14  ;;  %v2333_v6 = vpop.trf.xlu1  ;;  %v4447_v30 = vpop.eup %4446 }
 0x62e   : > { %2424 = vmatprep.mubr.bf16.mxu0 %v8801_v52 }
 0x635   : > { %4052 = vmatmul.mubr.msk.bf16.gmra.mrb[108].mxu0 %vm877_vm2, %v2311_v17 }
 0x636   : > { %2434 = vmatprep.mubr.bf16.mxu0 %v8801_v52 }
 0x63d   : > { %4053 = vmatmul.mubr.msk.bf16.gmra.mrb[112].mxu0 %vm877_vm2, %v2312_v11 }
 0x63e   : > { %2444 = vmatprep.mubr.bf16.mxu0 %v8801_v52 }
 0x645   : > { %4054 = vmatmul.mubr.msk.bf16.gmra.mrb[116].mxu0 %vm877_vm2, %v2313_v46 }
 0x646   : > { %2454 = vmatprep.mubr.bf16.mxu0 %v8801_v52 }
 0x64d   : > { %4055 = vmatmul.mubr.msk.bf16.gmra.mrb[120].mxu0 %vm877_vm2, %v2314_v13 }
 0x64e   : > { %2464 = vmatprep.mubr.bf16.mxu0 %v8801_v52 }
 0x655   : > { %4056 = vmatmul.mubr.msk.bf16.gmra.mrb[124].mxu0 %vm877_vm2, %v2315_v1 }
 0x656   : > { %2474 = vmatprep.mubr.bf16.mxu0 %v8801_v52 }
 0x65d   : > { %4057 = vmatmul.mubr.msk.bf16.gmra.mrb[128].mxu0 %vm877_vm2, %v2316_v22 }
 0x65e   : > { %2484 = vmatprep.mubr.bf16.mxu0 %v8801_v52 }
 0x665   : > { %4058 = vmatmul.mubr.msk.bf16.gmra.mrb[132].mxu0 %vm877_vm2, %v2317_v53 }
 0x666   : > { %2494 = vmatprep.mubr.bf16.mxu0 %v8801_v52 }
 0x66d   : > { %4059 = vmatmul.mubr.msk.bf16.gmra.mrb[136].mxu0 %vm877_vm2, %v2326_v41 }
 0x66e   : > { %2504 = vmatprep.mubr.bf16.mxu0 %v8801_v52 }
 0x675   : > { %4060 = vmatmul.mubr.msk.bf16.gmra.mrb[140].mxu0 %vm877_vm2, %v2327_v12 }
 0x676   : > { %2514 = vmatprep.mubr.bf16.mxu0 %v8801_v52 }
 0x67d   : > { %4061 = vmatmul.mubr.msk.bf16.gmra.mrb[144].mxu0 %vm877_vm2, %v2328_v9 }
 0x67e   : > { %2524 = vmatprep.mubr.bf16.mxu0 %v8801_v52 }
 0x685   : > { %4062 = vmatmul.mubr.msk.bf16.gmra.mrb[148].mxu0 %vm877_vm2, %v2329_v43 }
 0x686   : > { %2534 = vmatprep.mubr.bf16.mxu0 %v8801_v52 }
 0x68d   : > { %4063 = vmatmul.mubr.msk.bf16.gmra.mrb[152].mxu0 %vm877_vm2, %v2330_v31 }
 0x68e   : > { %2544 = vmatprep.mubr.bf16.mxu0 %v8801_v52 }
 0x695   : > { %4064 = vmatmul.mubr.msk.bf16.gmra.mrb[156].mxu0 %vm877_vm2, %v2331_v21 }
 0x696   : > { %2554 = vmatprep.mubr.bf16.mxu0 %v8801_v52 }
 0x69d   : > { %4065 = vmatmul.mubr.msk.bf16.gmra.mrb[160].mxu0 %vm877_vm2, %v2332_v35 }
 0x69e   : > { %2564 = vmatprep.mubr.bf16.mxu0 %v8801_v52 }
 0x6a5   : > { %4066 = vmatmul.mubr.msk.bf16.gmra.mrb[164].mxu0 %vm877_vm2, %v2333_v6 }
 0x6a6   : > { %3713 = vmatprep.mubr.bf16.mxu0 %v8804_v3 }
 0x6f0   : > { %v2259_v57 = vpop.f32.mrb[96].mxu0 }
 0x6f1   : > { %v6742_v38 = vmul.f32 %v4445_v45, %v2259_v57  ;;  %v2261_v51 = vpop.f32.mrb[97].mxu0 }
 0x6f2   : > { %v6744_v39 = vmul.f32 %v4447_v30, %v2261_v51  ;;  %v2263_v20 = vpop.f32.mrb[98].mxu0 }
 0x6f3   : > { %8805 = vst [vmem:[#allocation17_spill] sm:$0xff] %v6742_v38  ;;  %v6746_v58 = vmul.f32 %v4445_v45, %v2263_v20  ;;  %v2265_v18 = vpop.f32.mrb[99].mxu0 }
 0x6f4   : > { %8806 = vst [vmem:[#allocation18_spill] sm:$0xff] %v6744_v39  ;;  %v6748_v16 = vmul.f32 %v4447_v30, %v2265_v18 }
 0x6f5   : > { %8807 = vst [vmem:[#allocation16_spill] sm:$0xff] %v6746_v58 }
 0x6f6   : > { %8808 = vst [vmem:[#allocation36_spill] sm:$0xff] %v6748_v16 }
 0x6f8   : > { %v2269_v40 = vpop.f32.mrb[100].mxu0 }
 0x6f9   : > { %v6754_v62 = vmul.f32 %v4445_v45, %v2269_v40  ;;  %v2271_v37 = vpop.f32.mrb[101].mxu0 }
 0x6fa   : > { %v6756_v15 = vmul.f32 %v4447_v30, %v2271_v37  ;;  %v2273_v7 = vpop.f32.mrb[102].mxu0 }
 0x6fb   : > { %8809 = vst [vmem:[#allocation60_spill] sm:$0xff] %v6754_v62  ;;  %v6758_v25 = vmul.f32 %v4445_v45, %v2273_v7  ;;  %v2275_v54 = vpop.f32.mrb[103].mxu0 }
 0x6fc   : > { %8810 = vst [vmem:[#allocation62_spill] sm:$0xff] %v6756_v15  ;;  %v6760_v23 = vmul.f32 %v4447_v30, %v2275_v54 }
 0x6fd   : > { %8811 = vst [vmem:[#allocation63_spill] sm:$0xff] %v6758_v25 }
 0x6fe   : > { %8812 = vst [vmem:[#allocation64_spill] sm:$0xff] %v6760_v23 }
 0x700   : > { %v6766_v32 = vpop.f32.mrb[104].mxu0 }
 0x701   : > { %v6768_v24 = vpop.f32.mrb[105].mxu0 }
 0x702   : > { %v6770_v60 = vpop.f32.mrb[106].mxu0 }
 0x703   : > { %v6772_v48 = vpop.f32.mrb[107].mxu0 }
 0x708   : > { %v6774_v5 = vpop.f32.mrb[108].mxu0 }
 0x709   : > { %v2575_v44 = vmax.f32 %v6766_v32, %v6774_v5  ;;  %v6778_v8 = vpop.f32.mrb[109].mxu0 }
 0x70a   : > { %v2612_v36 = vmax.f32 %v6768_v24, %v6778_v8  ;;  %v6782_v4 = vpop.f32.mrb[110].mxu0 }
 0x70b   : > { %v2576_v28 = vmax.f32 %v6770_v60, %v6782_v4  ;;  %v6786_v14 = vpop.f32.mrb[111].mxu0 }
 0x70c   : > { %v2613_v17 = vmax.f32 %v6772_v48, %v6786_v14 }
 0x710   : > { %v6790_v11 = vpop.f32.mrb[112].mxu0 }
 0x711   : > { %v2577_v46 = vmax.f32 %v2575_v44, %v6790_v11  ;;  %v6793_v13 = vpop.f32.mrb[113].mxu0 }
 0x712   : > { %v2614_v1 = vmax.f32 %v2612_v36, %v6793_v13  ;;  %v6796_v22 = vpop.f32.mrb[114].mxu0 }
 0x713   : > { %v2578_v53 = vmax.f32 %v2576_v28, %v6796_v22  ;;  %v6799_v41 = vpop.f32.mrb[115].mxu0 }
 0x714   : > { %v2615_v12 = vmax.f32 %v2613_v17, %v6799_v41 }
 0x718   : > { %v6802_v9 = vpop.f32.mrb[116].mxu0 }
 0x719   : > { %v2579_v43 = vmax.f32 %v2577_v46, %v6802_v9  ;;  %v6805_v31 = vpop.f32.mrb[117].mxu0 }
 0x71a   : > { %v2616_v21 = vmax.f32 %v2614_v1, %v6805_v31  ;;  %v6808_v35 = vpop.f32.mrb[118].mxu0 }
 0x71b   : > { %v2580_v6 = vmax.f32 %v2578_v53, %v6808_v35  ;;  %v6811_v55 = vpop.f32.mrb[119].mxu0 }
 0x71c   : > { %v2617_v2 = vmax.f32 %v2615_v12, %v6811_v55 }
 0x720   : > { %v6814_v3 = vpop.f32.mrb[120].mxu0 }
 0x721   : > { %v2581_v26 = vmax.f32 %v2579_v43, %v6814_v3  ;;  %v6817_v49 = vpop.f32.mrb[121].mxu0 }
 0x722   : > { %v2618_v47 = vmax.f32 %v2616_v21, %v6817_v49  ;;  %v6820_v61 = vpop.f32.mrb[122].mxu0 }
 0x723   : > { %v2582_v42 = vmax.f32 %v2580_v6, %v6820_v61  ;;  %v6823_v19 = vpop.f32.mrb[123].mxu0 }
 0x724   : > { %v2619_v27 = vmax.f32 %v2617_v2, %v6823_v19 }
 0x728   : > { %v6826_v10 = vpop.f32.mrb[124].mxu0 }
 0x729   : > { %v2583_v29 = vmax.f32 %v2581_v26, %v6826_v10  ;;  %v6829_v50 = vpop.f32.mrb[125].mxu0 }
 0x72a   : > { %v2620_v0 = vmax.f32 %v2618_v47, %v6829_v50  ;;  %v6832_v63 = vpop.f32.mrb[126].mxu0 }
 0x72b   : > { %v2584_v45 = vmax.f32 %v2582_v42, %v6832_v63  ;;  %v6835_v57 = vpop.f32.mrb[127].mxu0 }
 0x72c   : > { %8813 = vst [vmem:[#allocation65_spill] sm:$0xff] %v6835_v57  ;;  %v2621_v30 = vmax.f32 %v2619_v27, %v6835_v57 }
 0x730   : > { %v6838_v51 = vpop.f32.mrb[128].mxu0 }
 0x731   : > { %v2585_v20 = vmax.f32 %v2583_v29, %v6838_v51  ;;  %v6841_v18 = vpop.f32.mrb[129].mxu0 }
 0x732   : > { %8814 = vst [vmem:[#allocation66_spill] sm:$0xff] %v6841_v18  ;;  %v2622_v40 = vmax.f32 %v2620_v0, %v6841_v18  ;;  %v6844_v37 = vpop.f32.mrb[130].mxu0 }
 0x733   : > { %v2586_v7 = vmax.f32 %v2584_v45, %v6844_v37  ;;  %v6847_v54 = vpop.f32.mrb[131].mxu0 }
 0x734   : > { %8815 = vst [vmem:[#allocation67_spill] sm:$0xff] %v6847_v54  ;;  %v2623_v44 = vmax.f32 %v2621_v30, %v6847_v54 }
 0x738   : > { %v6850_v36 = vpop.f32.mrb[132].mxu0 }
 0x739   : > { %v2587_v28 = vmax.f32 %v2585_v20, %v6850_v36  ;;  %v6853_v17 = vpop.f32.mrb[133].mxu0 }
 0x73a   : > { %8816 = vst [vmem:[#allocation68_spill] sm:$0xff] %v6853_v17  ;;  %v2624_v46 = vmax.f32 %v2622_v40, %v6853_v17  ;;  %v6856_v1 = vpop.f32.mrb[134].mxu0 }
 0x73b   : > { %v2588_v53 = vmax.f32 %v2586_v7, %v6856_v1  ;;  %v6859_v12 = vpop.f32.mrb[135].mxu0 }
 0x73c   : > { %8817 = vst [vmem:[#allocation69_spill] sm:$0xff] %v6859_v12  ;;  %v2625_v43 = vmax.f32 %v2623_v44, %v6859_v12 }
 0x740   : > { %v6862_v21 = vpop.f32.mrb[136].mxu0 }
 0x741   : > { %v2589_v6 = vmax.f32 %v2587_v28, %v6862_v21  ;;  %v6865_v2 = vpop.f32.mrb[137].mxu0 }
 0x742   : > { %8818 = vst [vmem:[#allocation70_spill] sm:$0xff] %v6865_v2  ;;  %v2626_v26 = vmax.f32 %v2624_v46, %v6865_v2  ;;  %v6868_v47 = vpop.f32.mrb[138].mxu0 }
 0x743   : > { %v2590_v42 = vmax.f32 %v2588_v53, %v6868_v47  ;;  %v6871_v27 = vpop.f32.mrb[139].mxu0 }
 0x744   : > { %8819 = vst [vmem:[#allocation72_spill] sm:$0xff] %v6871_v27  ;;  %v2627_v29 = vmax.f32 %v2625_v43, %v6871_v27 }
 0x748   : > { %v6874_v0 = vpop.f32.mrb[140].mxu0 }
 0x749   : > { %v2591_v45 = vmax.f32 %v2589_v6, %v6874_v0  ;;  %v6877_v30 = vpop.f32.mrb[141].mxu0 }
 0x74a   : > { %8820 = vst [vmem:[#allocation74_spill] sm:$0xff] %v6877_v30  ;;  %v2628_v20 = vmax.f32 %v2626_v26, %v6877_v30  ;;  %v6880_v40 = vpop.f32.mrb[142].mxu0 }
 0x74b   : > { %v2592_v7 = vmax.f32 %v2590_v42, %v6880_v40  ;;  %v6883_v44 = vpop.f32.mrb[143].mxu0 }
 0x74c   : > { %8821 = vst [vmem:[#allocation75_spill] sm:$0xff] %v6883_v44  ;;  %v2629_v28 = vmax.f32 %v2627_v29, %v6883_v44 }
 0x750   : > { %v6886_v46 = vpop.f32.mrb[144].mxu0 }
 0x751   : > { %v2593_v53 = vmax.f32 %v2591_v45, %v6886_v46  ;;  %v6889_v43 = vpop.f32.mrb[145].mxu0 }
 0x752   : > { %8822 = vst [vmem:[#allocation71_spill] sm:$0xff] %v6889_v43  ;;  %v2630_v6 = vmax.f32 %v2628_v20, %v6889_v43  ;;  %v6892_v59 = vpop.f32.mrb[146].mxu0 }
 0x753   : > { %v2594_v26 = vmax.f32 %v2592_v7, %v6892_v59  ;;  %v6895_v56 = vpop.f32.mrb[147].mxu0 }
 0x754   : > { %8823 = vst [vmem:[#allocation73_spill] sm:$0xff] %v6895_v56  ;;  %v2631_v42 = vmax.f32 %v2629_v28, %v6895_v56 }
 0x758   : > { %v6898_v34 = vpop.f32.mrb[148].mxu0 }
 0x759   : > { %v2595_v29 = vmax.f32 %v2593_v53, %v6898_v34  ;;  %v6901_v33 = vpop.f32.mrb[149].mxu0 }
 0x75a   : > { %8824 = vst [vmem:[#allocation76_spill] sm:$0xff] %v6901_v33  ;;  %v2632_v45 = vmax.f32 %v2630_v6, %v6901_v33  ;;  %v6904_v62 = vpop.f32.mrb[150].mxu0 }
 0x75b   : > { %v2596_v20 = vmax.f32 %v2594_v26, %v6904_v62  ;;  %v6907_v25 = vpop.f32.mrb[151].mxu0 }
 0x75c   : > { %8825 = vst [vmem:[#allocation19_spill] sm:$0xff] %v6907_v25  ;;  %v2633_v7 = vmax.f32 %v2631_v42, %v6907_v25 }
 0x760   : > { %v6910_v15 = vpop.f32.mrb[152].mxu0 }
 0x761   : > { %v2597_v28 = vmax.f32 %v2595_v29, %v6910_v15  ;;  %v6913_v23 = vpop.f32.mrb[153].mxu0 }
 0x762   : > { %8826 = vst [vmem:[#allocation23_spill] sm:$0xff] %v6913_v23  ;;  %v2634_v53 = vmax.f32 %v2632_v45, %v6913_v23  ;;  %v6916_v38 = vpop.f32.mrb[154].mxu0 }
 0x763   : > { %v2598_v6 = vmax.f32 %v2596_v20, %v6916_v38  ;;  %v6919_v58 = vpop.f32.mrb[155].mxu0 }
 0x764   : > { %8827 = vst [vmem:[#allocation21_spill] sm:$0xff] %v6919_v58  ;;  %v2635_v26 = vmax.f32 %v2633_v7, %v6919_v58 }
 0x768   : > { %v6922_v39 = vpop.f32.mrb[156].mxu0 }
 0x769   : > { %v2599_v42 = vmax.f32 %v2597_v28, %v6922_v39  ;;  %v6925_v16 = vpop.f32.mrb[157].mxu0 }
 0x76a   : > { %8828 = vst [vmem:[#allocation39_spill] sm:$0xff] %v6925_v16  ;;  %v2636_v29 = vmax.f32 %v2634_v53, %v6925_v16  ;;  %v6928_v52 = vpop.f32.mrb[158].mxu0 }
 0x76b   : > { %v2600_v45 = vmax.f32 %v2598_v6, %v6928_v52  ;;  %v6931_v23 = vpop.f32.mrb[159].mxu0 }
 0x76c   : > { %8829 = vst [vmem:[#allocation38_spill] sm:$0xff] %v6931_v23  ;;  %v2637_v20 = vmax.f32 %v2635_v26, %v6931_v23 }
 0x770   : > { %v6934_v25 = vpop.f32.mrb[160].mxu0 }
 0x771   : > { %v2601_v7 = vmax.f32 %v2599_v42, %v6934_v25  ;;  %v6937_v58 = vpop.f32.mrb[161].mxu0 }
 0x772   : > { %8830 = vst [vmem:[#allocation55_spill] sm:$0xff] %v6937_v58  ;;  %v2638_v28 = vmax.f32 %v2636_v29, %v6937_v58  ;;  %v6940_v33 = vpop.f32.mrb[162].mxu0 }
 0x773   : > { %v2602_v53 = vmax.f32 %v2600_v45, %v6940_v33  ;;  %v6943_v16 = vpop.f32.mrb[163].mxu0 }
 0x774   : > { %8831 = vst [vmem:[#allocation42_spill] sm:$0xff] %v6943_v16  ;;  %v2639_v6 = vmax.f32 %v2637_v20, %v6943_v16 }
 0x778   : > { %v6946_v56 = vpop.f32.mrb[164].mxu0 }
 0x779   : > { %v2603_v26 = vmax.f32 %v2601_v7, %v6946_v56  ;;  %v6949_v23 = vpop.f32.mrb[165].mxu0 }
 0x77a   : > { %8832 = vst [vmem:[#allocation22_spill] sm:$0xff] %v6949_v23  ;;  %v2640_v42 = vmax.f32 %v2638_v28, %v6949_v23  ;;  %v6952_v43 = vpop.f32.mrb[166].mxu0 }
 0x77b   : > { %v2604_v29 = vmax.f32 %v2602_v53, %v6952_v43  ;;  %v6955_v58 = vpop.f32.mrb[167].mxu0 }
 0x77c   : > { %8833 = vst [vmem:[#allocation20_spill] sm:$0xff] %v6955_v58  ;;  %v2641_v45 = vmax.f32 %v2639_v6, %v6955_v58 }
 0x77d   : > { %v2605_v44 = vmax.f32 %v2603_v26, %v2604_v29 }
 0x77e   : > { %v2642_v30 = vmax.f32 %v2640_v42, %v2641_v45 }
 0x77f   : > { %v2606_v27 = vrot.slane %v2605_v44, 4 }
 0x780   : > { %v2643_v20 = vrot.slane %v2642_v30, 4 }
 0x781   : > { %v2607_v16 = vmax.f32 %v2605_v44, %v2606_v27 }
 0x782   : > { %v2644_v2 = vmax.f32 %v2642_v30, %v2643_v20 }
 0x783   : > { %v2608_v12 = vrot.slane %v2607_v16, 2 }
 0x784   : > { %v2645_v7 = vrot.slane %v2644_v2, 2 }
 0x785   : > { %v2609_v17 = vmax.f32 %v2607_v16, %v2608_v12  ;;  %v8853_v12 = vld [vmem:[#allocation22_spill] sm:$0xff] }
 0x786   : > { %v2646_v54 = vmax.f32 %v2644_v2, %v2645_v7 }
 0x787   : > { %v2610_v18 = vrot.slane %v2609_v17, 1 }
 0x788   : > { %v2647_v28 = vrot.slane %v2646_v54, 1 }
 0x789   : > { %v6958_v23 = vmax.f32 %v2609_v17, %v2610_v18 }
 0x78a   : > { %v6960_v57 = vmax.f32 %v2646_v54, %v2647_v28 }
 0x78b   : > { %v2649_v53 = vsub.f32 %v6766_v32, %v6958_v23  ;;  %v2651_v6 = vsub.f32 %v6770_v60, %v6958_v23  ;;  %v2653_v27 = vsub.f32 %v6774_v5, %v6958_v23  ;;  %v2655_v30 = vsub.f32 %v6782_v4, %v6958_v23 }
 0x78c   : > { %v2657_v16 = vsub.f32 %v6790_v11, %v6958_v23  ;;  %v2659_v18 = vsub.f32 %v6796_v22, %v6958_v23  ;;  %v2661_v54 = vsub.f32 %v6802_v9, %v6958_v23  ;;  %v2663_v32 = vsub.f32 %v6808_v35, %v6958_v23 }
 0x78d   : > { %v2665_v60 = vsub.f32 %v6814_v3, %v6958_v23  ;;  %v2667_v5 = vsub.f32 %v6820_v61, %v6958_v23  ;;  %v2669_v4 = vsub.f32 %v6826_v10, %v6958_v23  ;;  %v2671_v11 = vsub.f32 %v6832_v63, %v6958_v23 }
 0x78e   : > { %v2673_v22 = vsub.f32 %v6838_v51, %v6958_v23  ;;  %v2675_v9 = vsub.f32 %v6844_v37, %v6958_v23  ;;  %v2677_v35 = vsub.f32 %v6850_v36, %v6958_v23  ;;  %v2679_v3 = vsub.f32 %v6856_v1, %v6958_v23 }
 0x78f   : > { %v2681_v61 = vsub.f32 %v6862_v21, %v6958_v23  ;;  %v2683_v10 = vsub.f32 %v6868_v47, %v6958_v23  ;;  %v2685_v63 = vsub.f32 %v6874_v0, %v6958_v23  ;;  %v2687_v51 = vsub.f32 %v6880_v40, %v6958_v23 }
 0x790   : > { %v2689_v37 = vsub.f32 %v6886_v46, %v6958_v23  ;;  %v2691_v36 = vsub.f32 %v6892_v59, %v6958_v23  ;;  %v2693_v17 = vsub.f32 %v6898_v34, %v6958_v23  ;;  %v2695_v1 = vsub.f32 %v6904_v62, %v6958_v23 }
 0x791   : > { %v2713_v40 = vmul.f32 1.442695, %v2649_v53  ;;  %v2717_v44 = vmul.f32 1.442695, %v2651_v6  ;;  %v2721_v46 = vmul.f32 1.442695, %v2653_v27 }
 0x792   : > { %v2725_v42 = vmul.f32 1.442695, %v2655_v30  ;;  %v2729_v45 = vmul.f32 1.442695, %v2657_v16  ;;  %v2733_v20 = vmul.f32 1.442695, %v2659_v18 }
 0x793   : > { %4448 = vpow2.f32 %v2713_v40  ;;  %v2737_v7 = vmul.f32 1.442695, %v2661_v54  ;;  %v2741_v28 = vmul.f32 1.442695, %v2663_v32  ;;  %v2745_v62 = vmul.f32 1.442695, %v2665_v60 }
 0x794   : > { %4450 = vpow2.f32 %v2717_v44  ;;  %v2749_v0 = vmul.f32 1.442695, %v2667_v5  ;;  %v2753_v53 = vmul.f32 1.442695, %v2669_v4  ;;  %v2757_v6 = vmul.f32 1.442695, %v2671_v11 }
 0x795   : > { %4452 = vpow2.f32 %v2721_v46  ;;  %v2761_v27 = vmul.f32 1.442695, %v2673_v22  ;;  %v2765_v26 = vmul.f32 1.442695, %v2675_v9  ;;  %v2769_v30 = vmul.f32 1.442695, %v2677_v35 }
 0x796   : > { %4454 = vpow2.f32 %v2725_v42  ;;  %v2773_v34 = vmul.f32 1.442695, %v2679_v3  ;;  %v2777_v29 = vmul.f32 1.442695, %v2681_v61  ;;  %v2781_v40 = vmul.f32 1.442695, %v2683_v10 }
 0x797   : > { %4456 = vpow2.f32 %v2729_v45  ;;  %v2785_v16 = vmul.f32 1.442695, %v2685_v63  ;;  %v2789_v18 = vmul.f32 1.442695, %v2687_v51  ;;  %v2793_v44 = vmul.f32 1.442695, %v2689_v37 }
 0x798   : > { %4458 = vpow2.f32 %v2733_v20  ;;  %v7030_v54 = vmul.f32 1.442695, %v2691_v36  ;;  %v7032_v32 = vmul.f32 1.442695, %v2693_v17  ;;  %v7034_v60 = vmul.f32 1.442695, %v2695_v1 }
 0x799   : > { %4460 = vpow2.f32 %v2737_v7  ;;  %v8834_v37 = vld [vmem:[#allocation65_spill] sm:$0xff]  ;;  %v8836_v46 = vld [vmem:[#allocation67_spill] sm:$0xff]  ;;  %v8837_v20 = vld [vmem:[#allocation68_spill] sm:$0xff] }
 0x79a   : > { %4462 = vpow2.f32 %v2741_v28  ;;  %v8838_v28 = vld [vmem:[#allocation69_spill] sm:$0xff]  ;;  %v8840_v51 = vld [vmem:[#allocation72_spill] sm:$0xff]  ;;  %v8841_v63 = vld [vmem:[#allocation74_spill] sm:$0xff] }
 0x79b   : > { %4464 = vpow2.f32 %v2745_v62  ;;  %v8835_v62 = vld [vmem:[#allocation66_spill] sm:$0xff]  ;;  %v8842_v7 = vld [vmem:[#allocation75_spill] sm:$0xff]  ;;  %v8844_v35 = vld [vmem:[#allocation73_spill] sm:$0xff] }
 0x79c   : > { %4466 = vpow2.f32 %v2749_v0  ;;  %v8843_v3 = vld [vmem:[#allocation71_spill] sm:$0xff]  ;;  %v8845_v42 = vld [vmem:[#allocation76_spill] sm:$0xff]  ;;  %v8848_v5 = vld [vmem:[#allocation21_spill] sm:$0xff] }
 0x79d   : > { %v7044_v9 = vpop.eup %4448  ;;  %4468 = vpow2.f32 %v2753_v53  ;;  %v8846_v11 = vld [vmem:[#allocation19_spill] sm:$0xff] }
 0x79e   : > { %v7052_v10 = vpop.eup %4450  ;;  %4470 = vpow2.f32 %v2757_v6  ;;  %v8839_v6 = vld [vmem:[#allocation70_spill] sm:$0xff]  ;;  %v8847_v53 = vld [vmem:[#allocation23_spill] sm:$0xff] }
 0x79f   : > { %v7060_v17 = vpop.eup %4452  ;;  %4472 = vpow2.f32 %v2761_v27  ;;  %v2841_v1 = vadd.f32 %v7052_v10, %v7044_v9  ;;  %v8852_v27 = vld [vmem:[#allocation42_spill] sm:$0xff] }
 0x7a0   : > { %v7068_v45 = vpop.eup %4454  ;;  %4474 = vpow2.f32 %v2765_v26  ;;  %v8850_v26 = vld [vmem:[#allocation38_spill] sm:$0xff] }
 0x7a1   : > { %v7076_v36 = vpop.eup %4456  ;;  %4476 = vpow2.f32 %v2769_v30  ;;  %v2842_v0 = vadd.f32 %v7060_v17, %v2841_v1 }
 0x7a2   : > { %v7083_v61 = vpop.eup %4458  ;;  %4478 = vpow2.f32 %v2773_v34 }
 0x7a3   : > { %v7091_v22 = vpop.eup %4460  ;;  %4480 = vpow2.f32 %v2777_v29  ;;  %v2843_v1 = vadd.f32 %v7068_v45, %v2842_v0 }
 0x7a4   : > { %v7098_v4 = vpop.eup %4462  ;;  %4482 = vpow2.f32 %v2781_v40 }
 0x7a5   : > { %v7106_v47 = vpop.eup %4464  ;;  %4484 = vpow2.f32 %v2785_v16  ;;  %v2844_v0 = vadd.f32 %v7076_v36, %v2843_v1  ;;  %v8854_v1 = vsub.f32 %v6910_v15, %v6958_v23 }
 0x7a6   : > { %v7113_v21 = vpop.eup %4466  ;;  %4486 = vpow2.f32 %v2789_v18  ;;  %v8855_v18 = vsub.f32 %v6916_v38, %v6958_v23 }
 0x7a7   : > { %v7121_v59 = vpop.eup %4468  ;;  %4488 = vpow2.f32 %v2793_v44  ;;  %v2809_v34 = vmul.f32 1.442695, %v8854_v1  ;;  %v2845_v40 = vadd.f32 %v7083_v61, %v2844_v0  ;;  %v8856_v44 = vsub.f32 %v6922_v39, %v6958_v23 }
 0x7a8   : > { %v7127_v2 = vpop.eup %4470  ;;  %4490 = vpow2.f32 %v7030_v54  ;;  %v2813_v29 = vmul.f32 1.442695, %v8855_v18  ;;  %v8857_v54 = vsub.f32 %v6928_v52, %v6958_v23  ;;  %v8861_v52 = vsub.f32 %v6946_v56, %v6958_v23 }
 0x7a9   : > { %v7133_v30 = vpop.eup %4472  ;;  %4492 = vpow2.f32 %v7032_v32  ;;  %v2817_v16 = vmul.f32 1.442695, %v8856_v44  ;;  %v2846_v15 = vadd.f32 %v7091_v22, %v2845_v40  ;;  %v8858_v32 = vsub.f32 %v6934_v25, %v6958_v23 }
 0x7aa   : > { %v7140_v1 = vpop.eup %4474  ;;  %4494 = vpow2.f32 %v7034_v60  ;;  %v2821_v0 = vmul.f32 1.442695, %v8857_v54  ;;  %v8859_v40 = vsub.f32 %v6940_v33, %v6958_v23 }
 0x7ab   : > { %v7146_v38 = vpop.eup %4476  ;;  %4496 = vpow2.f32 %v2809_v34  ;;  %v2825_v18 = vmul.f32 1.442695, %v8858_v32  ;;  %v2847_v39 = vadd.f32 %v7098_v4, %v2846_v15  ;;  %v2833_v34 = vmul.f32 1.442695, %v8861_v52 }
 0x7ac   : > { %v7152_v44 = vpop.eup %4478  ;;  %4498 = vpow2.f32 %v2813_v29  ;;  %v2829_v60 = vmul.f32 1.442695, %v8859_v40  ;;  %v8862_v15 = vsub.f32 %v6952_v43, %v6958_v23  ;;  %v8865_v23 = vsub.f32 %v6778_v8, %v6960_v57 }
 0x7ad   : > { %v7157_v58 = vpop.eup %4480  ;;  %4500 = vpow2.f32 %v2817_v16  ;;  %v2848_v54 = vadd.f32 %v7106_v47, %v2847_v39  ;;  %v8863_v16 = vsub.f32 %v6768_v24, %v6960_v57  ;;  %v8864_v39 = vsub.f32 %v6772_v48, %v6960_v57 }
 0x7ae   : > { %8860 = vst [vmem:[#allocation27_spill] sm:$0xff] %v7157_v58  ;;  %v7163_v25 = vpop.eup %4482  ;;  %4502 = vpow2.f32 %v2821_v0  ;;  %v2837_v29 = vmul.f32 1.442695, %v8862_v15  ;;  %v2723_v43 = vmul.f32 1.442695, %v8865_v23  ;;  %v8866_v24 = vsub.f32 %v6786_v14, %v6960_v57 }
 0x7af   : > { %v7168_v32 = vpop.eup %4484  ;;  %4504 = vpow2.f32 %v2825_v18  ;;  %v2849_v33 = vadd.f32 %v7113_v21, %v2848_v54  ;;  %v2715_v40 = vmul.f32 1.442695, %v8863_v16  ;;  %v2719_v0 = vmul.f32 1.442695, %v8864_v39 }
 0x7b0   : > { %v7174_v56 = vpop.eup %4486  ;;  %4506 = vpow2.f32 %v2829_v60  ;;  %v2727_v54 = vmul.f32 1.442695, %v8866_v24  ;;  %v8867_v60 = vsub.f32 %v6793_v13, %v6960_v57  ;;  %v8868_v48 = vsub.f32 %v6799_v41, %v6960_v57 }
 0x7b1   : > { %v7182_v52 = vpop.eup %4488  ;;  %4508 = vpow2.f32 %v2833_v34  ;;  %v2850_v18 = vadd.f32 %v7121_v59, %v2849_v33  ;;  %v8869_v34 = vsub.f32 %v6805_v31, %v6960_v57  ;;  %v8870_v33 = vsub.f32 %v6811_v55, %v6960_v57 }
 0x7b2   : > { %v2731_v15 = vmul.f32 1.442695, %v8867_v60  ;;  %v7191_v16 = vpop.eup %4490  ;;  %4510 = vpow2.f32 %v2837_v29  ;;  %v2735_v8 = vmul.f32 1.442695, %v8868_v48  ;;  %v8871_v29 = vsub.f32 %v6817_v49, %v6960_v57 }
 0x7b3   : > { %v2739_v39 = vmul.f32 1.442695, %v8869_v34  ;;  %v2743_v14 = vmul.f32 1.442695, %v8870_v33  ;;  %v7202_v23 = vpop.eup %4492  ;;  %v2851_v13 = vadd.f32 %v7127_v2, %v2850_v18  ;;  %4512 = vpow2.f32 %v2715_v40 }
 0x7b4   : > { %v2747_v24 = vmul.f32 1.442695, %v8871_v29  ;;  %v8872_v41 = vsub.f32 %v6823_v19, %v6960_v57  ;;  %v7211_v48 = vpop.eup %4494  ;;  %4514 = vpow2.f32 %v2719_v0 }
 0x7b5   : > { %v7219_v18 = vpop.eup %4496  ;;  %v2852_v49 = vadd.f32 %v7133_v30, %v2851_v13  ;;  %4516 = vpow2.f32 %v2723_v43 }
 0x7b6   : > { %v2751_v60 = vmul.f32 1.442695, %v8872_v41  ;;  %v7226_v34 = vpop.eup %4498  ;;  %4518 = vpow2.f32 %v2727_v54  ;;  %v8873_v54 = vsub.f32 %v6829_v50, %v6960_v57  ;;  %v8874_v41 = vsub.f32 %v8834_v37, %v6960_v57 }
 0x7b7   : > { %v7234_v13 = vpop.eup %4500  ;;  %v2853_v43 = vadd.f32 %v7140_v1, %v2852_v49  ;;  %4520 = vpow2.f32 %v2731_v15 }
 0x7b8   : > { %v7241_v19 = vpop.eup %4502  ;;  %4522 = vpow2.f32 %v2735_v8  ;;  %v2755_v0 = vmul.f32 1.442695, %v8873_v54  ;;  %v2759_v29 = vmul.f32 1.442695, %v8874_v41 }
 0x7b9   : > { %v7249_v49 = vpop.eup %4504  ;;  %v2854_v15 = vadd.f32 %v7146_v38, %v2853_v43  ;;  %4524 = vpow2.f32 %v2739_v39  ;;  %v8875_v39 = vsub.f32 %v8835_v62, %v6960_v57  ;;  %v8880_v62 = vsub.f32 %v8840_v51, %v6960_v57 }
 0x7ba   : > { %v7257_v40 = vpop.eup %4506  ;;  %4526 = vpow2.f32 %v2743_v14  ;;  %v8876_v14 = vsub.f32 %v8836_v46, %v6960_v57  ;;  %v8879_v46 = vsub.f32 %v8839_v6, %v6960_v57  ;;  %v8883_v51 = vsub.f32 %v8843_v3, %v6960_v57 }
 0x7bb   : > { %v7262_v33 = vpop.eup %4508  ;;  %v2855_v55 = vadd.f32 %v7152_v44, %v2854_v15  ;;  %4528 = vpow2.f32 %v2747_v24  ;;  %v2763_v50 = vmul.f32 1.442695, %v8875_v39  ;;  %v8877_v24 = vsub.f32 %v8837_v20, %v6960_v57 }
 0x7bc   : > { %v7270_v54 = vpop.eup %4510  ;;  %4530 = vpow2.f32 %v2751_v60  ;;  %v2767_v37 = vmul.f32 1.442695, %v8876_v14  ;;  %v8878_v60 = vsub.f32 %v8838_v28, %v6960_v57  ;;  %v2779_v14 = vmul.f32 1.442695, %v8879_v46 }
 0x7bd   : > { %v4513_v41 = vpop.eup %4512  ;;  %v2856_v8 = vadd.f32 %v7157_v58, %v2855_v55  ;;  %4532 = vpow2.f32 %v2755_v0  ;;  %v2771_v15 = vmul.f32 1.442695, %v8877_v24  ;;  %v8881_v28 = vsub.f32 %v8841_v63, %v6960_v57 }
 0x7be   : > { %v4515_v39 = vpop.eup %4514  ;;  %4534 = vpow2.f32 %v2759_v29  ;;  %v2775_v43 = vmul.f32 1.442695, %v8878_v60  ;;  %v2783_v29 = vmul.f32 1.442695, %v8880_v62  ;;  %v2795_v62 = vmul.f32 1.442695, %v8883_v51 }
 0x7bf   : > { %v4517_v31 = vpop.eup %4516  ;;  %v2857_v55 = vadd.f32 %v7163_v25, %v2856_v8  ;;  %4536 = vpow2.f32 %v2763_v50  ;;  %v2878_v0 = vadd.f32 %v4515_v39, %v4513_v41  ;;  %v2922_v20 = vpack.c.bf16 %v4515_v39, %v4513_v41 }
 0x7c0   : > { %v4519_v24 = vpop.eup %4518  ;;  %4538 = vpow2.f32 %v2767_v37  ;;  %v2787_v60 = vmul.f32 1.442695, %v8881_v28  ;;  %v8882_v37 = vsub.f32 %v8842_v7, %v6960_v57  ;;  %v8884_v63 = vpack.c.bf16 %v7052_v10, %v7044_v9 }
 0x7c1   : > { %v4521_v58 = vpop.eup %4520  ;;  %v2858_v6 = vadd.f32 %v7168_v32, %v2857_v55  ;;  %4540 = vpow2.f32 %v2771_v15  ;;  %v2879_v46 = vadd.f32 %v4517_v31, %v2878_v0  ;;  %2953 = vmatprep.subr.bf16.mxu1 %v2922_v20  ;;  %v2924_v8 = vpack.c.bf16 %v4519_v24, %v4517_v31 }
 0x7c2   : > { %v4523_v50 = vpop.eup %4522  ;;  %4542 = vpow2.f32 %v2775_v43  ;;  %v2791_v41 = vmul.f32 1.442695, %v8882_v37  ;;  %2954 = vmatpush1.bf16.msra.mxu1 %v8884_v63  ;;  %v8885_v7 = vsub.f32 %v8844_v35, %v6960_v57  ;;  %v8886_v3 = vsub.f32 %v8845_v42, %v6960_v57  ;;  %v8891_v63 = vld [vmem:[#allocation39_spill] sm:$0xff] }
 0x7c3   : > { %v4525_v39 = vpop.eup %4524  ;;  %v2859_v15 = vadd.f32 %v7174_v56, %v2858_v6  ;;  %4544 = vpow2.f32 %v2779_v14  ;;  %v2880_v55 = vadd.f32 %v4519_v24, %v2879_v46  ;;  %2955 = vmatprep.subr.bf16.mxu1 %v2924_v8  ;;  %v2926_v31 = vpack.c.bf16 %v4523_v50, %v4521_v58 }
 0x7c4   : > { %v4527_v43 = vpop.eup %4526  ;;  %4546 = vpow2.f32 %v2783_v29  ;;  %v2799_v0 = vmul.f32 1.442695, %v8885_v7  ;;  %v2803_v20 = vmul.f32 1.442695, %v8886_v3  ;;  %v8887_v24 = vsub.f32 %v8846_v11, %v6960_v57 }
 0x7c5   : > { %v4529_v28 = vpop.eup %4528  ;;  %v2860_v9 = vadd.f32 %v7182_v52, %v2859_v15  ;;  %4548 = vpow2.f32 %v2787_v60  ;;  %v2881_v10 = vadd.f32 %v4521_v58, %v2880_v55  ;;  %v2928_v6 = vpack.c.bf16 %v4527_v43, %v4525_v39 }
 0x7c6   : > { %v4531_v14 = vpop.eup %4530  ;;  %4550 = vpow2.f32 %v2791_v41  ;;  %v2807_v29 = vmul.f32 1.442695, %v8887_v24  ;;  %v8888_v35 = vsub.f32 %v8847_v53, %v6960_v57  ;;  %v8889_v42 = vpack.c.bf16 %v7068_v45, %v7060_v17 }
 0x7c7   : > { %v4533_v8 = vpop.eup %4532  ;;  %v2861_v37 = vadd.f32 %v7191_v16, %v2860_v9  ;;  %4552 = vpow2.f32 %v2795_v62  ;;  %v2882_v58 = vadd.f32 %v4523_v50, %v2881_v10  ;;  %v2930_v60 = vpack.c.bf16 %v4531_v14, %v4529_v28 }
 0x7c8   : > { %v2811_v46 = vmul.f32 1.442695, %v8888_v35  ;;  %2956 = vmatpush1.bf16.msra.mxu1 %v8889_v42  ;;  %v4535_v41 = vpop.eup %4534  ;;  %4554 = vpow2.f32 %v2799_v0  ;;  %v8890_v11 = vsub.f32 %v8848_v5, %v6960_v57  ;;  %v8892_v53 = vsub.f32 %v8891_v63, %v6960_v57  ;;  %v8894_v0 = vld [vmem:[#allocation55_spill] sm:$0xff] }
 0x7c9   : > { %2957 = vmatprep.subr.bf16.mxu1 %v2926_v31  ;;  %v4537_v55 = vpop.eup %4536  ;;  %v2862_v17 = vadd.f32 %v7202_v23, %v2861_v37  ;;  %4556 = vpow2.f32 %v2803_v20  ;;  %v2883_v45 = vadd.f32 %v4525_v39, %v2882_v58  ;;  %v2932_v7 = vpack.c.bf16 %v4535_v41, %v4533_v8 }
 0x7ca   : > { %v2815_v51 = vmul.f32 1.442695, %v8890_v11  ;;  %v2819_v15 = vmul.f32 1.442695, %v8892_v53  ;;  %v4539_v62 = vpop.eup %4538  ;;  %4558 = vpow2.f32 %v2807_v29  ;;  %v8893_v50 = vsub.f32 %v8850_v26, %v6960_v57 }
 0x7cb   : > { %v8895_v5 = vsub.f32 %v8894_v0, %v6960_v57  ;;  %v8896_v9 = vpack.c.bf16 %v7083_v61, %v7076_v36  ;;  %v4541_v10 = vpop.eup %4540  ;;  %v2863_v24 = vadd.f32 %v7211_v48, %v2862_v17  ;;  %4560 = vpow2.f32 %v2811_v46 }
 0x7cc   : > { %v2823_v31 = vmul.f32 1.442695, %v8893_v50  ;;  %v2884_v39 = vadd.f32 %v4527_v43, %v2883_v45  ;;  %v2934_v20 = vpack.c.bf16 %v4539_v62, %v4537_v55  ;;  %v4543_v29 = vpop.eup %4542  ;;  %4562 = vpow2.f32 %v2815_v51  ;;  %v8899_v43 = vld [vmem:[#allocation20_spill] sm:$0xff] }
 0x7cd   : > { %v2827_v3 = vmul.f32 1.442695, %v8895_v5  ;;  %2958 = vmatpush1.bf16.msra.mxu1 %v8896_v9  ;;  %v8897_v26 = vsub.f32 %v8852_v27, %v6960_v57  ;;  %v8898_v42 = vsub.f32 %v8853_v12, %v6960_v57  ;;  %v4545_v58 = vpop.eup %4544  ;;  %v2864_v61 = vadd.f32 %v7219_v18, %v2863_v24 }
 0x7ce   : > { %2959 = vmatprep.subr.bf16.mxu1 %v2928_v6  ;;  %4564 = vpow2.f32 %v2819_v15  ;;  %v2885_v36 = vadd.f32 %v4529_v28, %v2884_v39  ;;  %v2936_v11 = vpack.c.bf16 %v4543_v29, %v4541_v10  ;;  %v4547_v46 = vpop.eup %4546  ;;  %v8900_v6 = vsub.f32 %v8899_v43, %v6960_v57 }
 0x7cf   : > { %v2831_v35 = vmul.f32 1.442695, %v8897_v26  ;;  %v2835_v37 = vmul.f32 1.442695, %v8898_v42  ;;  %4566 = vpow2.f32 %v2823_v31  ;;  %v8901_v27 = vpack.c.bf16 %v7098_v4, %v7091_v22  ;;  %v4549_v63 = vpop.eup %4548 }
 0x7d0   : > { %v2839_v51 = vmul.f32 1.442695, %v8900_v6  ;;  %v2865_v12 = vadd.f32 %v7226_v34, %v2864_v61  ;;  %4568 = vpow2.f32 %v2827_v3  ;;  %v2886_v53 = vadd.f32 %v4531_v14, %v2885_v36  ;;  %v4551_v15 = vpop.eup %4550 }
 0x7d1   : > { %2960 = vmatpush1.bf16.msra.mxu1 %v8901_v27  ;;  %v2938_v17 = vpack.c.bf16 %v4547_v46, %v4545_v58  ;;  %4570 = vpow2.f32 %v2831_v35  ;;  %v4553_v28 = vpop.eup %4552  ;;  %v2940_v57 = vpack.c.bf16 %v4551_v15, %v4549_v63  ;;  %v8902_v4 = vpack.c.bf16 %v7113_v21, %v7106_v47 }
 0x7d2   : > { %2961 = vmatprep.subr.bf16.mxu1 %v2930_v60  ;;  %v2866_v45 = vadd.f32 %v7234_v13, %v2865_v12  ;;  %4572 = vpow2.f32 %v2835_v37  ;;  %v2887_v50 = vadd.f32 %v4533_v8, %v2886_v53  ;;  %v4555_v31 = vpop.eup %4554  ;;  %v8903_v26 = vpack.c.bf16 %v7127_v2, %v7121_v59 }
 0x7d3   : > { %4574 = vpow2.f32 %v2839_v51  ;;  %v4557_v22 = vpop.eup %4556  ;;  %v2942_v60 = vpack.c.bf16 %v4555_v31, %v4553_v28  ;;  %v8905_v12 = vpack.c.bf16 %v7152_v44, %v7146_v38  ;;  %v8909_v38 = vpack.c.bf16 %v7191_v16, %v7182_v52 }
 0x7d4   : > { %v2867_v0 = vadd.f32 %v7241_v19, %v2866_v45  ;;  %v2888_v14 = vadd.f32 %v4535_v41, %v2887_v50  ;;  %v4559_v5 = vpop.eup %4558  ;;  %v8912_v52 = vpack.c.bf16 %v7241_v19, %v7234_v13  ;;  %v8919_v19 = vld [vmem:[#allocation56_spill] sm:$0xff] }
 0x7d5   : > { %2962 = vmatpush1.bf16.msra.mxu1 %v8902_v4  ;;  %v4561_v3 = vpop.eup %4560  ;;  %v2944_v39 = vpack.c.bf16 %v4559_v5, %v4557_v22  ;;  %v8918_v4 = vld [vmem:[#allocation57_spill] sm:$0xff] }
 0x7d6   : > { %2963 = vmatprep.subr.bf16.mxu1 %v2932_v7  ;;  %v2868_v9 = vadd.f32 %v7249_v49, %v2867_v0  ;;  %v2889_v24 = vadd.f32 %v4537_v55, %v2888_v14  ;;  %v4563_v8 = vpop.eup %4562  ;;  %v8904_v55 = vpack.c.bf16 %v7140_v1, %v7133_v30  ;;  %v8906_v30 = vld [vmem:[#allocation27_spill] sm:$0xff]  ;;  %v8920_v13 = vpack.c.bf16 %v8918_v4, %v8919_v19 }
 0x7d7   : > { %v2946_v42 = vpack.c.bf16 %v4563_v8, %v4561_v3  ;;  %v8907_v1 = vpack.c.bf16 %v7163_v25, %v8906_v30  ;;  %v8910_v25 = vpack.c.bf16 %v7211_v48, %v7202_v23  ;;  %v8913_v23 = vpack.c.bf16 %v7257_v40, %v7249_v49  ;;  %v8922_v0 = vld [vmem:[#allocation43_spill] sm:$0xff]  ;;  %v8925_v49 = vld [vmem:[#allocation28_spill] sm:$0xff] }
 0x7d8   : > { %v4565_v35 = vpop.eup %4564  ;;  %v2869_v21 = vadd.f32 %v7257_v40, %v2868_v9  ;;  %v2890_v47 = vadd.f32 %v4539_v62, %v2889_v24  ;;  %v8924_v40 = vld [vmem:[#allocation30_spill] sm:$0xff]  ;;  %v8931_v9 = vld [vmem:[#allocation32_spill] sm:$0xff] }
 0x7d9   : > { %2964 = vmatpush1.bf16.msra.mxu1 %v8903_v26  ;;  %v4567_v41 = vpop.eup %4566 }
 0x7da   : > { %2965 = vmatprep.subr.bf16.mxu1 %v2934_v20  ;;  %v4569_v7 = vpop.eup %4568  ;;  %v2870_v37 = vadd.f32 %v7262_v33, %v2869_v21  ;;  %v2891_v61 = vadd.f32 %v4541_v10, %v2890_v47  ;;  %v2948_v36 = vpack.c.bf16 %v4567_v41, %v4565_v35  ;;  %v3038_v21 = vpop.trf.xlu0 }
 0x7db   : > { %v4571_v43 = vpop.eup %4570 }
 0x7dc   : > { %v4573_v6 = vpop.eup %4572  ;;  %v7368_v2 = vadd.f32 %v7270_v54, %v2870_v37  ;;  %v2892_v59 = vadd.f32 %v4543_v29, %v2891_v61  ;;  %v2950_v62 = vpack.c.bf16 %v4571_v43, %v4569_v7  ;;  %v8908_v29 = vpack.c.bf16 %v7174_v56, %v7168_v32 }
 0x7dd   : > { %2966 = vmatpush1.bf16.msra.mxu1 %v8904_v55  ;;  %v4575_v20 = vpop.eup %4574  ;;  %v8911_v32 = vpack.c.bf16 %v7226_v34, %v7219_v18  ;;  %v8914_v18 = vpack.c.bf16 %v7270_v54, %v7262_v33  ;;  %v8915_v34 = vld [vmem:[#allocation31_spill] sm:$0xff]  ;;  %v8930_v54 = vld [vmem:[#allocation34_spill] sm:$0xff] }
 0x7de   : > { %2967 = vmatprep.subr.bf16.mxu1 %v2936_v11  ;;  %v2893_v51 = vadd.f32 %v4545_v58, %v2892_v59  ;;  %v2952_v27 = vpack.c.bf16 %v4575_v20, %v4573_v6  ;;  %v8932_v24 = vpack.c.bf16 %v8930_v54, %v8931_v9  ;;  %v3039_v47 = vpop.trf.xlu0 }
 0x7e0   : > { %v2894_v10 = vadd.f32 %v4547_v46, %v2893_v51 }
 0x7e1   : > { %2968 = vmatpush1.bf16.msra.mxu1 %v8905_v12  ;;  %v2872_v12 = vrot.slane %v7368_v2, 4 }
 0x7e2   : > { %2969 = vmatprep.subr.bf16.mxu1 %v2938_v17  ;;  %v2895_v53 = vadd.f32 %v4549_v63, %v2894_v10 }
 0x7e4   : > { %v2896_v45 = vadd.f32 %v4551_v15, %v2895_v53  ;;  %v2873_v53 = vadd.f32 %v2872_v12, %v7368_v2 }
 0x7e5   : > { %2970 = vmatpush1.bf16.msra.mxu1 %v8907_v1 }
 0x7e6   : > { %2971 = vmatprep.subr.bf16.mxu1 %v2940_v57  ;;  %v2897_v50 = vadd.f32 %v4553_v28, %v2896_v45  ;;  %v8916_v57 = vld [vmem:[#allocation29_spill] sm:$0xff]  ;;  %v2874_v1 = vrot.slane %v2873_v53, 2 }
 0x7e8   : > { %v2898_v58 = vadd.f32 %v4555_v31, %v2897_v50  ;;  %v8917_v31 = vpack.c.bf16 %v8915_v34, %v8916_v57  ;;  %v2875_v50 = vadd.f32 %v2874_v1, %v2873_v53 }
 0x7e9   : > { %2972 = vmatpush1.bf16.msra.mxu1 %v8908_v29 }
 0x7ea   : > { %2973 = vmatprep.subr.bf16.mxu1 %v2942_v60  ;;  %v2899_v11 = vadd.f32 %v4557_v22, %v2898_v58  ;;  %v8921_v22 = vld [vmem:[#allocation45_spill] sm:$0xff]  ;;  %v8926_v60 = vpack.c.bf16 %v8924_v40, %v8925_v49  ;;  %v2876_v58 = vrot.slane %v2875_v50, 1 }
 0x7eb   : > { %v8923_v14 = vpack.c.bf16 %v8921_v22, %v8922_v0 }
 0x7ec   : > { %v2900_v44 = vadd.f32 %v4559_v5, %v2899_v11  ;;  %v8927_v5 = vld [vmem:[#allocation35_spill] sm:$0xff] }
 0x7ed   : > { %2974 = vmatpush1.bf16.msra.mxu1 %v8909_v38  ;;  %v2877_v38 = vadd.f32 %v2876_v58, %v2875_v50 }
 0x7ee   : > { %2975 = vmatprep.subr.bf16.mxu1 %v2944_v39  ;;  %v2901_v46 = vadd.f32 %v4561_v3, %v2900_v44  ;;  %v8928_v3 = vld [vmem:[#allocation33_spill] sm:$0xff]  ;;  %v8933_v39 = vld [vmem:[#allocation44_spill] sm:$0xff] }
 0x7ef   : > { %v8929_v33 = vpack.c.bf16 %v8927_v5, %v8928_v3  ;;  %4576 = vrcp.f32 %v2877_v38 }
 0x7f0   : > { %v2902_v63 = vadd.f32 %v4563_v8, %v2901_v46  ;;  %v8934_v8 = vld [vmem:[#allocation41_spill] sm:$0xff] }
 0x7f1   : > { %2976 = vmatpush1.bf16.msra.mxu1 %v8910_v25  ;;  %v8935_v26 = vpack.c.bf16 %v8933_v39, %v8934_v8 }
 0x7f2   : > { %2977 = vmatprep.subr.bf16.mxu1 %v2946_v42  ;;  %v2903_v17 = vadd.f32 %v4565_v35, %v2902_v63  ;;  %v8936_v35 = vmov 0   ;;  %v3040_v42 = vpop.trf.xlu0 }
 0x7f4   : > { %v2904_v56 = vadd.f32 %v4567_v41, %v2903_v17 }
 0x7f5   : > { %2978 = vmatpush1.bf16.msra.mxu1 %v8911_v32 }
 0x7f6   : > { %2979 = vmatprep.subr.bf16.mxu1 %v2948_v36  ;;  %v2905_v15 = vadd.f32 %v4569_v7, %v2904_v56  ;;  %v3041_v41 = vpop.trf.xlu0 }
 0x7f8   : > { %v2906_v16 = vadd.f32 %v4571_v43, %v2905_v15  ;;  %v3054_v43 = vpop.trf.xlu1 }
 0x7f9   : > { %2980 = vmatpush1.bf16.msra.mxu1 %v8912_v52  ;;  %v4577_v46 = vpop.eup %4576 }
 0x7fa   : > { %2981 = vmatprep.subr.bf16.mxu1 %v2950_v62  ;;  %v2907_v28 = vadd.f32 %v4573_v6, %v2906_v16  ;;  %v3042_v7 = vpop.trf.xlu0 }
 0x7fc   : > { %v2908_v48 = vadd.f32 %v4575_v20, %v2907_v28  ;;  %v3055_v55 = vpop.trf.xlu1 }
 0x7fd   : > { %2982 = vmatpush1.bf16.msra.mxu1 %v8913_v23 }
 0x7fe   : > { %2983 = vmatprep.subr.bf16.mxu1 %v2952_v27  ;;  %v3043_v37 = vpop.trf.xlu0  ;;  %v2909_v10 = vrot.slane %v2908_v48, 4 }
 0x800   : > { %v3056_v6 = vpop.trf.xlu1  ;;  %v2910_v30 = vadd.f32 %v2909_v10, %v2908_v48 }
 0x801   : > { %2984 = vmatpush1.bf16.msra.mxu1 %v8914_v18 }
 0x802   : > { %3110 = vmatprep.subr.bf16.mxu1 %v8917_v31  ;;  %v3044_v61 = vpop.trf.xlu0  ;;  %v2911_v45 = vrot.slane %v2910_v30, 2 }
 0x804   : > { %2986 = vmatmul.mubr.bf16.vlgmr.msra.gmra.mrb[136].mxu1 %v8920_v13  ;;  %v3057_v59 = vpop.trf.xlu1  ;;  %v2912_v29 = vadd.f32 %v2911_v45, %v2910_v30 }
 0x805   : > { %2995 = vmatprep.mubr.bf16.mxu1 %v8923_v14  ;;  %3111 = vmatpush1.bf16.msra.mxu1 %v8926_v60 }
 0x806   : > { %3112 = vmatprep.subr.bf16.mxu1 %v8929_v33  ;;  %v3045_v36 = vpop.trf.xlu0  ;;  %v2913_v11 = vrot.slane %v2912_v29, 1 }
 0x808   : > { %v3058_v62 = vpop.trf.xlu1  ;;  %v2914_v44 = vadd.f32 %v2913_v11, %v2912_v29 }
 0x809   : > { %3113 = vmatpush1.bf16.msra.mxu1 %v8932_v24 }
 0x80a   : > { %4578 = vrcp.f32 %v2914_v44 }
 0x80c   : > { %2996 = vmatmul.mubr.bf16.gmra.mrb[140].mxu1 %v8935_v26  ;;  %v3059_v20 = vpop.trf.xlu1 }
 0x80d   : > { %3142 = vmatprep.mubr.bf16.mxu1 %v8936_v35 }
 0x810   : > { %v3060_v51 = vpop.trf.xlu1 }
 0x814   : > { %4067 = vmatmul.mubr.msk.bf16.vlgmr.msra.gmra.mrb[144].mxu1 %vm877_vm2, %v3038_v21  ;;  %v3061_v27 = vpop.trf.xlu1  ;;  %v4579_v63 = vpop.eup %4578 }
 0x815   : > { %3152 = vmatprep.mubr.bf16.mxu1 %v8936_v35 }
 0x81c   : > { %4068 = vmatmul.mubr.msk.bf16.gmra.mrb[148].mxu1 %vm877_vm2, %v3039_v47 }
 0x81d   : > { %3162 = vmatprep.mubr.bf16.mxu1 %v8936_v35 }
 0x824   : > { %4069 = vmatmul.mubr.msk.bf16.gmra.mrb[152].mxu1 %vm877_vm2, %v3040_v42 }
 0x825   : > { %3172 = vmatprep.mubr.bf16.mxu1 %v8936_v35 }
 0x82c   : > { %4070 = vmatmul.mubr.msk.bf16.gmra.mrb[156].mxu1 %vm877_vm2, %v3041_v41 }
 0x82d   : > { %3182 = vmatprep.mubr.bf16.mxu1 %v8936_v35 }
 0x834   : > { %4071 = vmatmul.mubr.msk.bf16.gmra.mrb[160].mxu1 %vm877_vm2, %v3042_v7 }
 0x835   : > { %3192 = vmatprep.mubr.bf16.mxu1 %v8936_v35 }
 0x83c   : > { %4072 = vmatmul.mubr.msk.bf16.gmra.mrb[164].mxu1 %vm877_vm2, %v3043_v37 }
 0x83d   : > { %3202 = vmatprep.mubr.bf16.mxu1 %v8936_v35 }
 0x844   : > { %4073 = vmatmul.mubr.msk.bf16.gmra.mrb[168].mxu1 %vm877_vm2, %v3044_v61 }
 0x845   : > { %3212 = vmatprep.mubr.bf16.mxu1 %v8936_v35 }
 0x84c   : > { %4074 = vmatmul.mubr.msk.bf16.gmra.mrb[172].mxu1 %vm877_vm2, %v3045_v36 }
 0x84d   : > { %3222 = vmatprep.mubr.bf16.mxu1 %v8936_v35 }
 0x854   : > { %4075 = vmatmul.mubr.msk.bf16.gmra.mrb[176].mxu1 %vm877_vm2, %v3054_v43 }
 0x855   : > { %3232 = vmatprep.mubr.bf16.mxu1 %v8936_v35 }
 0x85c   : > { %4076 = vmatmul.mubr.msk.bf16.gmra.mrb[180].mxu1 %vm877_vm2, %v3055_v55 }
 0x85d   : > { %3242 = vmatprep.mubr.bf16.mxu1 %v8936_v35 }
 0x864   : > { %4077 = vmatmul.mubr.msk.bf16.gmra.mrb[184].mxu1 %vm877_vm2, %v3056_v6 }
 0x865   : > { %3252 = vmatprep.mubr.bf16.mxu1 %v8936_v35 }
 0x86c   : > { %4078 = vmatmul.mubr.msk.bf16.gmra.mrb[188].mxu1 %vm877_vm2, %v3057_v59 }
 0x86d   : > { %3262 = vmatprep.mubr.bf16.mxu1 %v8936_v35 }
 0x874   : > { %4079 = vmatmul.mubr.msk.bf16.gmra.mrb[192].mxu1 %vm877_vm2, %v3058_v62 }
 0x875   : > { %3272 = vmatprep.mubr.bf16.mxu1 %v8936_v35 }
 0x87c   : > { %4080 = vmatmul.mubr.msk.bf16.gmra.mrb[196].mxu1 %vm877_vm2, %v3059_v20 }
 0x87d   : > { %3282 = vmatprep.mubr.bf16.mxu1 %v8936_v35 }
 0x884   : > { %4081 = vmatmul.mubr.msk.bf16.gmra.mrb[200].mxu1 %vm877_vm2, %v3060_v51 }
 0x885   : > { %3292 = vmatprep.mubr.bf16.mxu1 %v8936_v35 }
 0x88c   : > { %4082 = vmatmul.mubr.msk.bf16.gmra.mrb[204].mxu1 %vm877_vm2, %v3061_v27 }
 0x8d7   : > { %v2987_v25 = vpop.f32.mrb[136].mxu1 }
 0x8d8   : > { %v7452_v17 = vmul.f32 %v4577_v46, %v2987_v25  ;;  %v2989_v32 = vpop.f32.mrb[137].mxu1 }
 0x8d9   : > { %v7454_v56 = vmul.f32 %v4579_v63, %v2989_v32  ;;  %v2991_v2 = vpop.f32.mrb[138].mxu1 }
 0x8da   : > { %8937 = vst [vmem:[#allocation25_spill] sm:$0xff] %v7452_v17  ;;  %v7456_v15 = vmul.f32 %v4577_v46, %v2991_v2  ;;  %v2993_v52 = vpop.f32.mrb[139].mxu1 }
 0x8db   : > { %8938 = vst [vmem:[#allocation26_spill] sm:$0xff] %v7454_v56  ;;  %v7458_v16 = vmul.f32 %v4579_v63, %v2993_v52 }
 0x8dc   : > { %8939 = vst [vmem:[#allocation24_spill] sm:$0xff] %v7456_v15 }
 0x8dd   : > { %8940 = vst [vmem:[#allocation52_spill] sm:$0xff] %v7458_v16 }
 0x8df   : > { %v2997_v48 = vpop.f32.mrb[140].mxu1 }
 0x8e0   : > { %v7464_v18 = vmul.f32 %v4577_v46, %v2997_v48  ;;  %v2999_v34 = vpop.f32.mrb[141].mxu1 }
 0x8e1   : > { %v7466_v57 = vmul.f32 %v4579_v63, %v2999_v34  ;;  %v3001_v31 = vpop.f32.mrb[142].mxu1 }
 0x8e2   : > { %8941 = vst [vmem:[#allocation40_spill] sm:$0xff] %v7464_v18  ;;  %v7468_v4 = vmul.f32 %v4577_v46, %v3001_v31  ;;  %v3003_v19 = vpop.f32.mrb[143].mxu1 }
 0x8e3   : > { %8942 = vst [vmem:[#allocation49_spill] sm:$0xff] %v7466_v57  ;;  %v7470_v13 = vmul.f32 %v4579_v63, %v3003_v19 }
 0x8e4   : > { %8943 = vst [vmem:[#allocation47_spill] sm:$0xff] %v7468_v4 }
 0x8e5   : > { %8944 = vst [vmem:[#allocation65_spill] sm:$0xff] %v7470_v13 }
 0x8e7   : > { %v7476_v14 = vpop.f32.mrb[144].mxu1 }
 0x8e8   : > { %v7478_v40 = vpop.f32.mrb[145].mxu1 }
 0x8e9   : > { %v7480_v49 = vpop.f32.mrb[146].mxu1 }
 0x8ea   : > { %v7482_v60 = vpop.f32.mrb[147].mxu1 }
 0x8ef   : > { %v7484_v5 = vpop.f32.mrb[148].mxu1 }
 0x8f0   : > { %v3303_v3 = vmax.f32 %v7476_v14, %v7484_v5  ;;  %v7488_v33 = vpop.f32.mrb[149].mxu1 }
 0x8f1   : > { %v3340_v54 = vmax.f32 %v7478_v40, %v7488_v33  ;;  %v7492_v9 = vpop.f32.mrb[150].mxu1 }
 0x8f2   : > { %v3304_v24 = vmax.f32 %v7480_v49, %v7492_v9  ;;  %v7496_v39 = vpop.f32.mrb[151].mxu1 }
 0x8f3   : > { %v3341_v8 = vmax.f32 %v7482_v60, %v7496_v39 }
 0x8f7   : > { %v7500_v26 = vpop.f32.mrb[152].mxu1 }
 0x8f8   : > { %v3305_v35 = vmax.f32 %v3303_v3, %v7500_v26  ;;  %v7503_v21 = vpop.f32.mrb[153].mxu1 }
 0x8f9   : > { %v3342_v47 = vmax.f32 %v3340_v54, %v7503_v21  ;;  %v7506_v42 = vpop.f32.mrb[154].mxu1 }
 0x8fa   : > { %v3306_v41 = vmax.f32 %v3304_v24, %v7506_v42  ;;  %v7509_v7 = vpop.f32.mrb[155].mxu1 }
 0x8fb   : > { %v3343_v37 = vmax.f32 %v3341_v8, %v7509_v7 }
 0x8ff   : > { %v7512_v61 = vpop.f32.mrb[156].mxu1 }
 0x900   : > { %v3307_v36 = vmax.f32 %v3305_v35, %v7512_v61  ;;  %v7515_v43 = vpop.f32.mrb[157].mxu1 }
 0x901   : > { %v3344_v55 = vmax.f32 %v3342_v47, %v7515_v43  ;;  %v7518_v6 = vpop.f32.mrb[158].mxu1 }
 0x902   : > { %v3308_v59 = vmax.f32 %v3306_v41, %v7518_v6  ;;  %v7521_v62 = vpop.f32.mrb[159].mxu1 }
 0x903   : > { %v3345_v20 = vmax.f32 %v3343_v37, %v7521_v62 }
 0x907   : > { %v7524_v51 = vpop.f32.mrb[160].mxu1 }
 0x908   : > { %v3309_v27 = vmax.f32 %v3307_v36, %v7524_v51  ;;  %v7527_v12 = vpop.f32.mrb[161].mxu1 }
 0x909   : > { %v3346_v10 = vmax.f32 %v3344_v55, %v7527_v12  ;;  %v7530_v53 = vpop.f32.mrb[162].mxu1 }
 0x90a   : > { %v3310_v30 = vmax.f32 %v3308_v59, %v7530_v53  ;;  %v7533_v1 = vpop.f32.mrb[163].mxu1 }
 0x90b   : > { %v3347_v45 = vmax.f32 %v3345_v20, %v7533_v1 }
 0x90f   : > { %v7536_v50 = vpop.f32.mrb[164].mxu1 }
 0x910   : > { %v3311_v29 = vmax.f32 %v3309_v27, %v7536_v50  ;;  %v7539_v58 = vpop.f32.mrb[165].mxu1 }
 0x911   : > { %v3348_v11 = vmax.f32 %v3346_v10, %v7539_v58  ;;  %v7542_v38 = vpop.f32.mrb[166].mxu1 }
 0x912   : > { %v3312_v44 = vmax.f32 %v3310_v30, %v7542_v38  ;;  %v7545_v46 = vpop.f32.mrb[167].mxu1 }
 0x913   : > { %8945 = vst [vmem:[#allocation66_spill] sm:$0xff] %v7545_v46  ;;  %v3349_v25 = vmax.f32 %v3347_v45, %v7545_v46 }
 0x917   : > { %v7548_v63 = vpop.f32.mrb[168].mxu1 }
 0x918   : > { %v3313_v32 = vmax.f32 %v3311_v29, %v7548_v63  ;;  %v7551_v2 = vpop.f32.mrb[169].mxu1 }
 0x919   : > { %8946 = vst [vmem:[#allocation67_spill] sm:$0xff] %v7551_v2  ;;  %v3350_v52 = vmax.f32 %v3348_v11, %v7551_v2  ;;  %v7554_v48 = vpop.f32.mrb[170].mxu1 }
 0x91a   : > { %v3314_v34 = vmax.f32 %v3312_v44, %v7554_v48  ;;  %v7557_v31 = vpop.f32.mrb[171].mxu1 }
 0x91b   : > { %8947 = vst [vmem:[#allocation68_spill] sm:$0xff] %v7557_v31  ;;  %v3351_v19 = vmax.f32 %v3349_v25, %v7557_v31 }
 0x91f   : > { %v7560_v3 = vpop.f32.mrb[172].mxu1 }
 0x920   : > { %v3315_v54 = vmax.f32 %v3313_v32, %v7560_v3  ;;  %v7563_v24 = vpop.f32.mrb[173].mxu1 }
 0x921   : > { %8948 = vst [vmem:[#allocation69_spill] sm:$0xff] %v7563_v24  ;;  %v3352_v8 = vmax.f32 %v3350_v52, %v7563_v24  ;;  %v7566_v35 = vpop.f32.mrb[174].mxu1 }
 0x922   : > { %v3316_v47 = vmax.f32 %v3314_v34, %v7566_v35  ;;  %v7569_v41 = vpop.f32.mrb[175].mxu1 }
 0x923   : > { %8949 = vst [vmem:[#allocation70_spill] sm:$0xff] %v7569_v41  ;;  %v3353_v37 = vmax.f32 %v3351_v19, %v7569_v41 }
 0x927   : > { %v7572_v36 = vpop.f32.mrb[176].mxu1 }
 0x928   : > { %v3317_v55 = vmax.f32 %v3315_v54, %v7572_v36  ;;  %v7575_v59 = vpop.f32.mrb[177].mxu1 }
 0x929   : > { %8950 = vst [vmem:[#allocation72_spill] sm:$0xff] %v7575_v59  ;;  %v3354_v20 = vmax.f32 %v3352_v8, %v7575_v59  ;;  %v7578_v27 = vpop.f32.mrb[178].mxu1 }
 0x92a   : > { %v3318_v10 = vmax.f32 %v3316_v47, %v7578_v27  ;;  %v7581_v30 = vpop.f32.mrb[179].mxu1 }
 0x92b   : > { %8951 = vst [vmem:[#allocation74_spill] sm:$0xff] %v7581_v30  ;;  %v3355_v45 = vmax.f32 %v3353_v37, %v7581_v30 }
 0x92f   : > { %v7584_v29 = vpop.f32.mrb[180].mxu1 }
 0x930   : > { %v3319_v11 = vmax.f32 %v3317_v55, %v7584_v29  ;;  %v7587_v44 = vpop.f32.mrb[181].mxu1 }
 0x931   : > { %8952 = vst [vmem:[#allocation75_spill] sm:$0xff] %v7587_v44  ;;  %v3356_v25 = vmax.f32 %v3354_v20, %v7587_v44  ;;  %v7590_v32 = vpop.f32.mrb[182].mxu1 }
 0x932   : > { %v3320_v52 = vmax.f32 %v3318_v10, %v7590_v32  ;;  %v7593_v34 = vpop.f32.mrb[183].mxu1 }
 0x933   : > { %8953 = vst [vmem:[#allocation71_spill] sm:$0xff] %v7593_v34  ;;  %v3357_v19 = vmax.f32 %v3355_v45, %v7593_v34 }
 0x937   : > { %v7596_v54 = vpop.f32.mrb[184].mxu1 }
 0x938   : > { %v3321_v8 = vmax.f32 %v3319_v11, %v7596_v54  ;;  %v7599_v47 = vpop.f32.mrb[185].mxu1 }
 0x939   : > { %8954 = vst [vmem:[#allocation73_spill] sm:$0xff] %v7599_v47  ;;  %v3358_v37 = vmax.f32 %v3356_v25, %v7599_v47  ;;  %v7602_v55 = vpop.f32.mrb[186].mxu1 }
 0x93a   : > { %v3322_v20 = vmax.f32 %v3320_v52, %v7602_v55  ;;  %v7605_v22 = vpop.f32.mrb[187].mxu1 }
 0x93b   : > { %8955 = vst [vmem:[#allocation76_spill] sm:$0xff] %v7605_v22  ;;  %v3359_v10 = vmax.f32 %v3357_v19, %v7605_v22 }
 0x93f   : > { %v7608_v0 = vpop.f32.mrb[188].mxu1 }
 0x940   : > { %v3323_v45 = vmax.f32 %v3321_v8, %v7608_v0  ;;  %v7611_v28 = vpop.f32.mrb[189].mxu1 }
 0x941   : > { %8956 = vst [vmem:[#allocation19_spill] sm:$0xff] %v7611_v28  ;;  %v3360_v11 = vmax.f32 %v3358_v37, %v7611_v28  ;;  %v7614_v23 = vpop.f32.mrb[190].mxu1 }
 0x942   : > { %v3324_v25 = vmax.f32 %v3322_v20, %v7614_v23  ;;  %v7617_v18 = vpop.f32.mrb[191].mxu1 }
 0x943   : > { %8957 = vst [vmem:[#allocation23_spill] sm:$0xff] %v7617_v18  ;;  %v3361_v52 = vmax.f32 %v3359_v10, %v7617_v18 }
 0x947   : > { %v7620_v4 = vpop.f32.mrb[192].mxu1 }
 0x948   : > { %v3325_v19 = vmax.f32 %v3323_v45, %v7620_v4  ;;  %v7623_v57 = vpop.f32.mrb[193].mxu1 }
 0x949   : > { %8958 = vst [vmem:[#allocation21_spill] sm:$0xff] %v7623_v57  ;;  %v3362_v8 = vmax.f32 %v3360_v11, %v7623_v57  ;;  %v7626_v13 = vpop.f32.mrb[194].mxu1 }
 0x94a   : > { %v3326_v37 = vmax.f32 %v3324_v25, %v7626_v13  ;;  %v7629_v17 = vpop.f32.mrb[195].mxu1 }
 0x94b   : > { %8959 = vst [vmem:[#allocation38_spill] sm:$0xff] %v7629_v17  ;;  %v3363_v20 = vmax.f32 %v3361_v52, %v7629_v17 }
 0x94f   : > { %v7632_v15 = vpop.f32.mrb[196].mxu1 }
 0x950   : > { %v3327_v10 = vmax.f32 %v3325_v19, %v7632_v15  ;;  %v7635_v56 = vpop.f32.mrb[197].mxu1 }
 0x951   : > { %8960 = vst [vmem:[#allocation42_spill] sm:$0xff] %v7635_v56  ;;  %v3364_v45 = vmax.f32 %v3362_v8, %v7635_v56  ;;  %v7638_v16 = vpop.f32.mrb[198].mxu1 }
 0x952   : > { %v3328_v11 = vmax.f32 %v3326_v37, %v7638_v16  ;;  %v7641_v57 = vpop.f32.mrb[199].mxu1 }
 0x953   : > { %8961 = vst [vmem:[#allocation22_spill] sm:$0xff] %v7641_v57  ;;  %v3365_v25 = vmax.f32 %v3363_v20, %v7641_v57 }
 0x957   : > { %v7644_v18 = vpop.f32.mrb[200].mxu1 }
 0x958   : > { %v3329_v52 = vmax.f32 %v3327_v10, %v7644_v18  ;;  %v7647_v17 = vpop.f32.mrb[201].mxu1 }
 0x959   : > { %8962 = vst [vmem:[#allocation39_spill] sm:$0xff] %v7647_v17  ;;  %v3366_v19 = vmax.f32 %v3364_v45, %v7647_v17  ;;  %v7650_v28 = vpop.f32.mrb[202].mxu1 }
 0x95a   : > { %v3330_v8 = vmax.f32 %v3328_v11, %v7650_v28  ;;  %v7653_v56 = vpop.f32.mrb[203].mxu1 }
 0x95b   : > { %8963 = vst [vmem:[#allocation55_spill] sm:$0xff] %v7653_v56  ;;  %v3367_v37 = vmax.f32 %v3365_v25, %v7653_v56 }
 0x95f   : > { %v7656_v22 = vpop.f32.mrb[204].mxu1 }
 0x960   : > { %v3331_v20 = vmax.f32 %v3329_v52, %v7656_v22  ;;  %v7659_v57 = vpop.f32.mrb[205].mxu1 }
 0x961   : > { %8964 = vst [vmem:[#allocation20_spill] sm:$0xff] %v7659_v57  ;;  %v3368_v10 = vmax.f32 %v3366_v19, %v7659_v57  ;;  %v7662_v47 = vpop.f32.mrb[206].mxu1 }
 0x962   : > { %v3332_v45 = vmax.f32 %v3330_v8, %v7662_v47  ;;  %v7665_v17 = vpop.f32.mrb[207].mxu1 }
 0x963   : > { %8965 = vst [vmem:[#allocation27_spill] sm:$0xff] %v7665_v17  ;;  %v3369_v11 = vmax.f32 %v3367_v37, %v7665_v17 }
 0x964   : > { %v3333_v34 = vmax.f32 %v3331_v20, %v3332_v45 }
 0x965   : > { %v3370_v44 = vmax.f32 %v3368_v10, %v3369_v11 }
 0x966   : > { %v3334_v30 = vrot.slane %v3333_v34, 4 }
 0x967   : > { %v3371_v25 = vrot.slane %v3370_v44, 4 }
 0x968   : > { %v3335_v56 = vmax.f32 %v3333_v34, %v3334_v30 }
 0x969   : > { %v3372_v59 = vmax.f32 %v3370_v44, %v3371_v25 }
 0x96a   : > { %v3336_v41 = vrot.slane %v3335_v56, 2 }
 0x96b   : > { %v3373_v52 = vrot.slane %v3372_v59, 2 }
 0x96c   : > { %v3337_v24 = vmax.f32 %v3335_v56, %v3336_v41  ;;  %v8985_v41 = vld [vmem:[#allocation20_spill] sm:$0xff] }
 0x96d   : > { %v3374_v31 = vmax.f32 %v3372_v59, %v3373_v52 }
 0x96e   : > { %v3338_v2 = vrot.slane %v3337_v24, 1 }
 0x96f   : > { %v3375_v19 = vrot.slane %v3374_v31, 1 }
 0x970   : > { %v7668_v57 = vmax.f32 %v3337_v24, %v3338_v2 }
 0x971   : > { %v7670_v46 = vmax.f32 %v3374_v31, %v3375_v19 }
 0x972   : > { %v3377_v8 = vsub.f32 %v7476_v14, %v7668_v57  ;;  %v3379_v37 = vsub.f32 %v7480_v49, %v7668_v57  ;;  %v3381_v30 = vsub.f32 %v7484_v5, %v7668_v57  ;;  %v3383_v44 = vsub.f32 %v7492_v9, %v7668_v57 }
 0x973   : > { %v3385_v56 = vsub.f32 %v7500_v26, %v7668_v57  ;;  %v3387_v2 = vsub.f32 %v7506_v42, %v7668_v57  ;;  %v3389_v31 = vsub.f32 %v7512_v61, %v7668_v57  ;;  %v3391_v14 = vsub.f32 %v7518_v6, %v7668_v57 }
 0x974   : > { %v3393_v49 = vsub.f32 %v7524_v51, %v7668_v57  ;;  %v3395_v5 = vsub.f32 %v7530_v53, %v7668_v57  ;;  %v3397_v9 = vsub.f32 %v7536_v50, %v7668_v57  ;;  %v3399_v26 = vsub.f32 %v7542_v38, %v7668_v57 }
 0x975   : > { %v3401_v42 = vsub.f32 %v7548_v63, %v7668_v57  ;;  %v3403_v61 = vsub.f32 %v7554_v48, %v7668_v57  ;;  %v3405_v6 = vsub.f32 %v7560_v3, %v7668_v57  ;;  %v3407_v51 = vsub.f32 %v7566_v35, %v7668_v57 }
 0x976   : > { %v3409_v53 = vsub.f32 %v7572_v36, %v7668_v57  ;;  %v3411_v50 = vsub.f32 %v7578_v27, %v7668_v57  ;;  %v3413_v38 = vsub.f32 %v7584_v29, %v7668_v57  ;;  %v3415_v63 = vsub.f32 %v7590_v32, %v7668_v57 }
 0x977   : > { %v3417_v48 = vsub.f32 %v7596_v54, %v7668_v57  ;;  %v3419_v3 = vsub.f32 %v7602_v55, %v7668_v57  ;;  %v3421_v24 = vsub.f32 %v7608_v0, %v7668_v57  ;;  %v3423_v35 = vsub.f32 %v7614_v23, %v7668_v57 }
 0x978   : > { %v3441_v34 = vmul.f32 1.442695, %v3377_v8  ;;  %v3445_v54 = vmul.f32 1.442695, %v3379_v37  ;;  %v3449_v55 = vmul.f32 1.442695, %v3381_v30 }
 0x979   : > { %v3453_v10 = vmul.f32 1.442695, %v3383_v44  ;;  %v3457_v11 = vmul.f32 1.442695, %v3385_v56  ;;  %v3461_v25 = vmul.f32 1.442695, %v3387_v2 }
 0x97a   : > { %4580 = vpow2.f32 %v3441_v34  ;;  %v3465_v52 = vmul.f32 1.442695, %v3389_v31  ;;  %v3469_v19 = vmul.f32 1.442695, %v3391_v14  ;;  %v3473_v23 = vmul.f32 1.442695, %v3393_v49 }
 0x97b   : > { %4582 = vpow2.f32 %v3445_v54  ;;  %v3477_v32 = vmul.f32 1.442695, %v3395_v5  ;;  %v3481_v8 = vmul.f32 1.442695, %v3397_v9  ;;  %v3485_v37 = vmul.f32 1.442695, %v3399_v26 }
 0x97c   : > { %4584 = vpow2.f32 %v3449_v55  ;;  %v3489_v30 = vmul.f32 1.442695, %v3401_v42  ;;  %v3493_v20 = vmul.f32 1.442695, %v3403_v61  ;;  %v3497_v44 = vmul.f32 1.442695, %v3405_v6 }
 0x97d   : > { %4586 = vpow2.f32 %v3453_v10  ;;  %v3501_v0 = vmul.f32 1.442695, %v3407_v51  ;;  %v3505_v45 = vmul.f32 1.442695, %v3409_v53  ;;  %v3509_v34 = vmul.f32 1.442695, %v3411_v50 }
 0x97e   : > { %4588 = vpow2.f32 %v3457_v11  ;;  %v3513_v56 = vmul.f32 1.442695, %v3413_v38  ;;  %v3517_v2 = vmul.f32 1.442695, %v3415_v63  ;;  %v3521_v54 = vmul.f32 1.442695, %v3417_v48 }
 0x97f   : > { %4590 = vpow2.f32 %v3461_v25  ;;  %v7740_v31 = vmul.f32 1.442695, %v3419_v3  ;;  %v7742_v14 = vmul.f32 1.442695, %v3421_v24  ;;  %v7744_v49 = vmul.f32 1.442695, %v3423_v35 }
 0x980   : > { %4592 = vpow2.f32 %v3465_v52  ;;  %v8966_v48 = vld [vmem:[#allocation66_spill] sm:$0xff]  ;;  %v8968_v55 = vld [vmem:[#allocation68_spill] sm:$0xff]  ;;  %v8969_v25 = vld [vmem:[#allocation69_spill] sm:$0xff] }
 0x981   : > { %4594 = vpow2.f32 %v3469_v19  ;;  %v8970_v19 = vld [vmem:[#allocation70_spill] sm:$0xff]  ;;  %v8973_v38 = vld [vmem:[#allocation75_spill] sm:$0xff]  ;;  %v8975_v51 = vld [vmem:[#allocation73_spill] sm:$0xff] }
 0x982   : > { %4596 = vpow2.f32 %v3473_v23  ;;  %v8967_v23 = vld [vmem:[#allocation67_spill] sm:$0xff]  ;;  %v8972_v63 = vld [vmem:[#allocation74_spill] sm:$0xff]  ;;  %v8976_v6 = vld [vmem:[#allocation76_spill] sm:$0xff] }
 0x983   : > { %4598 = vpow2.f32 %v3477_v32  ;;  %v8974_v52 = vld [vmem:[#allocation71_spill] sm:$0xff]  ;;  %v8980_v5 = vld [vmem:[#allocation38_spill] sm:$0xff] }
 0x984   : > { %v7754_v61 = vpop.eup %4580  ;;  %4600 = vpow2.f32 %v3481_v8  ;;  %v8977_v10 = vld [vmem:[#allocation19_spill] sm:$0xff]  ;;  %v8979_v8 = vld [vmem:[#allocation21_spill] sm:$0xff] }
 0x985   : > { %v7762_v50 = vpop.eup %4582  ;;  %4602 = vpow2.f32 %v3485_v37  ;;  %v8971_v37 = vld [vmem:[#allocation72_spill] sm:$0xff]  ;;  %v8978_v26 = vld [vmem:[#allocation23_spill] sm:$0xff] }
 0x986   : > { %v7770_v24 = vpop.eup %4584  ;;  %4604 = vpow2.f32 %v3489_v30  ;;  %v3569_v35 = vadd.f32 %v7762_v50, %v7754_v61  ;;  %v8984_v30 = vld [vmem:[#allocation55_spill] sm:$0xff] }
 0x987   : > { %v7778_v11 = vpop.eup %4586  ;;  %4606 = vpow2.f32 %v3493_v20  ;;  %v8982_v20 = vld [vmem:[#allocation22_spill] sm:$0xff] }
 0x988   : > { %v7786_v3 = vpop.eup %4588  ;;  %4608 = vpow2.f32 %v3497_v44  ;;  %v3570_v32 = vadd.f32 %v7770_v24, %v3569_v35 }
 0x989   : > { %v7793_v53 = vpop.eup %4590  ;;  %4610 = vpow2.f32 %v3501_v0 }
 0x98a   : > { %v7801_v42 = vpop.eup %4592  ;;  %4612 = vpow2.f32 %v3505_v45  ;;  %v3571_v35 = vadd.f32 %v7778_v11, %v3570_v32 }
 0x98b   : > { %v7808_v9 = vpop.eup %4594  ;;  %4614 = vpow2.f32 %v3509_v34 }
 0x98c   : > { %v7816_v27 = vpop.eup %4596  ;;  %4616 = vpow2.f32 %v3513_v56  ;;  %v3572_v32 = vadd.f32 %v7786_v3, %v3571_v35  ;;  %v8986_v35 = vsub.f32 %v7620_v4, %v7668_v57 }
 0x98d   : > { %v7823_v36 = vpop.eup %4598  ;;  %4618 = vpow2.f32 %v3517_v2  ;;  %v8987_v2 = vsub.f32 %v7626_v13, %v7668_v57 }
 0x98e   : > { %v7831_v29 = vpop.eup %4600  ;;  %4620 = vpow2.f32 %v3521_v54  ;;  %v3537_v0 = vmul.f32 1.442695, %v8986_v35  ;;  %v3573_v34 = vadd.f32 %v7793_v53, %v3572_v32  ;;  %v8988_v54 = vsub.f32 %v7632_v15, %v7668_v57 }
 0x98f   : > { %v7837_v59 = vpop.eup %4602  ;;  %4622 = vpow2.f32 %v7740_v31  ;;  %v3541_v45 = vmul.f32 1.442695, %v8987_v2  ;;  %v8989_v31 = vsub.f32 %v7638_v16, %v7668_v57  ;;  %v8993_v16 = vsub.f32 %v7656_v22, %v7668_v57 }
 0x990   : > { %v7843_v44 = vpop.eup %4604  ;;  %4624 = vpow2.f32 %v7742_v14  ;;  %v3545_v56 = vmul.f32 1.442695, %v8988_v54  ;;  %v3574_v4 = vadd.f32 %v7801_v42, %v3573_v34  ;;  %v8990_v14 = vsub.f32 %v7644_v18, %v7668_v57 }
 0x991   : > { %v7850_v35 = vpop.eup %4606  ;;  %4626 = vpow2.f32 %v7744_v49  ;;  %v3549_v32 = vmul.f32 1.442695, %v8989_v31  ;;  %v8991_v34 = vsub.f32 %v7650_v28, %v7668_v57 }
 0x992   : > { %v7856_v13 = vpop.eup %4608  ;;  %4628 = vpow2.f32 %v3537_v0  ;;  %v3553_v2 = vmul.f32 1.442695, %v8990_v14  ;;  %v3575_v15 = vadd.f32 %v7808_v9, %v3574_v4  ;;  %v3561_v0 = vmul.f32 1.442695, %v8993_v16 }
 0x993   : > { %v7862_v54 = vpop.eup %4610  ;;  %4630 = vpow2.f32 %v3541_v45  ;;  %v3557_v49 = vmul.f32 1.442695, %v8991_v34  ;;  %v8994_v4 = vsub.f32 %v7662_v47, %v7668_v57  ;;  %v8997_v57 = vsub.f32 %v7488_v33, %v7670_v46 }
 0x994   : > { %v7867_v17 = vpop.eup %4612  ;;  %4632 = vpow2.f32 %v3545_v56  ;;  %v3576_v31 = vadd.f32 %v7816_v27, %v3575_v15  ;;  %v8995_v56 = vsub.f32 %v7478_v40, %v7670_v46  ;;  %v8996_v15 = vsub.f32 %v7482_v60, %v7670_v46 }
 0x995   : > { %8992 = vst [vmem:[#allocation31_spill] sm:$0xff] %v7867_v17  ;;  %v7873_v18 = vpop.eup %4614  ;;  %4634 = vpow2.f32 %v3549_v32  ;;  %v3565_v45 = vmul.f32 1.442695, %v8994_v4  ;;  %v3451_v47 = vmul.f32 1.442695, %v8997_v57  ;;  %v8998_v40 = vsub.f32 %v7496_v39, %v7670_v46 }
 0x996   : > { %v7878_v14 = vpop.eup %4616  ;;  %4636 = vpow2.f32 %v3553_v2  ;;  %v3577_v28 = vadd.f32 %v7823_v36, %v3576_v31  ;;  %v3443_v34 = vmul.f32 1.442695, %v8995_v56  ;;  %v3447_v32 = vmul.f32 1.442695, %v8996_v15 }
 0x997   : > { %v7884_v22 = vpop.eup %4618  ;;  %4638 = vpow2.f32 %v3557_v49  ;;  %v3455_v31 = vmul.f32 1.442695, %v8998_v40  ;;  %v8999_v49 = vsub.f32 %v7503_v21, %v7670_v46  ;;  %v9000_v60 = vsub.f32 %v7509_v7, %v7670_v46 }
 0x998   : > { %v7892_v16 = vpop.eup %4620  ;;  %4640 = vpow2.f32 %v3561_v0  ;;  %v3578_v2 = vadd.f32 %v7831_v29, %v3577_v28  ;;  %v9001_v0 = vsub.f32 %v7515_v43, %v7670_v46  ;;  %v9002_v28 = vsub.f32 %v7521_v62, %v7670_v46 }
 0x999   : > { %v3459_v4 = vmul.f32 1.442695, %v8999_v49  ;;  %v7901_v56 = vpop.eup %4622  ;;  %4642 = vpow2.f32 %v3565_v45  ;;  %v3463_v33 = vmul.f32 1.442695, %v9000_v60  ;;  %v9003_v45 = vsub.f32 %v7527_v12, %v7670_v46 }
 0x99a   : > { %v3467_v15 = vmul.f32 1.442695, %v9001_v0  ;;  %v3471_v39 = vmul.f32 1.442695, %v9002_v28  ;;  %v7912_v57 = vpop.eup %4624  ;;  %v3579_v21 = vadd.f32 %v7837_v59, %v3578_v2  ;;  %4644 = vpow2.f32 %v3443_v34 }
 0x99b   : > { %v3475_v40 = vmul.f32 1.442695, %v9003_v45  ;;  %v9004_v7 = vsub.f32 %v7533_v1, %v7670_v46  ;;  %v7921_v60 = vpop.eup %4626  ;;  %4646 = vpow2.f32 %v3447_v32 }
 0x99c   : > { %v7929_v2 = vpop.eup %4628  ;;  %v3580_v12 = vadd.f32 %v7843_v44, %v3579_v21  ;;  %4648 = vpow2.f32 %v3451_v47 }
 0x99d   : > { %v3479_v49 = vmul.f32 1.442695, %v9004_v7  ;;  %v7936_v0 = vpop.eup %4630  ;;  %4650 = vpow2.f32 %v3455_v31  ;;  %v9005_v31 = vsub.f32 %v7539_v58, %v7670_v46  ;;  %v9006_v7 = vsub.f32 %v8966_v48, %v7670_v46 }
 0x99e   : > { %v7944_v21 = vpop.eup %4632  ;;  %v3581_v47 = vadd.f32 %v7850_v35, %v3580_v12  ;;  %4652 = vpow2.f32 %v3459_v4 }
 0x99f   : > { %v7951_v1 = vpop.eup %4634  ;;  %4654 = vpow2.f32 %v3463_v33  ;;  %v3483_v32 = vmul.f32 1.442695, %v9005_v31  ;;  %v3487_v45 = vmul.f32 1.442695, %v9006_v7 }
 0x9a0   : > { %v7959_v12 = vpop.eup %4636  ;;  %v3582_v4 = vadd.f32 %v7856_v13, %v3581_v47  ;;  %4656 = vpow2.f32 %v3467_v15  ;;  %v9007_v15 = vsub.f32 %v8967_v23, %v7670_v46  ;;  %v9012_v23 = vsub.f32 %v8972_v63, %v7670_v46 }
 0x9a1   : > { %v7967_v34 = vpop.eup %4638  ;;  %4658 = vpow2.f32 %v3471_v39  ;;  %v9008_v39 = vsub.f32 %v8968_v55, %v7670_v46  ;;  %v9011_v55 = vsub.f32 %v8971_v37, %v7670_v46  ;;  %v9015_v63 = vsub.f32 %v8975_v51, %v7670_v46 }
 0x9a2   : > { %v7972_v28 = vpop.eup %4640  ;;  %v3583_v62 = vadd.f32 %v7862_v54, %v3582_v4  ;;  %4660 = vpow2.f32 %v3475_v40  ;;  %v3491_v58 = vmul.f32 1.442695, %v9007_v15  ;;  %v9009_v40 = vsub.f32 %v8969_v25, %v7670_v46 }
 0x9a3   : > { %v7980_v31 = vpop.eup %4642  ;;  %4662 = vpow2.f32 %v3479_v49  ;;  %v3495_v48 = vmul.f32 1.442695, %v9008_v39  ;;  %v9010_v49 = vsub.f32 %v8970_v19, %v7670_v46  ;;  %v3507_v39 = vmul.f32 1.442695, %v9011_v55 }
 0x9a4   : > { %v4645_v7 = vpop.eup %4644  ;;  %v3584_v33 = vadd.f32 %v7867_v17, %v3583_v62  ;;  %4664 = vpow2.f32 %v3483_v32  ;;  %v3499_v4 = vmul.f32 1.442695, %v9009_v40  ;;  %v9013_v19 = vsub.f32 %v8973_v38, %v7670_v46 }
 0x9a5   : > { %v4647_v15 = vpop.eup %4646  ;;  %4666 = vpow2.f32 %v3487_v45  ;;  %v3503_v47 = vmul.f32 1.442695, %v9010_v49  ;;  %v3511_v45 = vmul.f32 1.442695, %v9012_v23  ;;  %v3523_v23 = vmul.f32 1.442695, %v9015_v63 }
 0x9a6   : > { %v4649_v43 = vpop.eup %4648  ;;  %v3585_v62 = vadd.f32 %v7873_v18, %v3584_v33  ;;  %4668 = vpow2.f32 %v3491_v58  ;;  %v3606_v32 = vadd.f32 %v4647_v15, %v4645_v7  ;;  %v3650_v25 = vpack.c.bf16 %v4647_v15, %v4645_v7 }
 0x9a7   : > { %v4651_v40 = vpop.eup %4650  ;;  %4670 = vpow2.f32 %v3495_v48  ;;  %v3515_v49 = vmul.f32 1.442695, %v9013_v19  ;;  %v9014_v48 = vsub.f32 %v8974_v52, %v7670_v46  ;;  %v9016_v38 = vpack.c.bf16 %v7762_v50, %v7754_v61 }
 0x9a8   : > { %v4653_v17 = vpop.eup %4652  ;;  %v3586_v37 = vadd.f32 %v7878_v14, %v3585_v62  ;;  %4672 = vpow2.f32 %v3499_v4  ;;  %v3607_v55 = vadd.f32 %v4649_v43, %v3606_v32  ;;  %3681 = vmatprep.subr.bf16.mxu0 %v3650_v25  ;;  %v3652_v33 = vpack.c.bf16 %v4651_v40, %v4649_v43 }
 0x9a9   : > { %v4655_v58 = vpop.eup %4654  ;;  %4674 = vpow2.f32 %v3503_v47  ;;  %v3519_v7 = vmul.f32 1.442695, %v9014_v48  ;;  %3682 = vmatpush1.bf16.msra.mxu0 %v9016_v38  ;;  %v9017_v52 = vsub.f32 %v8976_v6, %v7670_v46  ;;  %v9018_v51 = vsub.f32 %v8977_v10, %v7670_v46  ;;  %v9023_v38 = vld [vmem:[#allocation42_spill] sm:$0xff] }
 0x9aa   : > { %v4657_v15 = vpop.eup %4656  ;;  %v3587_v4 = vadd.f32 %v7884_v22, %v3586_v37  ;;  %4676 = vpow2.f32 %v3507_v39  ;;  %v3608_v62 = vadd.f32 %v4651_v40, %v3607_v55  ;;  %3683 = vmatprep.subr.bf16.mxu0 %v3652_v33  ;;  %v3654_v43 = vpack.c.bf16 %v4655_v58, %v4653_v17 }
 0x9ab   : > { %v4659_v47 = vpop.eup %4658  ;;  %4678 = vpow2.f32 %v3511_v45  ;;  %v3527_v32 = vmul.f32 1.442695, %v9017_v52  ;;  %v3531_v25 = vmul.f32 1.442695, %v9018_v51  ;;  %v9019_v40 = vsub.f32 %v8978_v26, %v7670_v46 }
 0x9ac   : > { %v4661_v19 = vpop.eup %4660  ;;  %v3588_v61 = vadd.f32 %v7892_v16, %v3587_v4  ;;  %4680 = vpow2.f32 %v3515_v49  ;;  %v3609_v50 = vadd.f32 %v4653_v17, %v3608_v62  ;;  %v3656_v37 = vpack.c.bf16 %v4659_v47, %v4657_v15 }
 0x9ad   : > { %v4663_v39 = vpop.eup %4662  ;;  %4682 = vpow2.f32 %v3519_v7  ;;  %v3535_v45 = vmul.f32 1.442695, %v9019_v40  ;;  %v9020_v6 = vsub.f32 %v8979_v8, %v7670_v46  ;;  %v9021_v10 = vpack.c.bf16 %v7778_v11, %v7770_v24 }
 0x9ae   : > { %v4665_v33 = vpop.eup %4664  ;;  %v3589_v48 = vadd.f32 %v7901_v56, %v3588_v61  ;;  %4684 = vpow2.f32 %v3523_v23  ;;  %v3610_v17 = vadd.f32 %v4655_v58, %v3609_v50  ;;  %v3658_v49 = vpack.c.bf16 %v4663_v39, %v4661_v19 }
 0x9af   : > { %v3539_v55 = vmul.f32 1.442695, %v9020_v6  ;;  %3684 = vmatpush1.bf16.msra.mxu0 %v9021_v10  ;;  %v4667_v7 = vpop.eup %4666  ;;  %4686 = vpow2.f32 %v3527_v32  ;;  %v9022_v26 = vsub.f32 %v8980_v5, %v7670_v46  ;;  %v9024_v8 = vsub.f32 %v9023_v38, %v7670_v46  ;;  %v9026_v32 = vld [vmem:[#allocation39_spill] sm:$0xff] }
 0x9b0   : > { %3685 = vmatprep.subr.bf16.mxu0 %v3654_v43  ;;  %v4669_v62 = vpop.eup %4668  ;;  %v3590_v24 = vadd.f32 %v7912_v57, %v3589_v48  ;;  %4688 = vpow2.f32 %v3531_v25  ;;  %v3611_v11 = vadd.f32 %v4657_v15, %v3610_v17  ;;  %v3660_v52 = vpack.c.bf16 %v4667_v7, %v4665_v33 }
 0x9b1   : > { %v3543_v63 = vmul.f32 1.442695, %v9022_v26  ;;  %v3547_v4 = vmul.f32 1.442695, %v9024_v8  ;;  %v4671_v23 = vpop.eup %4670  ;;  %4690 = vpow2.f32 %v3535_v45  ;;  %v9025_v58 = vsub.f32 %v8982_v20, %v7670_v46 }
 0x9b2   : > { %v9027_v5 = vsub.f32 %v9026_v32, %v7670_v46  ;;  %v9028_v61 = vpack.c.bf16 %v7793_v53, %v7786_v3  ;;  %v4673_v50 = vpop.eup %4672  ;;  %v3591_v40 = vadd.f32 %v7921_v60, %v3590_v24  ;;  %4692 = vpow2.f32 %v3539_v55 }
 0x9b3   : > { %v3551_v43 = vmul.f32 1.442695, %v9025_v58  ;;  %v3612_v15 = vadd.f32 %v4659_v47, %v3611_v11  ;;  %v3662_v25 = vpack.c.bf16 %v4671_v23, %v4669_v62  ;;  %v4675_v45 = vpop.eup %4674  ;;  %4694 = vpow2.f32 %v3543_v63  ;;  %v9031_v47 = vld [vmem:[#allocation27_spill] sm:$0xff] }
 0x9b4   : > { %v3555_v51 = vmul.f32 1.442695, %v9027_v5  ;;  %3686 = vmatpush1.bf16.msra.mxu0 %v9028_v61  ;;  %v9029_v20 = vsub.f32 %v8984_v30, %v7670_v46  ;;  %v9030_v10 = vsub.f32 %v8985_v41, %v7670_v46  ;;  %v4677_v17 = vpop.eup %4676  ;;  %v3592_v53 = vadd.f32 %v7929_v2, %v3591_v40 }
 0x9b5   : > { %3687 = vmatprep.subr.bf16.mxu0 %v3656_v37  ;;  %4696 = vpow2.f32 %v3547_v4  ;;  %v3613_v3 = vadd.f32 %v4661_v19, %v3612_v15  ;;  %v3664_v26 = vpack.c.bf16 %v4675_v45, %v4673_v50  ;;  %v4679_v55 = vpop.eup %4678  ;;  %v9032_v37 = vsub.f32 %v9031_v47, %v7670_v46 }
 0x9b6   : > { %v3559_v6 = vmul.f32 1.442695, %v9029_v20  ;;  %v3563_v48 = vmul.f32 1.442695, %v9030_v10  ;;  %4698 = vpow2.f32 %v3551_v43  ;;  %v9033_v30 = vpack.c.bf16 %v7808_v9, %v7801_v42  ;;  %v4681_v38 = vpop.eup %4680 }
 0x9b7   : > { %v3567_v63 = vmul.f32 1.442695, %v9032_v37  ;;  %v3593_v41 = vadd.f32 %v7936_v0, %v3592_v53  ;;  %4700 = vpow2.f32 %v3555_v51  ;;  %v3614_v8 = vadd.f32 %v4663_v39, %v3613_v3  ;;  %v4683_v4 = vpop.eup %4682 }
 0x9b8   : > { %3688 = vmatpush1.bf16.msra.mxu0 %v9033_v30  ;;  %v3666_v24 = vpack.c.bf16 %v4679_v55, %v4677_v17  ;;  %4702 = vpow2.f32 %v3559_v6  ;;  %v4685_v19 = vpop.eup %4684  ;;  %v3668_v46 = vpack.c.bf16 %v4683_v4, %v4681_v38  ;;  %v9034_v9 = vpack.c.bf16 %v7823_v36, %v7816_v27 }
 0x9b9   : > { %3689 = vmatprep.subr.bf16.mxu0 %v3658_v49  ;;  %v3594_v11 = vadd.f32 %v7944_v21, %v3593_v41  ;;  %4704 = vpow2.f32 %v3563_v48  ;;  %v3615_v58 = vadd.f32 %v4665_v33, %v3614_v8  ;;  %v4687_v43 = vpop.eup %4686  ;;  %v9035_v20 = vpack.c.bf16 %v7837_v59, %v7831_v29 }
 0x9ba   : > { %4706 = vpow2.f32 %v3567_v63  ;;  %v4689_v42 = vpop.eup %4688  ;;  %v3670_v49 = vpack.c.bf16 %v4687_v43, %v4685_v19  ;;  %v9037_v41 = vpack.c.bf16 %v7862_v54, %v7856_v13  ;;  %v9041_v13 = vpack.c.bf16 %v7901_v56, %v7892_v16 }
 0x9bb   : > { %v3595_v32 = vadd.f32 %v7951_v1, %v3594_v11  ;;  %v3616_v39 = vadd.f32 %v4667_v7, %v3615_v58  ;;  %v4691_v5 = vpop.eup %4690  ;;  %v9038_v11 = vld [vmem:[#allocation31_spill] sm:$0xff]  ;;  %v9044_v16 = vpack.c.bf16 %v7951_v1, %v7944_v21  ;;  %v9051_v1 = vld [vmem:[#allocation46_spill] sm:$0xff] }
 0x9bc   : > { %3690 = vmatpush1.bf16.msra.mxu0 %v9034_v9  ;;  %v4693_v51 = vpop.eup %4692  ;;  %v3672_v15 = vpack.c.bf16 %v4691_v5, %v4689_v42  ;;  %v9050_v9 = vld [vmem:[#allocation48_spill] sm:$0xff] }
 0x9bd   : > { %3691 = vmatprep.subr.bf16.mxu0 %v3660_v52  ;;  %v3596_v61 = vadd.f32 %v7959_v12, %v3595_v32  ;;  %v3617_v40 = vadd.f32 %v4669_v62, %v3616_v39  ;;  %v4695_v33 = vpop.eup %4694  ;;  %v9036_v62 = vpack.c.bf16 %v7850_v35, %v7843_v44  ;;  %v9039_v44 = vpack.c.bf16 %v7873_v18, %v9038_v11  ;;  %v9054_v32 = vld [vmem:[#allocation51_spill] sm:$0xff]  ;;  %v9088_v11 = vld [vmem:[#allocation49_spill] sm:$0xff] }
 0x9be   : > { %v3674_v10 = vpack.c.bf16 %v4695_v33, %v4693_v51  ;;  %v9042_v18 = vpack.c.bf16 %v7921_v60, %v7912_v57  ;;  %v9045_v57 = vpack.c.bf16 %v7967_v34, %v7959_v12  ;;  %v9052_v21 = vpack.c.bf16 %v9050_v9, %v9051_v1  ;;  %v9057_v12 = vld [vmem:[#allocation58_spill] sm:$0xff] }
 0x9bf   : > { %v4697_v6 = vpop.eup %4696  ;;  %v3597_v36 = vadd.f32 %v7967_v34, %v3596_v61  ;;  %v3618_v27 = vadd.f32 %v4671_v23, %v3617_v40  ;;  %v9056_v34 = vld [vmem:[#allocation15_spill] sm:$0xff]  ;;  %v9063_v61 = vld [vmem:[#allocation14_spill] sm:$0xff] }
 0x9c0   : > { %3692 = vmatpush1.bf16.msra.mxu0 %v9035_v20  ;;  %v4699_v7 = vpop.eup %4698 }
 0x9c1   : > { %3693 = vmatprep.subr.bf16.mxu0 %v3662_v25  ;;  %v4701_v52 = vpop.eup %4700  ;;  %v3598_v48 = vadd.f32 %v7972_v28, %v3597_v36  ;;  %v3619_v53 = vadd.f32 %v4673_v50, %v3618_v27  ;;  %v3676_v3 = vpack.c.bf16 %v4699_v7, %v4697_v6  ;;  %v9069_v36 = vld [vmem:[#allocation50_spill] sm:$0xff] }
 0x9c2   : > { %v4703_v47 = vpop.eup %4702 }
 0x9c3   : > { %v4705_v37 = vpop.eup %4704  ;;  %v3599_v59 = vadd.f32 %v7980_v31, %v3598_v48  ;;  %v3620_v29 = vadd.f32 %v4675_v45, %v3619_v53  ;;  %v3678_v63 = vpack.c.bf16 %v4703_v47, %v4701_v52  ;;  %v9040_v45 = vpack.c.bf16 %v7884_v22, %v7878_v14  ;;  %v9075_v53 = vld [vmem:[#allocation64_spill] sm:$0xff] }
 0x9c4   : > { %3694 = vmatpush1.bf16.msra.mxu0 %v9036_v62  ;;  %v4707_v23 = vpop.eup %4706  ;;  %v9043_v14 = vpack.c.bf16 %v7936_v0, %v7929_v2  ;;  %v9046_v2 = vpack.c.bf16 %v7980_v31, %v7972_v28  ;;  %v9047_v0 = vld [vmem:[#allocation13_spill] sm:$0xff]  ;;  %v9074_v48 = vmov 0.0   ;;  %v9078_v62 = vld [vmem:[#allocation63_spill] sm:$0xff] }
 0x9c5   : > { %3695 = vmatprep.subr.bf16.mxu0 %v3664_v26  ;;  %v3621_v25 = vadd.f32 %v4677_v17, %v3620_v29  ;;  %v3680_v30 = vpack.c.bf16 %v4707_v23, %v4705_v37  ;;  %v9062_v31 = vld [vmem:[#allocation37_spill] sm:$0xff] }
 0x9c6   : > { %v9064_v40 = vpack.c.bf16 %v9062_v31, %v9063_v61 }
 0x9c7   : > { %v3622_v50 = vadd.f32 %v4679_v55, %v3621_v25 }
 0x9c8   : > { %3696 = vmatpush1.bf16.msra.mxu0 %v9037_v41  ;;  %v9085_v41 = vld [vmem:[#allocation25_spill] sm:$0xff] }
 0x9c9   : > { %3697 = vmatprep.subr.bf16.mxu0 %v3666_v24  ;;  %v3623_v8 = vadd.f32 %v4681_v38, %v3622_v50 }
 0x9cb   : > { %v3624_v35 = vadd.f32 %v4683_v4, %v3623_v8  ;;  %v9087_v8 = vld [vmem:[#allocation65_spill] sm:$0xff] }
 0x9cc   : > { %3698 = vmatpush1.bf16.msra.mxu0 %v9039_v44  ;;  %v9089_v44 = vpack.c.bf16 %v9087_v8, %v9088_v11 }
 0x9cd   : > { %3699 = vmatprep.subr.bf16.mxu0 %v3668_v46  ;;  %v3625_v58 = vadd.f32 %v4685_v19, %v3624_v35  ;;  %v9048_v46 = vld [vmem:[#allocation59_spill] sm:$0xff] }
 0x9ce   : > { %v9090_v35 = vld [vmem:[#allocation47_spill] sm:$0xff] }
 0x9cf   : > { %v3626_v17 = vadd.f32 %v4687_v43, %v3625_v58  ;;  %v9049_v43 = vpack.c.bf16 %v9047_v0, %v9048_v46  ;;  %v9091_v58 = vld [vmem:[#allocation40_spill] sm:$0xff] }
 0x9d0   : > { %3700 = vmatpush1.bf16.msra.mxu0 %v9040_v45  ;;  %v9092_v45 = vpack.c.bf16 %v9090_v35, %v9091_v58 }
 0x9d1   : > { %3701 = vmatprep.subr.bf16.mxu0 %v3670_v49  ;;  %v3627_v26 = vadd.f32 %v4689_v42, %v3626_v17  ;;  %v9053_v42 = vld [vmem:[#allocation54_spill] sm:$0xff]  ;;  %v9058_v49 = vpack.c.bf16 %v9056_v34, %v9057_v12 }
 0x9d2   : > { %v9055_v39 = vpack.c.bf16 %v9053_v42, %v9054_v32  ;;  %v231_v17 = vld [vmem:[%s8210_s3] sm:$0xf] }
 0x9d3   : > { %v3628_v54 = vadd.f32 %v4691_v5, %v3627_v26  ;;  %v9059_v5 = vld [vmem:[#allocation61_spill] sm:$0xff]  ;;  %3784 = vperm.xlu0 %4181, %v231_v17   ;;  %v3600_v26 = vrot.slane %v3599_v59, 4 }
 0x9d4   : > { %3702 = vmatpush1.bf16.msra.mxu0 %v9041_v13 }
 0x9d5   : > { %3703 = vmatprep.subr.bf16.mxu0 %v3672_v15  ;;  %v3629_v55 = vadd.f32 %v4693_v51, %v3628_v54  ;;  %v9060_v51 = vld [vmem:[#allocation12_spill] sm:$0xff]  ;;  %v3601_v54 = vadd.f32 %v3600_v26, %v3599_v59 }
 0x9d6   : > { %v9061_v28 = vpack.c.bf16 %v9059_v5, %v9060_v51  ;;  %v9065_v15 = vld [vmem:[#allocation36_spill] sm:$0xff] }
 0x9d7   : > { %v3630_v38 = vadd.f32 %v4695_v33, %v3629_v55  ;;  %v9066_v33 = vld [vmem:[#allocation18_spill] sm:$0xff] }
 0x9d8   : > { %3704 = vmatpush1.bf16.msra.mxu0 %v9042_v18  ;;  %v9067_v20 = vpack.c.bf16 %v9065_v15, %v9066_v33  ;;  %v3602_v18 = vrot.slane %v3601_v54, 2 }
 0x9d9   : > { %3705 = vmatprep.subr.bf16.mxu0 %v3674_v10  ;;  %v3631_v24 = vadd.f32 %v4697_v6, %v3630_v38  ;;  %v9068_v6 = vld [vmem:[#allocation53_spill] sm:$0xff]  ;;  %v9071_v10 = vld [vmem:[#allocation16_spill] sm:$0xff] }
 0x9da   : > { %v9070_v27 = vpack.c.bf16 %v9068_v6, %v9069_v36 }
 0x9db   : > { %v3632_v22 = vadd.f32 %v4699_v7, %v3631_v24  ;;  %v9072_v7 = vld [vmem:[#allocation17_spill] sm:$0xff]  ;;  %v3603_v24 = vadd.f32 %v3602_v18, %v3601_v54 }
 0x9dc   : > { %3706 = vmatpush1.bf16.msra.mxu0 %v9043_v14 }
 0x9dd   : > { %3707 = vmatprep.subr.bf16.mxu0 %v3676_v3  ;;  %v3633_v4 = vadd.f32 %v4701_v52, %v3632_v22  ;;  %v9073_v52 = vpack.c.bf16 %v9071_v10, %v9072_v7  ;;  %v9076_v3 = vld [vmem:[#allocation62_spill] sm:$0xff]  ;;  %v3604_v22 = vrot.slane %v3603_v24, 1 }
 0x9df   : > { %v3634_v56 = vadd.f32 %v4703_v47, %v3633_v4  ;;  %v9077_v47 = vpack.c.bf16 %v9075_v53, %v9076_v3 }
 0x9e0   : > { %3708 = vmatpush1.bf16.msra.mxu0 %v9044_v16  ;;  %v3605_v16 = vadd.f32 %v3604_v22, %v3603_v24 }
 0x9e1   : > { %3709 = vmatprep.subr.bf16.mxu0 %v3678_v63  ;;  %v3635_v19 = vadd.f32 %v4705_v37, %v3634_v56  ;;  %v9079_v37 = vld [vmem:[#allocation60_spill] sm:$0xff] }
 0x9e2   : > { %v9080_v29 = vpack.c.bf16 %v9078_v62, %v9079_v37  ;;  %v9081_v63 = vld [vmem:[#allocation52_spill] sm:$0xff]  ;;  %4708 = vrcp.f32 %v3605_v16 }
 0x9e3   : > { %v3636_v60 = vadd.f32 %v4707_v23, %v3635_v19  ;;  %v9082_v23 = vld [vmem:[#allocation26_spill] sm:$0xff] }
 0x9e4   : > { %3710 = vmatpush1.bf16.msra.mxu0 %v9045_v57  ;;  %v9083_v25 = vpack.c.bf16 %v9081_v63, %v9082_v23 }
 0x9e5   : > { %3711 = vmatprep.subr.bf16.mxu0 %v3680_v30  ;;  %v9084_v30 = vld [vmem:[#allocation24_spill] sm:$0xff]  ;;  %v3637_v13 = vrot.slane %v3636_v60, 4 }
 0x9e6   : > { %v9086_v50 = vpack.c.bf16 %v9084_v30, %v9085_v41 }
 0x9e7   : > { %v3638_v55 = vadd.f32 %v3637_v13, %v3636_v60 }
 0x9e8   : > { %3712 = vmatpush1.bf16.msra.mxu0 %v9046_v2 }
 0x9e9   : > { %4091 = vmatprep.subr.bf16.mxu0 %v9049_v43  ;;  %v3639_v38 = vrot.slane %v3638_v55, 2 }
 0x9eb   : > { %3714 = vmatmul.mubr.bf16.vlgmr.msra.gmra.mrb[168].mxu0 %v9052_v21  ;;  %v3640_v14 = vadd.f32 %v3639_v38, %v3638_v55 }
 0x9ec   : > { %3723 = vmatprep.mubr.bf16.mxu0 %v9055_v39  ;;  %4093 = vmatpush1.bf16.msra.mxu0 %v9058_v49  ;;  %v4709_v19 = vpop.eup %4708 }
 0x9ed   : > { %4095 = vmatprep.subr.bf16.mxu0 %v9061_v28  ;;  %v3641_v4 = vrot.slane %v3640_v14, 1 }
 0x9ef   : > { %v3642_v56 = vadd.f32 %v3641_v4, %v3640_v14 }
 0x9f0   : > { %4097 = vmatpush1.bf16.msra.mxu0 %v9064_v40  ;;  %v230_v40 = vld [vmem:[%s8209_s2] sm:$0xf] }
 0x9f1   : > { %4099 = vmatprep.subr.bf16.mxu0 %v9067_v20  ;;  %4710 = vrcp.f32 %v3642_v56 }
 0x9f3   : > { %3724 = vmatmul.mubr.bf16.gmra.mrb[172].mxu0 %v9070_v27 }
 0x9f4   : > { %4101 = vmatpush1.bf16.msra.mxu0 %v9073_v52  ;;  %3851 = vmatprep.mubr.f32.mxu0 %v9074_v48 }
 0x9f5   : > { %4103 = vmatprep.subr.bf16.mxu0 %v9077_v47 }
 0x9f8   : > { %4105 = vmatpush1.bf16.msra.mxu0 %v9080_v29 }
 0x9f9   : > { %4107 = vmatprep.subr.bf16.mxu0 %v9083_v25 }
 0x9fb   : > { %v4711_v2 = vpop.eup %4710 }
 0x9fc   : > { %4109 = vmatpush1.bf16.msra.mxu0 %v9086_v50 }
 0x9fd   : > { %4111 = vmatprep.subr.bf16.mxu0 %v9089_v44 }
 0xa00   : > { %4113 = vmatpush1.bf16.msra.mxu0 %v9092_v45 }
 0xa52   : > { %v3785_v15 = vpop.permute.xlu0 %3784 }
 0xabe   : > { %v3715_v57 = vpop.f32.mrb[168].mxu0 }
 0xabf   : > { %v3734_v0 = vmul.f32 %v4709_v19, %v3715_v57  ;;  %v3717_v46 = vpop.f32.mrb[169].mxu0 }
 0xac0   : > { %v3735_v43 = vmul.f32 %v4711_v2, %v3717_v46  ;;  %v3719_v9 = vpop.f32.mrb[170].mxu0 }
 0xac1   : > { %v3736_v1 = vmul.f32 %v4709_v19, %v3719_v9  ;;  %v3721_v59 = vpop.f32.mrb[171].mxu0 }
 0xac2   : > { %v3737_v60 = vmul.f32 %v4711_v2, %v3721_v59 }
 0xac3   : > { %v4116_v21 = vpack.c.bf16 %v3736_v1, %v3734_v0 }
 0xac4   : > { %v4114_v42 = vpack.c.bf16 %v3737_v60, %v3735_v43 }
 0xac6   : > { %v3725_v32 = vpop.f32.mrb[172].mxu0  ;;  %4115 = vmatprep.subr.bf16.mxu0 %v4114_v42 }
 0xac7   : > { %v3738_v39 = vmul.f32 %v4709_v19, %v3725_v32  ;;  %v3727_v34 = vpop.f32.mrb[173].mxu0  ;;  %4117 = vmatpush1.bf16.msra.mxu0 %v4116_v21 }
 0xac8   : > { %v3739_v12 = vmul.f32 %v4711_v2, %v3727_v34  ;;  %v3729_v49 = vpop.f32.mrb[174].mxu0 }
 0xac9   : > { %v3740_v5 = vmul.f32 %v4709_v19, %v3729_v49  ;;  %v3731_v51 = vpop.f32.mrb[175].mxu0 }
 0xaca   : > { %v3741_v28 = vmul.f32 %v4711_v2, %v3731_v51 }
 0xacb   : > { %v4120_v31 = vpack.c.bf16 %v3740_v5, %v3738_v39 }
 0xacc   : > { %v4118_v61 = vpack.c.bf16 %v3741_v28, %v3739_v12 }
 0xace   : > { %4119 = vmatprep.subr.bf16.mxu0 %v4118_v61 }
 0xacf   : > { %4121 = vmatpush1.bf16.msra.mxu0 %v4120_v31 }
 0xad2   : > { %3852 = vmatmul.mubr.f32.vlgmr.msra.gmra.mrb[176].mxu0 %v230_v40 }
 0xba5   : > { %v3853_v33 = vpop.f32.mrb[176].mxu0 }
 0xba6   : > { %v3855_v20 = vpop.f32.mrb[177].mxu0  ;;  %v3854_v6 = vadd.f32 %v3853_v33, %v3785_v15 }
 0xba7   : > { %v3856_v36 = vadd.f32 %v3855_v20, %v3785_v15 }
 0xba9   : > { %v3860_v27 = vcombine.low %v3854_v6, %v3856_v36 }
 0xbab   : > { %3862 = vst [vmem:[%s226_s9] sm:$0xff] %v3860_v27 }
 0xbac   : > { %4783 = shalt.err (!%p4780_p10)
}
 0xbad   : > { %s4784_s29 = scalar_lea.hbm %s8163_s27, 128  ;;  %s4788_s21 = scalar_lea.hbm %s8211_s4, 256 }
 0xbae   : > { %p4785_p1 = scmp.ne.s32.totalorder %s8163_s27, %s4784_s29  ;;  %p4789_p3 = scmp.lt.u32.totalorder %s8163_s27, %s8211_s4 }
 0xbaf   : > { %p4790_p11 = scmp.lt.u32.totalorder %s4788_s21, %s4784_s29  ;;  %p4792_p6 = scmp.lt.u32.totalorder %s4784_s29, %s8163_s27 }
 0xbb0   : > { %p4786_p2 = pnand %p4785_p1, %p4964_p8 }
 0xbb1   : > { %p4791_p4 = por %p4790_p11, %p4789_p3 }
 0xbb2   : > { %p4787_p7 = pneg %p4786_p2 }
 0xbb3   : > { %p4793_p9 = por %p4792_p6, %p4791_p4 }
 0xbb5   : > { %p4794_p12 = pnand %p4793_p9, %p4787_p7 }
 0xbb7   : > { %4797 = shalt.err (!%p4794_p12)
}
 0xbb8   : > { %4128 = dma.vmem_to_hbm [thread:$0]  (%p4964_p8), %s8165_s13, 128, %s8163_s27, %s3864_s5  }
 0xbb9 PF: > { %s3890_s30 = sand.u32 1, %s4828_s15   ;;  %p9093_p13 = scmp.ne.s32.totalorder %s8468_s22, 0 }
 0xbba   : > { %p9094_p0 = scmp.ge.s32.totalorder %s4840_s18, 2  ;;  %s3891_s8 = scalar_lea.sflag [#allocation5], %s3890_s30 }
 0xbbc   : > { %p4139_p5 = pnand %p9094_p0, %p9093_p13 }
 0xbbe   : > { %4823 = dma.done.wait (!%p4139_p5), %s3891_s8, 128  }
 0xbbf   : > { %4825 = vsyncadd (!%p4139_p5), %s3891_s8, 4294967168  ;;  %p18_p10 = scmp.ge.s32.totalorder %s4920_s26, 4   ;;  %s9095_s15 = smov %s4832_s16 }
 0xbc0   : > { %s9096_s16 = smov %s4836_s17  ;;  %s9097_s17 = smov %s4956_s20 }
 0xbc1   : > { %s9098_s18 = smov %s4920_s26  ;;  %20 = sbr.rel (!%p18_p10) target bundleno = 6 (0x6), region = 85 }
 0xbc8   :  { %3896 = vsyncpa [#allocation4], 1 }
 0xbc9   :  { %3898 = vsyncpa [#allocation4 + $0x1], 1 }
 0xbca   :  { %3899 = vsyncpa [#allocation7], 1 }
 0xbcb   :  { %3900 = vsyncpa [#allocation5], 1 }
 0xbcc   :  { %3902 = vsyncpa [#allocation5 + $0x1], 1 }

</bundles_post_ra>
